<compile_context>
chip_gen: v5e
topology: v5e:2x2
jax: 0.10.0
libtpu: 0.0.40
codegen_flags: <defaults>
</compile_context>

<pallas_src>
import jax
import jax.numpy as jnp
from jax.experimental import pallas as pl
from jax.experimental.pallas import tpu as pltpu

# ----------------------------- model config ---------------------------------
IMAGE_SIZE = 16
PATCH = 4
CHANNELS = 4
DIM = 32
DEPTH = 2
HEADS = 4
DIM_HEAD = 8
MLP_DIM = 64
NUM_CLASSES = 10

INNER = HEADS * DIM_HEAD                    # 32
NUM_PATCHES = (IMAGE_SIZE // PATCH) ** 2    # 16
SEQ = NUM_PATCHES + 1                       # 17 (cls token + patches)
PATCH_DIM = CHANNELS * PATCH * PATCH        # 64
LN_EPS = 1e-5
SCALE = DIM_HEAD ** (-0.5)

# dropout / emb_dropout are 0.0 in this configuration -> identity (no-op).


# ----------------------------- in-kernel helpers ----------------------------
def _erf(x):
    # TODO(synk): exact erf (PyTorch nn.GELU default) approximated in-kernel with
    # the Abramowitz&Stegun 7.1.26 polynomial (|err| < 1.5e-7); lax.erf is not
    # guaranteed to have a Mosaic lowering.
    p = 0.3275911
    a1, a2, a3, a4, a5 = 0.254829592, -0.284496736, 1.421413741, -1.453152027, 1.061405429
    s = jnp.where(x >= 0.0, 1.0, -1.0)
    ax = jnp.abs(x)
    t = 1.0 / (1.0 + p * ax)
    poly = ((((a5 * t + a4) * t + a3) * t + a2) * t + a1) * t
    return s * (1.0 - poly * jnp.exp(-ax * ax))


def _gelu_exact(x):
    return 0.5 * x * (1.0 + _erf(x * (2.0 ** -0.5)))


def _layernorm(x, w, b):
    mu = jnp.mean(x, axis=-1, keepdims=True)
    var = jnp.mean((x - mu) ** 2, axis=-1, keepdims=True)
    return (x - mu) * jax.lax.rsqrt(var + LN_EPS) * w + b


# ----------------------------- fused Pallas kernel ---------------------------
def vit_kernel(mixw_ref,                     # SMEM scalar-prefetch (DEPTH, 12)
               patches_ref,                  # (1, NP, PATCH_DIM)
               ew_ref, eb_ref, cls_ref, pos_ref,
               alnw_ref, alnb_ref, wqkv_ref, wout_ref, bout_ref,
               flnw_ref, flnb_ref, w1_ref, b1_ref, w2_ref, b2_ref,
               hlnw_ref, hlnb_ref, hw_ref, hb_ref,
               o_ref,                        # (1, 1, NUM_CLASSES)
               x0_ref):                      # VMEM scratch (SEQ, DIM)
    # ---- patch embedding: one (NP, PD) @ (PD, D) matmul for this batch element ----
    pb = patches_ref[0]                                        # (NP, PD)
    xe = jnp.dot(pb, ew_ref[...], preferred_element_type=jnp.float32) + eb_ref[...]
    pos = pos_ref[...]                                         # (SEQ, D)
    x0_ref[pl.ds(0, 1), :] = cls_ref[...] + pos[0:1, :]
    x0_ref[pl.ds(1, NUM_PATCHES), :] = xe + pos[1:, :]
    x = x0_ref[...]                                            # (SEQ, D)

    # ---- transformer with cross-layer V mixing ----
    v_hist = []                      # V's of already-run layers (later ones are exactly 0)
    for i in range(DEPTH):
        # --- PreNorm + Attention + residual ---
        xn = _layernorm(x, alnw_ref[i], alnb_ref[i])
        qkv = jnp.dot(xn, wqkv_ref[i], preferred_element_type=jnp.float32)  # (SEQ, 3*INNER)
        v = qkv[:, 2 * INNER:3 * INNER]                        # (SEQ, INNER)

        # Fold the V-mix once per layer:
        #   attn @ (v + sum_j mixw[j]*v_j) == attn@v + sum_j mixw[j]*(attn@v_j)
        v_eff = v
        for j, vj in enumerate(v_hist):
            v_eff = v_eff + mixw_ref[i, j] * vj

        wout = wout_ref[i]                                     # (INNER, D)
        proj = jnp.zeros((SEQ, DIM), jnp.float32)
        for h in range(HEADS):
            s0 = h * DIM_HEAD
            q_h = qkv[:, s0:s0 + DIM_HEAD]
            k_h = qkv[:, INNER + s0:INNER + s0 + DIM_HEAD]
            dots = jax.lax.dot_general(
                q_h, k_h, (((1,), (1,)), ((), ())),
                preferred_element_type=jnp.float32) * SCALE    # (SEQ, SEQ)
            dots = dots - jnp.max(dots, axis=-1, keepdims=True)
            e = jnp.exp(dots)
            attn = e * pl.reciprocal(jnp.sum(e, axis=-1, keepdims=True), approx=True)
            out_h = jnp.dot(attn, v_eff[:, s0:s0 + DIM_HEAD],
                            preferred_element_type=jnp.float32)
            proj = proj + jnp.dot(out_h, wout[s0:s0 + DIM_HEAD, :],
                                  preferred_element_type=jnp.float32)
        x = x + proj + bout_ref[i]

        # --- PreNorm + MLP (Linear -> GELU -> Linear) + residual ---
        xn = _layernorm(x, flnw_ref[i], flnb_ref[i])
        hid = jnp.dot(xn, w1_ref[i], preferred_element_type=jnp.float32) + b1_ref[i]
        hid = _gelu_exact(hid)
        x = x + jnp.dot(hid, w2_ref[i], preferred_element_type=jnp.float32) + b2_ref[i]

        v_hist.append(v)

    # ---- mlp_head (LayerNorm + Linear) on the cls token ----
    xc = _layernorm(x[0:1, :], hlnw_ref[...], hlnb_ref[...])
    o_ref[0] = jnp.dot(xc, hw_ref[...], preferred_element_type=jnp.float32) + hb_ref[...]


# ----------------------------- full forward ---------------------------------
@jax.jit
def vit_forward(img, params):
    # glue: 'b c (h p1) (w p2) -> b (h w) (p1 p2 c)'
    B, C, H, W = img.shape
    hh, ww = H // PATCH, W // PATCH
    patches = img.reshape(B, C, hh, PATCH, ww, PATCH)
    patches = patches.transpose(0, 2, 4, 3, 5, 1).reshape(B, hh * ww, PATCH * PATCH * C)

    pe = params['embed']
    hd = params['head']
    la = [lp['attn'] for lp in params['layers']]
    lf = [lp['ffn'] for lp in params['layers']]
    stack = lambda seq: jnp.stack(seq, axis=0)

    mixw_all = stack([a['mixw'] for a in la])                  # (DEPTH, 12) -> SMEM

    def full_spec(shape):
        n = len(shape)

        def idx(b, mw):            # same (full) block every grid step
            return (0,) * n

        return pl.BlockSpec(shape, idx)

    in_specs = [
        pl.BlockSpec((1, NUM_PATCHES, PATCH_DIM), lambda b, mw: (b, 0, 0)),  # patches
        full_spec((PATCH_DIM, DIM)),            # embed w
        full_spec((1, DIM)),                    # embed b
        full_spec((1, DIM)),                    # cls
        full_spec((SEQ, DIM)),                  # pos
        full_spec((DEPTH, 1, DIM)),             # attn ln_w
        full_spec((DEPTH, 1, DIM)),             # attn ln_b
        full_spec((DEPTH, DIM, 3 * INNER)),     # wqkv
        full_spec((DEPTH, INNER, DIM)),         # wout
        full_spec((DEPTH, 1, DIM)),             # bout
        full_spec((DEPTH, 1, DIM)),             # ffn ln_w
        full_spec((DEPTH, 1, DIM)),             # ffn ln_b
        full_spec((DEPTH, DIM, MLP_DIM)),       # w1
        full_spec((DEPTH, 1, MLP_DIM)),         # b1
        full_spec((DEPTH, MLP_DIM, DIM)),       # w2
        full_spec((DEPTH, 1, DIM)),             # b2
        full_spec((1, DIM)),                    # head ln_w
        full_spec((1, DIM)),                    # head ln_b
        full_spec((DIM, NUM_CLASSES)),          # head w
        full_spec((1, NUM_CLASSES)),            # head b
    ]

    grid_spec = pltpu.PrefetchScalarGridSpec(
        num_scalar_prefetch=1,
        grid=(B,),
        in_specs=in_specs,
        out_specs=pl.BlockSpec((1, 1, NUM_CLASSES), lambda b, mw: (b, 0, 0)),
        scratch_shapes=[pltpu.VMEM((SEQ, DIM), jnp.float32)],
    )

    out = pl.pallas_call(
        vit_kernel,
        grid_spec=grid_spec,
        out_shape=jax.ShapeDtypeStruct((B, 1, NUM_CLASSES), jnp.float32),
        compiler_params=pltpu.CompilerParams(
            dimension_semantics=("parallel",)),
    )(
        mixw_all, patches,
        pe['w'], pe['b'], pe['cls'], pe['pos'],
        stack([a['ln_w'] for a in la]), stack([a['ln_b'] for a in la]),
        stack([a['wqkv'] for a in la]), stack([a['wout'] for a in la]),
        stack([a['bout'] for a in la]),
        stack([f['ln_w'] for f in lf]), stack([f['ln_b'] for f in lf]),
        stack([f['w1'] for f in lf]), stack([f['b1'] for f in lf]),
        stack([f['w2'] for f in lf]), stack([f['b2'] for f in lf]),
        hd['ln_w'], hd['ln_b'], hd['w'], hd['b'],
    )
    return out.reshape(B, NUM_CLASSES)


# ----------------------------- pure-JAX reference ---------------------------
def _layernorm_ref(x, w, b):
    mu = x.mean(-1, keepdims=True)
    var = ((x - mu) ** 2).mean(-1, keepdims=True)
    return (x - mu) / jnp.sqrt(var + LN_EPS) * w + b


def vit_reference(img, params):
    B, C, H, W = img.shape
    hh, ww = H // PATCH, W // PATCH
    patches = img.reshape(B, C, hh, PATCH, ww, PATCH)
    patches = patches.transpose(0, 2, 4, 3, 5, 1).reshape(B, hh * ww, PATCH * PATCH * C)

    pe = params['embed']
    x = patches @ pe['w'] + pe['b']
    cls = jnp.broadcast_to(pe['cls'][None], (B, 1, DIM))
    x = jnp.concatenate([cls, x], axis=1) + pe['pos'][None]

    V_list = [jnp.zeros((B, HEADS, SEQ, DIM_HEAD), jnp.float32) for _ in range(DEPTH)]
    for i in range(DEPTH):
        lp = params['layers'][i]
        ap = lp['attn']
        xn = _layernorm_ref(x, ap['ln_w'], ap['ln_b'])
        qkv = xn @ ap['wqkv']
        q, k, v = jnp.split(qkv, 3, axis=-1)
        tohead = lambda t: t.reshape(B, SEQ, HEADS, DIM_HEAD).transpose(0, 2, 1, 3)
        q, k, v = tohead(q), tohead(k), tohead(v)
        dots = jnp.einsum('bhnd,bhmd->bhnm', q, k) * SCALE
        attn = jax.nn.softmax(dots, axis=-1)
        out = jnp.einsum('bhnm,bhmd->bhnd', attn, v)
        for j, vmix in enumerate(V_list):
            out = out + jnp.einsum('bhnm,bhmd->bhnd', attn, vmix) * ap['mixw'][j]
        out = out.transpose(0, 2, 1, 3).reshape(B, SEQ, INNER)
        x = x + (out @ ap['wout'] + ap['bout'])

        fp = lp['ffn']
        xn = _layernorm_ref(x, fp['ln_w'], fp['ln_b'])
        hid = jax.nn.gelu(xn @ fp['w1'] + fp['b1'], approximate=False)
        x = (hid @ fp['w2'] + fp['b2']) + x
        V_list[i] = v

    hp = params['head']
    xc = _layernorm_ref(x[:, 0], hp['ln_w'], hp['ln_b'])
    return xc @ hp['w'] + hp['b']


# ----------------------------- parameters -----------------------------------
def init_params(key):
    keys = iter(jax.random.split(key, 64))

    def nrm(shape, scale):
        return (scale * jax.random.normal(next(keys), shape)).astype(jnp.float32)

    layers = []
    for _ in range(DEPTH):
        layers.append({
            'attn': {
                'ln_w': 1.0 + nrm((1, DIM), 0.1),
                'ln_b': nrm((1, DIM), 0.1),
                'wqkv': nrm((DIM, 3 * INNER), 0.02),    # to_qkv (bias=False)
                'wout': nrm((INNER, DIM), 0.02),        # to_out Linear
                'bout': nrm((1, DIM), 0.02),
                'mixw': nrm((12,), 1.0),                # nn.Parameter(torch.randn(12))
            },
            'ffn': {
                'ln_w': 1.0 + nrm((1, DIM), 0.1),
                'ln_b': nrm((1, DIM), 0.1),
                'w1': nrm((DIM, MLP_DIM), 0.02),
                'b1': nrm((1, MLP_DIM), 0.02),
                'w2': nrm((MLP_DIM, DIM), 0.02),
                'b2': nrm((1, DIM), 0.02),
            },
        })
    return {
        'embed': {
            'w': nrm((PATCH_DIM, DIM), 0.02),
            'b': nrm((1, DIM), 0.02),
            'cls': nrm((1, DIM), 0.5),
            'pos': nrm((SEQ, DIM), 0.5),
        },
        'layers': layers,
        'head': {
            'ln_w': 1.0 + nrm((1, DIM), 0.1),
            'ln_b': nrm((1, DIM), 0.1),
            'w': nrm((DIM, NUM_CLASSES), 0.02),
            'b': nrm((1, NUM_CLASSES), 0.02),
        },
    }


# ----------------------------- main ------------------------------------------
if __name__ == "__main__":
    root = jax.random.PRNGKey(0)
    pkey, xkey = jax.random.split(root)
    params = init_params(pkey)
    img = jax.random.normal(xkey, (2, CHANNELS, IMAGE_SIZE, IMAGE_SIZE), jnp.float32)

    out = vit_forward(img, params)
    out = jax.block_until_ready(out)
    assert out.shape == (2, NUM_CLASSES), out.shape

    ref = vit_reference(img, params)
    err = float(jnp.max(jnp.abs(out - ref)))
    if not jnp.allclose(out, ref, atol=2e-3, rtol=2e-3):
        raise AssertionError(f"Pallas ViT mismatch vs reference: max abs err = {err}")

    print("KERNEL_OK")
</pallas_src>

<mosaic_0001>
module attributes {stable_mosaic.version = 11 : i64} {
  func.func @vit_kernel(%arg0: i32, %arg1: memref<2x12xf32, #tpu.memory_space<smem>>, %arg2: memref<1x16x64xf32, #tpu.memory_space<vmem>>, %arg3: memref<64x32xf32, #tpu.memory_space<vmem>>, %arg4: memref<1x32xf32, #tpu.memory_space<vmem>>, %arg5: memref<1x32xf32, #tpu.memory_space<vmem>>, %arg6: memref<17x32xf32, #tpu.memory_space<vmem>>, %arg7: memref<2x1x32xf32, #tpu.memory_space<vmem>>, %arg8: memref<2x1x32xf32, #tpu.memory_space<vmem>>, %arg9: memref<2x32x96xf32, #tpu.memory_space<vmem>>, %arg10: memref<2x32x32xf32, #tpu.memory_space<vmem>>, %arg11: memref<2x1x32xf32, #tpu.memory_space<vmem>>, %arg12: memref<2x1x32xf32, #tpu.memory_space<vmem>>, %arg13: memref<2x1x32xf32, #tpu.memory_space<vmem>>, %arg14: memref<2x32x64xf32, #tpu.memory_space<vmem>>, %arg15: memref<2x1x64xf32, #tpu.memory_space<vmem>>, %arg16: memref<2x64x32xf32, #tpu.memory_space<vmem>>, %arg17: memref<2x1x32xf32, #tpu.memory_space<vmem>>, %arg18: memref<1x32xf32, #tpu.memory_space<vmem>>, %arg19: memref<1x32xf32, #tpu.memory_space<vmem>>, %arg20: memref<32x10xf32, #tpu.memory_space<vmem>>, %arg21: memref<1x10xf32, #tpu.memory_space<vmem>>, %arg22: memref<1x1x10xf32, #tpu.memory_space<vmem>>, %arg23: memref<17x32xf32, #tpu.memory_space<vmem>>) attributes {dimension_semantics = [#tpu.dimension_semantics<parallel>], iteration_bounds = array<i64: 2>, scalar_prefetch = 1 : i64, scratch_operands = 1 : i64, tpu.core_type = #tpu.core_type<tc>, window_params = [{transform_indices = @transform_0, window_bounds = array<i64: 1, 16, 64>}, {pipeline_mode = #tpu.pipeline_mode<synchronous>, transform_indices = @transform_1, window_bounds = array<i64: 64, 32>}, {pipeline_mode = #tpu.pipeline_mode<synchronous>, transform_indices = @transform_2, window_bounds = array<i64: 1, 32>}, {pipeline_mode = #tpu.pipeline_mode<synchronous>, transform_indices = @transform_3, window_bounds = array<i64: 1, 32>}, {pipeline_mode = #tpu.pipeline_mode<synchronous>, transform_indices = @transform_4, window_bounds = array<i64: 17, 32>}, {pipeline_mode = #tpu.pipeline_mode<synchronous>, transform_indices = @transform_5, window_bounds = array<i64: 2, 1, 32>}, {pipeline_mode = #tpu.pipeline_mode<synchronous>, transform_indices = @transform_6, window_bounds = array<i64: 2, 1, 32>}, {pipeline_mode = #tpu.pipeline_mode<synchronous>, transform_indices = @transform_7, window_bounds = array<i64: 2, 32, 96>}, {pipeline_mode = #tpu.pipeline_mode<synchronous>, transform_indices = @transform_8, window_bounds = array<i64: 2, 32, 32>}, {pipeline_mode = #tpu.pipeline_mode<synchronous>, transform_indices = @transform_9, window_bounds = array<i64: 2, 1, 32>}, {pipeline_mode = #tpu.pipeline_mode<synchronous>, transform_indices = @transform_10, window_bounds = array<i64: 2, 1, 32>}, {pipeline_mode = #tpu.pipeline_mode<synchronous>, transform_indices = @transform_11, window_bounds = array<i64: 2, 1, 32>}, {pipeline_mode = #tpu.pipeline_mode<synchronous>, transform_indices = @transform_12, window_bounds = array<i64: 2, 32, 64>}, {pipeline_mode = #tpu.pipeline_mode<synchronous>, transform_indices = @transform_13, window_bounds = array<i64: 2, 1, 64>}, {pipeline_mode = #tpu.pipeline_mode<synchronous>, transform_indices = @transform_14, window_bounds = array<i64: 2, 64, 32>}, {pipeline_mode = #tpu.pipeline_mode<synchronous>, transform_indices = @transform_15, window_bounds = array<i64: 2, 1, 32>}, {pipeline_mode = #tpu.pipeline_mode<synchronous>, transform_indices = @transform_16, window_bounds = array<i64: 1, 32>}, {pipeline_mode = #tpu.pipeline_mode<synchronous>, transform_indices = @transform_17, window_bounds = array<i64: 1, 32>}, {pipeline_mode = #tpu.pipeline_mode<synchronous>, transform_indices = @transform_18, window_bounds = array<i64: 32, 10>}, {pipeline_mode = #tpu.pipeline_mode<synchronous>, transform_indices = @transform_19, window_bounds = array<i64: 1, 10>}, {transform_indices = @transform_20, window_bounds = array<i64: 1, 1, 10>}]} {
    %c0 = arith.constant 0 : index
    %c0_0 = arith.constant 0 : index
    %c0_1 = arith.constant 0 : index
    %0 = vector.load %arg2[%c0, %c0_0, %c0_1] : memref<1x16x64xf32, #tpu.memory_space<vmem>>, vector<1x16x64xf32>
    %1 = vector.shape_cast %0 : vector<1x16x64xf32> to vector<16x64xf32>
    %c0_2 = arith.constant 0 : index
    %c0_3 = arith.constant 0 : index
    %2 = vector.load %arg3[%c0_2, %c0_3] : memref<64x32xf32, #tpu.memory_space<vmem>>, vector<64x32xf32>
    %cst = arith.constant dense<0.000000e+00> : vector<16x32xf32>
    %3 = tpu.matmul %1, %2, %cst {dimension_numbers = #tpu.dot_dimension_numbers<[1], [0], [0], [1], [0, 0, 1, 1], [], []>} : vector<16x64xf32>, vector<64x32xf32>, vector<16x32xf32> -> vector<16x32xf32>
    %c0_4 = arith.constant 0 : index
    %c0_5 = arith.constant 0 : index
    %4 = vector.load %arg4[%c0_4, %c0_5] : memref<1x32xf32, #tpu.memory_space<vmem>>, vector<1x32xf32>
    %5 = vector.broadcast %4 : vector<1x32xf32> to vector<16x32xf32>
    %6 = arith.addf %3, %5 : vector<16x32xf32>
    %c0_6 = arith.constant 0 : index
    %c0_7 = arith.constant 0 : index
    %7 = vector.load %arg6[%c0_6, %c0_7] : memref<17x32xf32, #tpu.memory_space<vmem>>, vector<17x32xf32>
    %c0_8 = arith.constant 0 : index
    %c0_9 = arith.constant 0 : index
    %8 = vector.load %arg5[%c0_8, %c0_9] : memref<1x32xf32, #tpu.memory_space<vmem>>, vector<1x32xf32>
    %9 = vector.extract_strided_slice %7 {offsets = [0, 0], sizes = [1, 32], strides = [1, 1]} : vector<17x32xf32> to vector<1x32xf32>
    %10 = arith.addf %8, %9 : vector<1x32xf32>
    %c0_10 = arith.constant 0 : index
    %c0_11 = arith.constant 0 : index
    %11 = vector.load %arg23[%c0_10, %c0_11] : memref<17x32xf32, #tpu.memory_space<vmem>>, vector<1x32xf32>
    tpu.vector_store %arg23[%c0_10, %c0_11], %10 {strides = array<i32>} : memref<17x32xf32, #tpu.memory_space<vmem>>, vector<1x32xf32>,
    %12 = vector.extract_strided_slice %7 {offsets = [1, 0], sizes = [16, 32], strides = [1, 1]} : vector<17x32xf32> to vector<16x32xf32>
    %13 = arith.addf %6, %12 : vector<16x32xf32>
    %c1 = arith.constant 1 : index
    %c0_12 = arith.constant 0 : index
    %14 = vector.load %arg23[%c1, %c0_12] : memref<17x32xf32, #tpu.memory_space<vmem>>, vector<16x32xf32>
    tpu.vector_store %arg23[%c1, %c0_12], %13 {strides = array<i32>} : memref<17x32xf32, #tpu.memory_space<vmem>>, vector<16x32xf32>,
    %c0_13 = arith.constant 0 : index
    %c0_14 = arith.constant 0 : index
    %15 = vector.load %arg23[%c0_13, %c0_14] : memref<17x32xf32, #tpu.memory_space<vmem>>, vector<17x32xf32>
    %c0_15 = arith.constant 0 : index
    %c0_16 = arith.constant 0 : index
    %c0_17 = arith.constant 0 : index
    %16 = vector.load %arg7[%c0_15, %c0_16, %c0_17] : memref<2x1x32xf32, #tpu.memory_space<vmem>>, vector<1x1x32xf32>
    %17 = vector.shape_cast %16 : vector<1x1x32xf32> to vector<1x32xf32>
    %c0_18 = arith.constant 0 : index
    %c0_19 = arith.constant 0 : index
    %c0_20 = arith.constant 0 : index
    %18 = vector.load %arg8[%c0_18, %c0_19, %c0_20] : memref<2x1x32xf32, #tpu.memory_space<vmem>>, vector<1x1x32xf32>
    %19 = vector.shape_cast %18 : vector<1x1x32xf32> to vector<1x32xf32>
    %cst_21 = arith.constant dense<0.000000e+00> : vector<17xf32>
    %20 = vector.multi_reduction <add>, %15, %cst_21 [1] : vector<17x32xf32> to vector<17xf32>
    %21 = vector.shape_cast %20 : vector<17xf32> to vector<17x1xf32>
    %cst_22 = arith.constant 3.200000e+01 : f32
    %22 = vector.broadcast %cst_22 : f32 to vector<17x1xf32>
    %23 = arith.divf %21, %22 : vector<17x1xf32>
    %24 = vector.broadcast %23 : vector<17x1xf32> to vector<17x32xf32>
    %25 = arith.subf %15, %24 : vector<17x32xf32>
    %26 = arith.mulf %25, %25 : vector<17x32xf32>
    %cst_23 = arith.constant dense<0.000000e+00> : vector<17xf32>
    %27 = vector.multi_reduction <add>, %26, %cst_23 [1] : vector<17x32xf32> to vector<17xf32>
    %28 = vector.shape_cast %27 : vector<17xf32> to vector<17x1xf32>
    %cst_24 = arith.constant 3.200000e+01 : f32
    %29 = vector.broadcast %cst_24 : f32 to vector<17x1xf32>
    %30 = arith.divf %28, %29 : vector<17x1xf32>
    %31 = vector.broadcast %23 : vector<17x1xf32> to vector<17x32xf32>
    %32 = arith.subf %15, %31 : vector<17x32xf32>
    %cst_25 = arith.constant 9.99999974E-6 : f32
    %33 = vector.broadcast %cst_25 : f32 to vector<17x1xf32>
    %34 = arith.addf %30, %33 : vector<17x1xf32>
    %35 = math.rsqrt %34 : vector<17x1xf32>
    %36 = vector.broadcast %35 : vector<17x1xf32> to vector<17x32xf32>
    %37 = arith.mulf %32, %36 : vector<17x32xf32>
    %38 = vector.broadcast %17 : vector<1x32xf32> to vector<17x32xf32>
    %39 = arith.mulf %37, %38 : vector<17x32xf32>
    %40 = vector.broadcast %19 : vector<1x32xf32> to vector<17x32xf32>
    %41 = arith.addf %39, %40 : vector<17x32xf32>
    %c0_26 = arith.constant 0 : index
    %c0_27 = arith.constant 0 : index
    %c0_28 = arith.constant 0 : index
    %42 = vector.load %arg9[%c0_26, %c0_27, %c0_28] : memref<2x32x96xf32, #tpu.memory_space<vmem>>, vector<1x32x96xf32>
    %43 = vector.shape_cast %42 : vector<1x32x96xf32> to vector<32x96xf32>
    %cst_29 = arith.constant dense<0.000000e+00> : vector<17x96xf32>
    %44 = tpu.matmul %41, %43, %cst_29 {dimension_numbers = #tpu.dot_dimension_numbers<[1], [0], [0], [1], [0, 0, 1, 1], [], []>} : vector<17x32xf32>, vector<32x96xf32>, vector<17x96xf32> -> vector<17x96xf32>
    %45 = vector.extract_strided_slice %44 {offsets = [0, 64], sizes = [17, 32], strides = [1, 1]} : vector<17x96xf32> to vector<17x32xf32>
    %c0_30 = arith.constant 0 : index
    %c0_31 = arith.constant 0 : index
    %c0_32 = arith.constant 0 : index
    %46 = vector.load %arg10[%c0_30, %c0_31, %c0_32] : memref<2x32x32xf32, #tpu.memory_space<vmem>>, vector<1x32x32xf32>
    %47 = vector.shape_cast %46 : vector<1x32x32xf32> to vector<32x32xf32>
    %cst_33 = arith.constant 0.000000e+00 : f32
    %48 = vector.broadcast %cst_33 : f32 to vector<17x32xf32>
    %49 = vector.extract_strided_slice %44 {offsets = [0, 0], sizes = [17, 8], strides = [1, 1]} : vector<17x96xf32> to vector<17x8xf32>
    %50 = vector.extract_strided_slice %44 {offsets = [0, 32], sizes = [17, 8], strides = [1, 1]} : vector<17x96xf32> to vector<17x8xf32>
    %cst_34 = arith.constant dense<0.000000e+00> : vector<17x17xf32>
    %51 = tpu.matmul %49, %50, %cst_34 {dimension_numbers = #tpu.dot_dimension_numbers<[1], [1], [0], [0], [0, 0, 1, 0], [], []>} : vector<17x8xf32>, vector<17x8xf32>, vector<17x17xf32> -> vector<17x17xf32>
    %cst_35 = arith.constant 0.353553385 : f32
    %52 = vector.broadcast %cst_35 : f32 to vector<17x17xf32>
    %53 = arith.mulf %51, %52 : vector<17x17xf32>
    %cst_36 = arith.constant dense<0xFF800000> : vector<17xf32>
    %54 = vector.multi_reduction <maximumf>, %53, %cst_36 [1] : vector<17x17xf32> to vector<17xf32>
    %55 = vector.shape_cast %54 : vector<17xf32> to vector<17x1xf32>
    %56 = vector.broadcast %55 : vector<17x1xf32> to vector<17x17xf32>
    %57 = arith.subf %53, %56 : vector<17x17xf32>
    %58 = math.exp %57 : vector<17x17xf32>
    %cst_37 = arith.constant dense<0.000000e+00> : vector<17xf32>
    %59 = vector.multi_reduction <add>, %58, %cst_37 [1] : vector<17x17xf32> to vector<17xf32>
    %60 = vector.shape_cast %59 : vector<17xf32> to vector<17x1xf32>
    %61 = tpu.reciprocal %60 {approx = true} : vector<17x1xf32> -> vector<17x1xf32>
    %62 = vector.broadcast %61 : vector<17x1xf32> to vector<17x17xf32>
    %63 = arith.mulf %58, %62 : vector<17x17xf32>
    %64 = vector.extract_strided_slice %45 {offsets = [0, 0], sizes = [17, 8], strides = [1, 1]} : vector<17x32xf32> to vector<17x8xf32>
    %cst_38 = arith.constant dense<0.000000e+00> : vector<17x8xf32>
    %65 = tpu.matmul %63, %64, %cst_38 {dimension_numbers = #tpu.dot_dimension_numbers<[1], [0], [0], [1], [0, 0, 1, 1], [], []>} : vector<17x17xf32>, vector<17x8xf32>, vector<17x8xf32> -> vector<17x8xf32>
    %66 = vector.extract_strided_slice %47 {offsets = [0, 0], sizes = [8, 32], strides = [1, 1]} : vector<32x32xf32> to vector<8x32xf32>
    %cst_39 = arith.constant dense<0.000000e+00> : vector<17x32xf32>
    %67 = tpu.matmul %65, %66, %cst_39 {dimension_numbers = #tpu.dot_dimension_numbers<[1], [0], [0], [1], [0, 0, 1, 1], [], []>} : vector<17x8xf32>, vector<8x32xf32>, vector<17x32xf32> -> vector<17x32xf32>
    %68 = arith.addf %48, %67 : vector<17x32xf32>
    %69 = vector.extract_strided_slice %44 {offsets = [0, 8], sizes = [17, 8], strides = [1, 1]} : vector<17x96xf32> to vector<17x8xf32>
    %70 = vector.extract_strided_slice %44 {offsets = [0, 40], sizes = [17, 8], strides = [1, 1]} : vector<17x96xf32> to vector<17x8xf32>
    %cst_40 = arith.constant dense<0.000000e+00> : vector<17x17xf32>
    %71 = tpu.matmul %69, %70, %cst_40 {dimension_numbers = #tpu.dot_dimension_numbers<[1], [1], [0], [0], [0, 0, 1, 0], [], []>} : vector<17x8xf32>, vector<17x8xf32>, vector<17x17xf32> -> vector<17x17xf32>
    %cst_41 = arith.constant 0.353553385 : f32
    %72 = vector.broadcast %cst_41 : f32 to vector<17x17xf32>
    %73 = arith.mulf %71, %72 : vector<17x17xf32>
    %cst_42 = arith.constant dense<0xFF800000> : vector<17xf32>
    %74 = vector.multi_reduction <maximumf>, %73, %cst_42 [1] : vector<17x17xf32> to vector<17xf32>
    %75 = vector.shape_cast %74 : vector<17xf32> to vector<17x1xf32>
    %76 = vector.broadcast %75 : vector<17x1xf32> to vector<17x17xf32>
    %77 = arith.subf %73, %76 : vector<17x17xf32>
    %78 = math.exp %77 : vector<17x17xf32>
    %cst_43 = arith.constant dense<0.000000e+00> : vector<17xf32>
    %79 = vector.multi_reduction <add>, %78, %cst_43 [1] : vector<17x17xf32> to vector<17xf32>
    %80 = vector.shape_cast %79 : vector<17xf32> to vector<17x1xf32>
    %81 = tpu.reciprocal %80 {approx = true} : vector<17x1xf32> -> vector<17x1xf32>
    %82 = vector.broadcast %81 : vector<17x1xf32> to vector<17x17xf32>
    %83 = arith.mulf %78, %82 : vector<17x17xf32>
    %84 = vector.extract_strided_slice %45 {offsets = [0, 8], sizes = [17, 8], strides = [1, 1]} : vector<17x32xf32> to vector<17x8xf32>
    %cst_44 = arith.constant dense<0.000000e+00> : vector<17x8xf32>
    %85 = tpu.matmul %83, %84, %cst_44 {dimension_numbers = #tpu.dot_dimension_numbers<[1], [0], [0], [1], [0, 0, 1, 1], [], []>} : vector<17x17xf32>, vector<17x8xf32>, vector<17x8xf32> -> vector<17x8xf32>
    %86 = vector.extract_strided_slice %47 {offsets = [8, 0], sizes = [8, 32], strides = [1, 1]} : vector<32x32xf32> to vector<8x32xf32>
    %cst_45 = arith.constant dense<0.000000e+00> : vector<17x32xf32>
    %87 = tpu.matmul %85, %86, %cst_45 {dimension_numbers = #tpu.dot_dimension_numbers<[1], [0], [0], [1], [0, 0, 1, 1], [], []>} : vector<17x8xf32>, vector<8x32xf32>, vector<17x32xf32> -> vector<17x32xf32>
    %88 = arith.addf %68, %87 : vector<17x32xf32>
    %89 = vector.extract_strided_slice %44 {offsets = [0, 16], sizes = [17, 8], strides = [1, 1]} : vector<17x96xf32> to vector<17x8xf32>
    %90 = vector.extract_strided_slice %44 {offsets = [0, 48], sizes = [17, 8], strides = [1, 1]} : vector<17x96xf32> to vector<17x8xf32>
    %cst_46 = arith.constant dense<0.000000e+00> : vector<17x17xf32>
    %91 = tpu.matmul %89, %90, %cst_46 {dimension_numbers = #tpu.dot_dimension_numbers<[1], [1], [0], [0], [0, 0, 1, 0], [], []>} : vector<17x8xf32>, vector<17x8xf32>, vector<17x17xf32> -> vector<17x17xf32>
    %cst_47 = arith.constant 0.353553385 : f32
    %92 = vector.broadcast %cst_47 : f32 to vector<17x17xf32>
    %93 = arith.mulf %91, %92 : vector<17x17xf32>
    %cst_48 = arith.constant dense<0xFF800000> : vector<17xf32>
    %94 = vector.multi_reduction <maximumf>, %93, %cst_48 [1] : vector<17x17xf32> to vector<17xf32>
    %95 = vector.shape_cast %94 : vector<17xf32> to vector<17x1xf32>
    %96 = vector.broadcast %95 : vector<17x1xf32> to vector<17x17xf32>
    %97 = arith.subf %93, %96 : vector<17x17xf32>
    %98 = math.exp %97 : vector<17x17xf32>
    %cst_49 = arith.constant dense<0.000000e+00> : vector<17xf32>
    %99 = vector.multi_reduction <add>, %98, %cst_49 [1] : vector<17x17xf32> to vector<17xf32>
    %100 = vector.shape_cast %99 : vector<17xf32> to vector<17x1xf32>
    %101 = tpu.reciprocal %100 {approx = true} : vector<17x1xf32> -> vector<17x1xf32>
    %102 = vector.broadcast %101 : vector<17x1xf32> to vector<17x17xf32>
    %103 = arith.mulf %98, %102 : vector<17x17xf32>
    %104 = vector.extract_strided_slice %45 {offsets = [0, 16], sizes = [17, 8], strides = [1, 1]} : vector<17x32xf32> to vector<17x8xf32>
    %cst_50 = arith.constant dense<0.000000e+00> : vector<17x8xf32>
    %105 = tpu.matmul %103, %104, %cst_50 {dimension_numbers = #tpu.dot_dimension_numbers<[1], [0], [0], [1], [0, 0, 1, 1], [], []>} : vector<17x17xf32>, vector<17x8xf32>, vector<17x8xf32> -> vector<17x8xf32>
    %106 = vector.extract_strided_slice %47 {offsets = [16, 0], sizes = [8, 32], strides = [1, 1]} : vector<32x32xf32> to vector<8x32xf32>
    %cst_51 = arith.constant dense<0.000000e+00> : vector<17x32xf32>
    %107 = tpu.matmul %105, %106, %cst_51 {dimension_numbers = #tpu.dot_dimension_numbers<[1], [0], [0], [1], [0, 0, 1, 1], [], []>} : vector<17x8xf32>, vector<8x32xf32>, vector<17x32xf32> -> vector<17x32xf32>
    %108 = arith.addf %88, %107 : vector<17x32xf32>
    %109 = vector.extract_strided_slice %44 {offsets = [0, 24], sizes = [17, 8], strides = [1, 1]} : vector<17x96xf32> to vector<17x8xf32>
    %110 = vector.extract_strided_slice %44 {offsets = [0, 56], sizes = [17, 8], strides = [1, 1]} : vector<17x96xf32> to vector<17x8xf32>
    %cst_52 = arith.constant dense<0.000000e+00> : vector<17x17xf32>
    %111 = tpu.matmul %109, %110, %cst_52 {dimension_numbers = #tpu.dot_dimension_numbers<[1], [1], [0], [0], [0, 0, 1, 0], [], []>} : vector<17x8xf32>, vector<17x8xf32>, vector<17x17xf32> -> vector<17x17xf32>
    %cst_53 = arith.constant 0.353553385 : f32
    %112 = vector.broadcast %cst_53 : f32 to vector<17x17xf32>
    %113 = arith.mulf %111, %112 : vector<17x17xf32>
    %cst_54 = arith.constant dense<0xFF800000> : vector<17xf32>
    %114 = vector.multi_reduction <maximumf>, %113, %cst_54 [1] : vector<17x17xf32> to vector<17xf32>
    %115 = vector.shape_cast %114 : vector<17xf32> to vector<17x1xf32>
    %116 = vector.broadcast %115 : vector<17x1xf32> to vector<17x17xf32>
    %117 = arith.subf %113, %116 : vector<17x17xf32>
    %118 = math.exp %117 : vector<17x17xf32>
    %cst_55 = arith.constant dense<0.000000e+00> : vector<17xf32>
    %119 = vector.multi_reduction <add>, %118, %cst_55 [1] : vector<17x17xf32> to vector<17xf32>
    %120 = vector.shape_cast %119 : vector<17xf32> to vector<17x1xf32>
    %121 = tpu.reciprocal %120 {approx = true} : vector<17x1xf32> -> vector<17x1xf32>
    %122 = vector.broadcast %121 : vector<17x1xf32> to vector<17x17xf32>
    %123 = arith.mulf %118, %122 : vector<17x17xf32>
    %124 = vector.extract_strided_slice %45 {offsets = [0, 24], sizes = [17, 8], strides = [1, 1]} : vector<17x32xf32> to vector<17x8xf32>
    %cst_56 = arith.constant dense<0.000000e+00> : vector<17x8xf32>
    %125 = tpu.matmul %123, %124, %cst_56 {dimension_numbers = #tpu.dot_dimension_numbers<[1], [0], [0], [1], [0, 0, 1, 1], [], []>} : vector<17x17xf32>, vector<17x8xf32>, vector<17x8xf32> -> vector<17x8xf32>
    %126 = vector.extract_strided_slice %47 {offsets = [24, 0], sizes = [8, 32], strides = [1, 1]} : vector<32x32xf32> to vector<8x32xf32>
    %cst_57 = arith.constant dense<0.000000e+00> : vector<17x32xf32>
    %127 = tpu.matmul %125, %126, %cst_57 {dimension_numbers = #tpu.dot_dimension_numbers<[1], [0], [0], [1], [0, 0, 1, 1], [], []>} : vector<17x8xf32>, vector<8x32xf32>, vector<17x32xf32> -> vector<17x32xf32>
    %128 = arith.addf %108, %127 : vector<17x32xf32>
    %129 = arith.addf %15, %128 : vector<17x32xf32>
    %c0_58 = arith.constant 0 : index
    %c0_59 = arith.constant 0 : index
    %c0_60 = arith.constant 0 : index
    %130 = vector.load %arg11[%c0_58, %c0_59, %c0_60] : memref<2x1x32xf32, #tpu.memory_space<vmem>>, vector<1x1x32xf32>
    %131 = vector.shape_cast %130 : vector<1x1x32xf32> to vector<1x32xf32>
    %132 = vector.broadcast %131 : vector<1x32xf32> to vector<17x32xf32>
    %133 = arith.addf %129, %132 : vector<17x32xf32>
    %c0_61 = arith.constant 0 : index
    %c0_62 = arith.constant 0 : index
    %c0_63 = arith.constant 0 : index
    %134 = vector.load %arg12[%c0_61, %c0_62, %c0_63] : memref<2x1x32xf32, #tpu.memory_space<vmem>>, vector<1x1x32xf32>
    %135 = vector.shape_cast %134 : vector<1x1x32xf32> to vector<1x32xf32>
    %c0_64 = arith.constant 0 : index
    %c0_65 = arith.constant 0 : index
    %c0_66 = arith.constant 0 : index
    %136 = vector.load %arg13[%c0_64, %c0_65, %c0_66] : memref<2x1x32xf32, #tpu.memory_space<vmem>>, vector<1x1x32xf32>
    %137 = vector.shape_cast %136 : vector<1x1x32xf32> to vector<1x32xf32>
    %cst_67 = arith.constant dense<0.000000e+00> : vector<17xf32>
    %138 = vector.multi_reduction <add>, %133, %cst_67 [1] : vector<17x32xf32> to vector<17xf32>
    %139 = vector.shape_cast %138 : vector<17xf32> to vector<17x1xf32>
    %cst_68 = arith.constant 3.200000e+01 : f32
    %140 = vector.broadcast %cst_68 : f32 to vector<17x1xf32>
    %141 = arith.divf %139, %140 : vector<17x1xf32>
    %142 = vector.broadcast %141 : vector<17x1xf32> to vector<17x32xf32>
    %143 = arith.subf %133, %142 : vector<17x32xf32>
    %144 = arith.mulf %143, %143 : vector<17x32xf32>
    %cst_69 = arith.constant dense<0.000000e+00> : vector<17xf32>
    %145 = vector.multi_reduction <add>, %144, %cst_69 [1] : vector<17x32xf32> to vector<17xf32>
    %146 = vector.shape_cast %145 : vector<17xf32> to vector<17x1xf32>
    %cst_70 = arith.constant 3.200000e+01 : f32
    %147 = vector.broadcast %cst_70 : f32 to vector<17x1xf32>
    %148 = arith.divf %146, %147 : vector<17x1xf32>
    %149 = vector.broadcast %141 : vector<17x1xf32> to vector<17x32xf32>
    %150 = arith.subf %133, %149 : vector<17x32xf32>
    %cst_71 = arith.constant 9.99999974E-6 : f32
    %151 = vector.broadcast %cst_71 : f32 to vector<17x1xf32>
    %152 = arith.addf %148, %151 : vector<17x1xf32>
    %153 = math.rsqrt %152 : vector<17x1xf32>
    %154 = vector.broadcast %153 : vector<17x1xf32> to vector<17x32xf32>
    %155 = arith.mulf %150, %154 : vector<17x32xf32>
    %156 = vector.broadcast %135 : vector<1x32xf32> to vector<17x32xf32>
    %157 = arith.mulf %155, %156 : vector<17x32xf32>
    %158 = vector.broadcast %137 : vector<1x32xf32> to vector<17x32xf32>
    %159 = arith.addf %157, %158 : vector<17x32xf32>
    %c0_72 = arith.constant 0 : index
    %c0_73 = arith.constant 0 : index
    %c0_74 = arith.constant 0 : index
    %160 = vector.load %arg14[%c0_72, %c0_73, %c0_74] : memref<2x32x64xf32, #tpu.memory_space<vmem>>, vector<1x32x64xf32>
    %161 = vector.shape_cast %160 : vector<1x32x64xf32> to vector<32x64xf32>
    %cst_75 = arith.constant dense<0.000000e+00> : vector<17x64xf32>
    %162 = tpu.matmul %159, %161, %cst_75 {dimension_numbers = #tpu.dot_dimension_numbers<[1], [0], [0], [1], [0, 0, 1, 1], [], []>} : vector<17x32xf32>, vector<32x64xf32>, vector<17x64xf32> -> vector<17x64xf32>
    %c0_76 = arith.constant 0 : index
    %c0_77 = arith.constant 0 : index
    %c0_78 = arith.constant 0 : index
    %163 = vector.load %arg15[%c0_76, %c0_77, %c0_78] : memref<2x1x64xf32, #tpu.memory_space<vmem>>, vector<1x1x64xf32>
    %164 = vector.shape_cast %163 : vector<1x1x64xf32> to vector<1x64xf32>
    %165 = vector.broadcast %164 : vector<1x64xf32> to vector<17x64xf32>
    %166 = arith.addf %162, %165 : vector<17x64xf32>
    %cst_79 = arith.constant 5.000000e-01 : f32
    %167 = vector.broadcast %cst_79 : f32 to vector<17x64xf32>
    %168 = arith.mulf %167, %166 : vector<17x64xf32>
    %cst_80 = arith.constant 0.707106769 : f32
    %169 = vector.broadcast %cst_80 : f32 to vector<17x64xf32>
    %170 = arith.mulf %166, %169 : vector<17x64xf32>
    %cst_81 = arith.constant 0.000000e+00 : f32
    %171 = vector.broadcast %cst_81 : f32 to vector<17x64xf32>
    %172 = arith.cmpf oge, %170, %171 : vector<17x64xf32>
    %cst_82 = arith.constant 1.000000e+00 : f32
    %cst_83 = arith.constant -1.000000e+00 : f32
    %173 = vector.broadcast %cst_82 : f32 to vector<17x64xf32>
    %174 = vector.broadcast %cst_83 : f32 to vector<17x64xf32>
    %175 = arith.select %172, %173, %174 : vector<17x64xi1>, vector<17x64xf32>
    %176 = math.absf %170 : vector<17x64xf32>
    %cst_84 = arith.constant 0.327591091 : f32
    %177 = vector.broadcast %cst_84 : f32 to vector<17x64xf32>
    %178 = arith.mulf %177, %176 : vector<17x64xf32>
    %cst_85 = arith.constant 1.000000e+00 : f32
    %179 = vector.broadcast %cst_85 : f32 to vector<17x64xf32>
    %180 = arith.addf %179, %178 : vector<17x64xf32>
    %cst_86 = arith.constant 1.000000e+00 : f32
    %181 = vector.broadcast %cst_86 : f32 to vector<17x64xf32>
    %182 = arith.divf %181, %180 : vector<17x64xf32>
    %cst_87 = arith.constant 1.06140542 : f32
    %183 = vector.broadcast %cst_87 : f32 to vector<17x64xf32>
    %184 = arith.mulf %183, %182 : vector<17x64xf32>
    %cst_88 = arith.constant -1.45315206 : f32
    %185 = vector.broadcast %cst_88 : f32 to vector<17x64xf32>
    %186 = arith.addf %184, %185 : vector<17x64xf32>
    %187 = arith.mulf %186, %182 : vector<17x64xf32>
    %cst_89 = arith.constant 1.42141378 : f32
    %188 = vector.broadcast %cst_89 : f32 to vector<17x64xf32>
    %189 = arith.addf %187, %188 : vector<17x64xf32>
    %190 = arith.mulf %189, %182 : vector<17x64xf32>
    %cst_90 = arith.constant -0.284496725 : f32
    %191 = vector.broadcast %cst_90 : f32 to vector<17x64xf32>
    %192 = arith.addf %190, %191 : vector<17x64xf32>
    %193 = arith.mulf %192, %182 : vector<17x64xf32>
    %cst_91 = arith.constant 0.254829586 : f32
    %194 = vector.broadcast %cst_91 : f32 to vector<17x64xf32>
    %195 = arith.addf %193, %194 : vector<17x64xf32>
    %196 = arith.mulf %195, %182 : vector<17x64xf32>
    %cst_92 = arith.constant 0.000000e+00 : f32
    %197 = vector.broadcast %cst_92 : f32 to vector<17x64xf32>
    %198 = arith.subf %197, %176 : vector<17x64xf32>
    %199 = arith.mulf %198, %176 : vector<17x64xf32>
    %200 = math.exp %199 : vector<17x64xf32>
    %201 = arith.mulf %196, %200 : vector<17x64xf32>
    %cst_93 = arith.constant 1.000000e+00 : f32
    %202 = vector.broadcast %cst_93 : f32 to vector<17x64xf32>
    %203 = arith.subf %202, %201 : vector<17x64xf32>
    %204 = arith.mulf %175, %203 : vector<17x64xf32>
    %cst_94 = arith.constant 1.000000e+00 : f32
    %205 = vector.broadcast %cst_94 : f32 to vector<17x64xf32>
    %206 = arith.addf %205, %204 : vector<17x64xf32>
    %207 = arith.mulf %168, %206 : vector<17x64xf32>
    %c0_95 = arith.constant 0 : index
    %c0_96 = arith.constant 0 : index
    %c0_97 = arith.constant 0 : index
    %208 = vector.load %arg16[%c0_95, %c0_96, %c0_97] : memref<2x64x32xf32, #tpu.memory_space<vmem>>, vector<1x64x32xf32>
    %209 = vector.shape_cast %208 : vector<1x64x32xf32> to vector<64x32xf32>
    %cst_98 = arith.constant dense<0.000000e+00> : vector<17x32xf32>
    %210 = tpu.matmul %207, %209, %cst_98 {dimension_numbers = #tpu.dot_dimension_numbers<[1], [0], [0], [1], [0, 0, 1, 1], [], []>} : vector<17x64xf32>, vector<64x32xf32>, vector<17x32xf32> -> vector<17x32xf32>
    %211 = arith.addf %133, %210 : vector<17x32xf32>
    %c0_99 = arith.constant 0 : index
    %c0_100 = arith.constant 0 : index
    %c0_101 = arith.constant 0 : index
    %212 = vector.load %arg17[%c0_99, %c0_100, %c0_101] : memref<2x1x32xf32, #tpu.memory_space<vmem>>, vector<1x1x32xf32>
    %213 = vector.shape_cast %212 : vector<1x1x32xf32> to vector<1x32xf32>
    %214 = vector.broadcast %213 : vector<1x32xf32> to vector<17x32xf32>
    %215 = arith.addf %211, %214 : vector<17x32xf32>
    %c1_102 = arith.constant 1 : index
    %c0_103 = arith.constant 0 : index
    %c0_104 = arith.constant 0 : index
    %216 = vector.load %arg7[%c1_102, %c0_103, %c0_104] : memref<2x1x32xf32, #tpu.memory_space<vmem>>, vector<1x1x32xf32>
    %217 = vector.shape_cast %216 : vector<1x1x32xf32> to vector<1x32xf32>
    %c1_105 = arith.constant 1 : index
    %c0_106 = arith.constant 0 : index
    %c0_107 = arith.constant 0 : index
    %218 = vector.load %arg8[%c1_105, %c0_106, %c0_107] : memref<2x1x32xf32, #tpu.memory_space<vmem>>, vector<1x1x32xf32>
    %219 = vector.shape_cast %218 : vector<1x1x32xf32> to vector<1x32xf32>
    %cst_108 = arith.constant dense<0.000000e+00> : vector<17xf32>
    %220 = vector.multi_reduction <add>, %215, %cst_108 [1] : vector<17x32xf32> to vector<17xf32>
    %221 = vector.shape_cast %220 : vector<17xf32> to vector<17x1xf32>
    %cst_109 = arith.constant 3.200000e+01 : f32
    %222 = vector.broadcast %cst_109 : f32 to vector<17x1xf32>
    %223 = arith.divf %221, %222 : vector<17x1xf32>
    %224 = vector.broadcast %223 : vector<17x1xf32> to vector<17x32xf32>
    %225 = arith.subf %215, %224 : vector<17x32xf32>
    %226 = arith.mulf %225, %225 : vector<17x32xf32>
    %cst_110 = arith.constant dense<0.000000e+00> : vector<17xf32>
    %227 = vector.multi_reduction <add>, %226, %cst_110 [1] : vector<17x32xf32> to vector<17xf32>
    %228 = vector.shape_cast %227 : vector<17xf32> to vector<17x1xf32>
    %cst_111 = arith.constant 3.200000e+01 : f32
    %229 = vector.broadcast %cst_111 : f32 to vector<17x1xf32>
    %230 = arith.divf %228, %229 : vector<17x1xf32>
    %231 = vector.broadcast %223 : vector<17x1xf32> to vector<17x32xf32>
    %232 = arith.subf %215, %231 : vector<17x32xf32>
    %cst_112 = arith.constant 9.99999974E-6 : f32
    %233 = vector.broadcast %cst_112 : f32 to vector<17x1xf32>
    %234 = arith.addf %230, %233 : vector<17x1xf32>
    %235 = math.rsqrt %234 : vector<17x1xf32>
    %236 = vector.broadcast %235 : vector<17x1xf32> to vector<17x32xf32>
    %237 = arith.mulf %232, %236 : vector<17x32xf32>
    %238 = vector.broadcast %217 : vector<1x32xf32> to vector<17x32xf32>
    %239 = arith.mulf %237, %238 : vector<17x32xf32>
    %240 = vector.broadcast %219 : vector<1x32xf32> to vector<17x32xf32>
    %241 = arith.addf %239, %240 : vector<17x32xf32>
    %c1_113 = arith.constant 1 : index
    %c0_114 = arith.constant 0 : index
    %c0_115 = arith.constant 0 : index
    %242 = vector.load %arg9[%c1_113, %c0_114, %c0_115] : memref<2x32x96xf32, #tpu.memory_space<vmem>>, vector<1x32x96xf32>
    %243 = vector.shape_cast %242 : vector<1x32x96xf32> to vector<32x96xf32>
    %cst_116 = arith.constant dense<0.000000e+00> : vector<17x96xf32>
    %244 = tpu.matmul %241, %243, %cst_116 {dimension_numbers = #tpu.dot_dimension_numbers<[1], [0], [0], [1], [0, 0, 1, 1], [], []>} : vector<17x32xf32>, vector<32x96xf32>, vector<17x96xf32> -> vector<17x96xf32>
    %245 = vector.extract_strided_slice %244 {offsets = [0, 64], sizes = [17, 32], strides = [1, 1]} : vector<17x96xf32> to vector<17x32xf32>
    %c1_117 = arith.constant 1 : index
    %c0_118 = arith.constant 0 : index
    %246 = memref.load %arg1[%c1_117, %c0_118] : memref<2x12xf32, #tpu.memory_space<smem>>
    %247 = vector.broadcast %246 : f32 to vector<17x32xf32>
    %248 = arith.mulf %247, %45 : vector<17x32xf32>
    %249 = arith.addf %245, %248 : vector<17x32xf32>
    %c1_119 = arith.constant 1 : index
    %c0_120 = arith.constant 0 : index
    %c0_121 = arith.constant 0 : index
    %250 = vector.load %arg10[%c1_119, %c0_120, %c0_121] : memref<2x32x32xf32, #tpu.memory_space<vmem>>, vector<1x32x32xf32>
    %251 = vector.shape_cast %250 : vector<1x32x32xf32> to vector<32x32xf32>
    %cst_122 = arith.constant 0.000000e+00 : f32
    %252 = vector.broadcast %cst_122 : f32 to vector<17x32xf32>
    %253 = vector.extract_strided_slice %244 {offsets = [0, 0], sizes = [17, 8], strides = [1, 1]} : vector<17x96xf32> to vector<17x8xf32>
    %254 = vector.extract_strided_slice %244 {offsets = [0, 32], sizes = [17, 8], strides = [1, 1]} : vector<17x96xf32> to vector<17x8xf32>
    %cst_123 = arith.constant dense<0.000000e+00> : vector<17x17xf32>
    %255 = tpu.matmul %253, %254, %cst_123 {dimension_numbers = #tpu.dot_dimension_numbers<[1], [1], [0], [0], [0, 0, 1, 0], [], []>} : vector<17x8xf32>, vector<17x8xf32>, vector<17x17xf32> -> vector<17x17xf32>
    %cst_124 = arith.constant 0.353553385 : f32
    %256 = vector.broadcast %cst_124 : f32 to vector<17x17xf32>
    %257 = arith.mulf %255, %256 : vector<17x17xf32>
    %cst_125 = arith.constant dense<0xFF800000> : vector<17xf32>
    %258 = vector.multi_reduction <maximumf>, %257, %cst_125 [1] : vector<17x17xf32> to vector<17xf32>
    %259 = vector.shape_cast %258 : vector<17xf32> to vector<17x1xf32>
    %260 = vector.broadcast %259 : vector<17x1xf32> to vector<17x17xf32>
    %261 = arith.subf %257, %260 : vector<17x17xf32>
    %262 = math.exp %261 : vector<17x17xf32>
    %cst_126 = arith.constant dense<0.000000e+00> : vector<17xf32>
    %263 = vector.multi_reduction <add>, %262, %cst_126 [1] : vector<17x17xf32> to vector<17xf32>
    %264 = vector.shape_cast %263 : vector<17xf32> to vector<17x1xf32>
    %265 = tpu.reciprocal %264 {approx = true} : vector<17x1xf32> -> vector<17x1xf32>
    %266 = vector.broadcast %265 : vector<17x1xf32> to vector<17x17xf32>
    %267 = arith.mulf %262, %266 : vector<17x17xf32>
    %268 = vector.extract_strided_slice %249 {offsets = [0, 0], sizes = [17, 8], strides = [1, 1]} : vector<17x32xf32> to vector<17x8xf32>
    %cst_127 = arith.constant dense<0.000000e+00> : vector<17x8xf32>
    %269 = tpu.matmul %267, %268, %cst_127 {dimension_numbers = #tpu.dot_dimension_numbers<[1], [0], [0], [1], [0, 0, 1, 1], [], []>} : vector<17x17xf32>, vector<17x8xf32>, vector<17x8xf32> -> vector<17x8xf32>
    %270 = vector.extract_strided_slice %251 {offsets = [0, 0], sizes = [8, 32], strides = [1, 1]} : vector<32x32xf32> to vector<8x32xf32>
    %cst_128 = arith.constant dense<0.000000e+00> : vector<17x32xf32>
    %271 = tpu.matmul %269, %270, %cst_128 {dimension_numbers = #tpu.dot_dimension_numbers<[1], [0], [0], [1], [0, 0, 1, 1], [], []>} : vector<17x8xf32>, vector<8x32xf32>, vector<17x32xf32> -> vector<17x32xf32>
    %272 = arith.addf %252, %271 : vector<17x32xf32>
    %273 = vector.extract_strided_slice %244 {offsets = [0, 8], sizes = [17, 8], strides = [1, 1]} : vector<17x96xf32> to vector<17x8xf32>
    %274 = vector.extract_strided_slice %244 {offsets = [0, 40], sizes = [17, 8], strides = [1, 1]} : vector<17x96xf32> to vector<17x8xf32>
    %cst_129 = arith.constant dense<0.000000e+00> : vector<17x17xf32>
    %275 = tpu.matmul %273, %274, %cst_129 {dimension_numbers = #tpu.dot_dimension_numbers<[1], [1], [0], [0], [0, 0, 1, 0], [], []>} : vector<17x8xf32>, vector<17x8xf32>, vector<17x17xf32> -> vector<17x17xf32>
    %cst_130 = arith.constant 0.353553385 : f32
    %276 = vector.broadcast %cst_130 : f32 to vector<17x17xf32>
    %277 = arith.mulf %275, %276 : vector<17x17xf32>
    %cst_131 = arith.constant dense<0xFF800000> : vector<17xf32>
    %278 = vector.multi_reduction <maximumf>, %277, %cst_131 [1] : vector<17x17xf32> to vector<17xf32>
    %279 = vector.shape_cast %278 : vector<17xf32> to vector<17x1xf32>
    %280 = vector.broadcast %279 : vector<17x1xf32> to vector<17x17xf32>
    %281 = arith.subf %277, %280 : vector<17x17xf32>
    %282 = math.exp %281 : vector<17x17xf32>
    %cst_132 = arith.constant dense<0.000000e+00> : vector<17xf32>
    %283 = vector.multi_reduction <add>, %282, %cst_132 [1] : vector<17x17xf32> to vector<17xf32>
    %284 = vector.shape_cast %283 : vector<17xf32> to vector<17x1xf32>
    %285 = tpu.reciprocal %284 {approx = true} : vector<17x1xf32> -> vector<17x1xf32>
    %286 = vector.broadcast %285 : vector<17x1xf32> to vector<17x17xf32>
    %287 = arith.mulf %282, %286 : vector<17x17xf32>
    %288 = vector.extract_strided_slice %249 {offsets = [0, 8], sizes = [17, 8], strides = [1, 1]} : vector<17x32xf32> to vector<17x8xf32>
    %cst_133 = arith.constant dense<0.000000e+00> : vector<17x8xf32>
    %289 = tpu.matmul %287, %288, %cst_133 {dimension_numbers = #tpu.dot_dimension_numbers<[1], [0], [0], [1], [0, 0, 1, 1], [], []>} : vector<17x17xf32>, vector<17x8xf32>, vector<17x8xf32> -> vector<17x8xf32>
    %290 = vector.extract_strided_slice %251 {offsets = [8, 0], sizes = [8, 32], strides = [1, 1]} : vector<32x32xf32> to vector<8x32xf32>
    %cst_134 = arith.constant dense<0.000000e+00> : vector<17x32xf32>
    %291 = tpu.matmul %289, %290, %cst_134 {dimension_numbers = #tpu.dot_dimension_numbers<[1], [0], [0], [1], [0, 0, 1, 1], [], []>} : vector<17x8xf32>, vector<8x32xf32>, vector<17x32xf32> -> vector<17x32xf32>
    %292 = arith.addf %272, %291 : vector<17x32xf32>
    %293 = vector.extract_strided_slice %244 {offsets = [0, 16], sizes = [17, 8], strides = [1, 1]} : vector<17x96xf32> to vector<17x8xf32>
    %294 = vector.extract_strided_slice %244 {offsets = [0, 48], sizes = [17, 8], strides = [1, 1]} : vector<17x96xf32> to vector<17x8xf32>
    %cst_135 = arith.constant dense<0.000000e+00> : vector<17x17xf32>
    %295 = tpu.matmul %293, %294, %cst_135 {dimension_numbers = #tpu.dot_dimension_numbers<[1], [1], [0], [0], [0, 0, 1, 0], [], []>} : vector<17x8xf32>, vector<17x8xf32>, vector<17x17xf32> -> vector<17x17xf32>
    %cst_136 = arith.constant 0.353553385 : f32
    %296 = vector.broadcast %cst_136 : f32 to vector<17x17xf32>
    %297 = arith.mulf %295, %296 : vector<17x17xf32>
    %cst_137 = arith.constant dense<0xFF800000> : vector<17xf32>
    %298 = vector.multi_reduction <maximumf>, %297, %cst_137 [1] : vector<17x17xf32> to vector<17xf32>
    %299 = vector.shape_cast %298 : vector<17xf32> to vector<17x1xf32>
    %300 = vector.broadcast %299 : vector<17x1xf32> to vector<17x17xf32>
    %301 = arith.subf %297, %300 : vector<17x17xf32>
    %302 = math.exp %301 : vector<17x17xf32>
    %cst_138 = arith.constant dense<0.000000e+00> : vector<17xf32>
    %303 = vector.multi_reduction <add>, %302, %cst_138 [1] : vector<17x17xf32> to vector<17xf32>
    %304 = vector.shape_cast %303 : vector<17xf32> to vector<17x1xf32>
    %305 = tpu.reciprocal %304 {approx = true} : vector<17x1xf32> -> vector<17x1xf32>
    %306 = vector.broadcast %305 : vector<17x1xf32> to vector<17x17xf32>
    %307 = arith.mulf %302, %306 : vector<17x17xf32>
    %308 = vector.extract_strided_slice %249 {offsets = [0, 16], sizes = [17, 8], strides = [1, 1]} : vector<17x32xf32> to vector<17x8xf32>
    %cst_139 = arith.constant dense<0.000000e+00> : vector<17x8xf32>
    %309 = tpu.matmul %307, %308, %cst_139 {dimension_numbers = #tpu.dot_dimension_numbers<[1], [0], [0], [1], [0, 0, 1, 1], [], []>} : vector<17x17xf32>, vector<17x8xf32>, vector<17x8xf32> -> vector<17x8xf32>
    %310 = vector.extract_strided_slice %251 {offsets = [16, 0], sizes = [8, 32], strides = [1, 1]} : vector<32x32xf32> to vector<8x32xf32>
    %cst_140 = arith.constant dense<0.000000e+00> : vector<17x32xf32>
    %311 = tpu.matmul %309, %310, %cst_140 {dimension_numbers = #tpu.dot_dimension_numbers<[1], [0], [0], [1], [0, 0, 1, 1], [], []>} : vector<17x8xf32>, vector<8x32xf32>, vector<17x32xf32> -> vector<17x32xf32>
    %312 = arith.addf %292, %311 : vector<17x32xf32>
    %313 = vector.extract_strided_slice %244 {offsets = [0, 24], sizes = [17, 8], strides = [1, 1]} : vector<17x96xf32> to vector<17x8xf32>
    %314 = vector.extract_strided_slice %244 {offsets = [0, 56], sizes = [17, 8], strides = [1, 1]} : vector<17x96xf32> to vector<17x8xf32>
    %cst_141 = arith.constant dense<0.000000e+00> : vector<17x17xf32>
    %315 = tpu.matmul %313, %314, %cst_141 {dimension_numbers = #tpu.dot_dimension_numbers<[1], [1], [0], [0], [0, 0, 1, 0], [], []>} : vector<17x8xf32>, vector<17x8xf32>, vector<17x17xf32> -> vector<17x17xf32>
    %cst_142 = arith.constant 0.353553385 : f32
    %316 = vector.broadcast %cst_142 : f32 to vector<17x17xf32>
    %317 = arith.mulf %315, %316 : vector<17x17xf32>
    %cst_143 = arith.constant dense<0xFF800000> : vector<17xf32>
    %318 = vector.multi_reduction <maximumf>, %317, %cst_143 [1] : vector<17x17xf32> to vector<17xf32>
    %319 = vector.shape_cast %318 : vector<17xf32> to vector<17x1xf32>
    %320 = vector.broadcast %319 : vector<17x1xf32> to vector<17x17xf32>
    %321 = arith.subf %317, %320 : vector<17x17xf32>
    %322 = math.exp %321 : vector<17x17xf32>
    %cst_144 = arith.constant dense<0.000000e+00> : vector<17xf32>
    %323 = vector.multi_reduction <add>, %322, %cst_144 [1] : vector<17x17xf32> to vector<17xf32>
    %324 = vector.shape_cast %323 : vector<17xf32> to vector<17x1xf32>
    %325 = tpu.reciprocal %324 {approx = true} : vector<17x1xf32> -> vector<17x1xf32>
    %326 = vector.broadcast %325 : vector<17x1xf32> to vector<17x17xf32>
    %327 = arith.mulf %322, %326 : vector<17x17xf32>
    %328 = vector.extract_strided_slice %249 {offsets = [0, 24], sizes = [17, 8], strides = [1, 1]} : vector<17x32xf32> to vector<17x8xf32>
    %cst_145 = arith.constant dense<0.000000e+00> : vector<17x8xf32>
    %329 = tpu.matmul %327, %328, %cst_145 {dimension_numbers = #tpu.dot_dimension_numbers<[1], [0], [0], [1], [0, 0, 1, 1], [], []>} : vector<17x17xf32>, vector<17x8xf32>, vector<17x8xf32> -> vector<17x8xf32>
    %330 = vector.extract_strided_slice %251 {offsets = [24, 0], sizes = [8, 32], strides = [1, 1]} : vector<32x32xf32> to vector<8x32xf32>
    %cst_146 = arith.constant dense<0.000000e+00> : vector<17x32xf32>
    %331 = tpu.matmul %329, %330, %cst_146 {dimension_numbers = #tpu.dot_dimension_numbers<[1], [0], [0], [1], [0, 0, 1, 1], [], []>} : vector<17x8xf32>, vector<8x32xf32>, vector<17x32xf32> -> vector<17x32xf32>
    %332 = arith.addf %312, %331 : vector<17x32xf32>
    %333 = arith.addf %215, %332 : vector<17x32xf32>
    %c1_147 = arith.constant 1 : index
    %c0_148 = arith.constant 0 : index
    %c0_149 = arith.constant 0 : index
    %334 = vector.load %arg11[%c1_147, %c0_148, %c0_149] : memref<2x1x32xf32, #tpu.memory_space<vmem>>, vector<1x1x32xf32>
    %335 = vector.shape_cast %334 : vector<1x1x32xf32> to vector<1x32xf32>
    %336 = vector.broadcast %335 : vector<1x32xf32> to vector<17x32xf32>
    %337 = arith.addf %333, %336 : vector<17x32xf32>
    %c1_150 = arith.constant 1 : index
    %c0_151 = arith.constant 0 : index
    %c0_152 = arith.constant 0 : index
    %338 = vector.load %arg12[%c1_150, %c0_151, %c0_152] : memref<2x1x32xf32, #tpu.memory_space<vmem>>, vector<1x1x32xf32>
    %339 = vector.shape_cast %338 : vector<1x1x32xf32> to vector<1x32xf32>
    %c1_153 = arith.constant 1 : index
    %c0_154 = arith.constant 0 : index
    %c0_155 = arith.constant 0 : index
    %340 = vector.load %arg13[%c1_153, %c0_154, %c0_155] : memref<2x1x32xf32, #tpu.memory_space<vmem>>, vector<1x1x32xf32>
    %341 = vector.shape_cast %340 : vector<1x1x32xf32> to vector<1x32xf32>
    %cst_156 = arith.constant dense<0.000000e+00> : vector<17xf32>
    %342 = vector.multi_reduction <add>, %337, %cst_156 [1] : vector<17x32xf32> to vector<17xf32>
    %343 = vector.shape_cast %342 : vector<17xf32> to vector<17x1xf32>
    %cst_157 = arith.constant 3.200000e+01 : f32
    %344 = vector.broadcast %cst_157 : f32 to vector<17x1xf32>
    %345 = arith.divf %343, %344 : vector<17x1xf32>
    %346 = vector.broadcast %345 : vector<17x1xf32> to vector<17x32xf32>
    %347 = arith.subf %337, %346 : vector<17x32xf32>
    %348 = arith.mulf %347, %347 : vector<17x32xf32>
    %cst_158 = arith.constant dense<0.000000e+00> : vector<17xf32>
    %349 = vector.multi_reduction <add>, %348, %cst_158 [1] : vector<17x32xf32> to vector<17xf32>
    %350 = vector.shape_cast %349 : vector<17xf32> to vector<17x1xf32>
    %cst_159 = arith.constant 3.200000e+01 : f32
    %351 = vector.broadcast %cst_159 : f32 to vector<17x1xf32>
    %352 = arith.divf %350, %351 : vector<17x1xf32>
    %353 = vector.broadcast %345 : vector<17x1xf32> to vector<17x32xf32>
    %354 = arith.subf %337, %353 : vector<17x32xf32>
    %cst_160 = arith.constant 9.99999974E-6 : f32
    %355 = vector.broadcast %cst_160 : f32 to vector<17x1xf32>
    %356 = arith.addf %352, %355 : vector<17x1xf32>
    %357 = math.rsqrt %356 : vector<17x1xf32>
    %358 = vector.broadcast %357 : vector<17x1xf32> to vector<17x32xf32>
    %359 = arith.mulf %354, %358 : vector<17x32xf32>
    %360 = vector.broadcast %339 : vector<1x32xf32> to vector<17x32xf32>
    %361 = arith.mulf %359, %360 : vector<17x32xf32>
    %362 = vector.broadcast %341 : vector<1x32xf32> to vector<17x32xf32>
    %363 = arith.addf %361, %362 : vector<17x32xf32>
    %c1_161 = arith.constant 1 : index
    %c0_162 = arith.constant 0 : index
    %c0_163 = arith.constant 0 : index
    %364 = vector.load %arg14[%c1_161, %c0_162, %c0_163] : memref<2x32x64xf32, #tpu.memory_space<vmem>>, vector<1x32x64xf32>
    %365 = vector.shape_cast %364 : vector<1x32x64xf32> to vector<32x64xf32>
    %cst_164 = arith.constant dense<0.000000e+00> : vector<17x64xf32>
    %366 = tpu.matmul %363, %365, %cst_164 {dimension_numbers = #tpu.dot_dimension_numbers<[1], [0], [0], [1], [0, 0, 1, 1], [], []>} : vector<17x32xf32>, vector<32x64xf32>, vector<17x64xf32> -> vector<17x64xf32>
    %c1_165 = arith.constant 1 : index
    %c0_166 = arith.constant 0 : index
    %c0_167 = arith.constant 0 : index
    %367 = vector.load %arg15[%c1_165, %c0_166, %c0_167] : memref<2x1x64xf32, #tpu.memory_space<vmem>>, vector<1x1x64xf32>
    %368 = vector.shape_cast %367 : vector<1x1x64xf32> to vector<1x64xf32>
    %369 = vector.broadcast %368 : vector<1x64xf32> to vector<17x64xf32>
    %370 = arith.addf %366, %369 : vector<17x64xf32>
    %cst_168 = arith.constant 5.000000e-01 : f32
    %371 = vector.broadcast %cst_168 : f32 to vector<17x64xf32>
    %372 = arith.mulf %371, %370 : vector<17x64xf32>
    %cst_169 = arith.constant 0.707106769 : f32
    %373 = vector.broadcast %cst_169 : f32 to vector<17x64xf32>
    %374 = arith.mulf %370, %373 : vector<17x64xf32>
    %cst_170 = arith.constant 0.000000e+00 : f32
    %375 = vector.broadcast %cst_170 : f32 to vector<17x64xf32>
    %376 = arith.cmpf oge, %374, %375 : vector<17x64xf32>
    %cst_171 = arith.constant 1.000000e+00 : f32
    %cst_172 = arith.constant -1.000000e+00 : f32
    %377 = vector.broadcast %cst_171 : f32 to vector<17x64xf32>
    %378 = vector.broadcast %cst_172 : f32 to vector<17x64xf32>
    %379 = arith.select %376, %377, %378 : vector<17x64xi1>, vector<17x64xf32>
    %380 = math.absf %374 : vector<17x64xf32>
    %cst_173 = arith.constant 0.327591091 : f32
    %381 = vector.broadcast %cst_173 : f32 to vector<17x64xf32>
    %382 = arith.mulf %381, %380 : vector<17x64xf32>
    %cst_174 = arith.constant 1.000000e+00 : f32
    %383 = vector.broadcast %cst_174 : f32 to vector<17x64xf32>
    %384 = arith.addf %383, %382 : vector<17x64xf32>
    %cst_175 = arith.constant 1.000000e+00 : f32
    %385 = vector.broadcast %cst_175 : f32 to vector<17x64xf32>
    %386 = arith.divf %385, %384 : vector<17x64xf32>
    %cst_176 = arith.constant 1.06140542 : f32
    %387 = vector.broadcast %cst_176 : f32 to vector<17x64xf32>
    %388 = arith.mulf %387, %386 : vector<17x64xf32>
    %cst_177 = arith.constant -1.45315206 : f32
    %389 = vector.broadcast %cst_177 : f32 to vector<17x64xf32>
    %390 = arith.addf %388, %389 : vector<17x64xf32>
    %391 = arith.mulf %390, %386 : vector<17x64xf32>
    %cst_178 = arith.constant 1.42141378 : f32
    %392 = vector.broadcast %cst_178 : f32 to vector<17x64xf32>
    %393 = arith.addf %391, %392 : vector<17x64xf32>
    %394 = arith.mulf %393, %386 : vector<17x64xf32>
    %cst_179 = arith.constant -0.284496725 : f32
    %395 = vector.broadcast %cst_179 : f32 to vector<17x64xf32>
    %396 = arith.addf %394, %395 : vector<17x64xf32>
    %397 = arith.mulf %396, %386 : vector<17x64xf32>
    %cst_180 = arith.constant 0.254829586 : f32
    %398 = vector.broadcast %cst_180 : f32 to vector<17x64xf32>
    %399 = arith.addf %397, %398 : vector<17x64xf32>
    %400 = arith.mulf %399, %386 : vector<17x64xf32>
    %cst_181 = arith.constant 0.000000e+00 : f32
    %401 = vector.broadcast %cst_181 : f32 to vector<17x64xf32>
    %402 = arith.subf %401, %380 : vector<17x64xf32>
    %403 = arith.mulf %402, %380 : vector<17x64xf32>
    %404 = math.exp %403 : vector<17x64xf32>
    %405 = arith.mulf %400, %404 : vector<17x64xf32>
    %cst_182 = arith.constant 1.000000e+00 : f32
    %406 = vector.broadcast %cst_182 : f32 to vector<17x64xf32>
    %407 = arith.subf %406, %405 : vector<17x64xf32>
    %408 = arith.mulf %379, %407 : vector<17x64xf32>
    %cst_183 = arith.constant 1.000000e+00 : f32
    %409 = vector.broadcast %cst_183 : f32 to vector<17x64xf32>
    %410 = arith.addf %409, %408 : vector<17x64xf32>
    %411 = arith.mulf %372, %410 : vector<17x64xf32>
    %c1_184 = arith.constant 1 : index
    %c0_185 = arith.constant 0 : index
    %c0_186 = arith.constant 0 : index
    %412 = vector.load %arg16[%c1_184, %c0_185, %c0_186] : memref<2x64x32xf32, #tpu.memory_space<vmem>>, vector<1x64x32xf32>
    %413 = vector.shape_cast %412 : vector<1x64x32xf32> to vector<64x32xf32>
    %cst_187 = arith.constant dense<0.000000e+00> : vector<17x32xf32>
    %414 = tpu.matmul %411, %413, %cst_187 {dimension_numbers = #tpu.dot_dimension_numbers<[1], [0], [0], [1], [0, 0, 1, 1], [], []>} : vector<17x64xf32>, vector<64x32xf32>, vector<17x32xf32> -> vector<17x32xf32>
    %415 = arith.addf %337, %414 : vector<17x32xf32>
    %c1_188 = arith.constant 1 : index
    %c0_189 = arith.constant 0 : index
    %c0_190 = arith.constant 0 : index
    %416 = vector.load %arg17[%c1_188, %c0_189, %c0_190] : memref<2x1x32xf32, #tpu.memory_space<vmem>>, vector<1x1x32xf32>
    %417 = vector.shape_cast %416 : vector<1x1x32xf32> to vector<1x32xf32>
    %418 = vector.broadcast %417 : vector<1x32xf32> to vector<17x32xf32>
    %419 = arith.addf %415, %418 : vector<17x32xf32>
    %420 = vector.extract_strided_slice %419 {offsets = [0, 0], sizes = [1, 32], strides = [1, 1]} : vector<17x32xf32> to vector<1x32xf32>
    %c0_191 = arith.constant 0 : index
    %c0_192 = arith.constant 0 : index
    %421 = vector.load %arg18[%c0_191, %c0_192] : memref<1x32xf32, #tpu.memory_space<vmem>>, vector<1x32xf32>
    %c0_193 = arith.constant 0 : index
    %c0_194 = arith.constant 0 : index
    %422 = vector.load %arg19[%c0_193, %c0_194] : memref<1x32xf32, #tpu.memory_space<vmem>>, vector<1x32xf32>
    %cst_195 = arith.constant dense<0.000000e+00> : vector<1xf32>
    %423 = vector.multi_reduction <add>, %420, %cst_195 [1] : vector<1x32xf32> to vector<1xf32>
    %424 = vector.shape_cast %423 : vector<1xf32> to vector<1x1xf32>
    %cst_196 = arith.constant 3.200000e+01 : f32
    %425 = vector.broadcast %cst_196 : f32 to vector<1x1xf32>
    %426 = arith.divf %424, %425 : vector<1x1xf32>
    %427 = vector.broadcast %426 : vector<1x1xf32> to vector<1x32xf32>
    %428 = arith.subf %420, %427 : vector<1x32xf32>
    %429 = arith.mulf %428, %428 : vector<1x32xf32>
    %cst_197 = arith.constant dense<0.000000e+00> : vector<1xf32>
    %430 = vector.multi_reduction <add>, %429, %cst_197 [1] : vector<1x32xf32> to vector<1xf32>
    %431 = vector.shape_cast %430 : vector<1xf32> to vector<1x1xf32>
    %cst_198 = arith.constant 3.200000e+01 : f32
    %432 = vector.broadcast %cst_198 : f32 to vector<1x1xf32>
    %433 = arith.divf %431, %432 : vector<1x1xf32>
    %434 = vector.broadcast %426 : vector<1x1xf32> to vector<1x32xf32>
    %435 = arith.subf %420, %434 : vector<1x32xf32>
    %cst_199 = arith.constant 9.99999974E-6 : f32
    %436 = vector.broadcast %cst_199 : f32 to vector<1x1xf32>
    %437 = arith.addf %433, %436 : vector<1x1xf32>
    %438 = math.rsqrt %437 : vector<1x1xf32>
    %439 = vector.broadcast %438 : vector<1x1xf32> to vector<1x32xf32>
    %440 = arith.mulf %435, %439 : vector<1x32xf32>
    %441 = arith.mulf %440, %421 : vector<1x32xf32>
    %442 = arith.addf %441, %422 : vector<1x32xf32>
    %c0_200 = arith.constant 0 : index
    %c0_201 = arith.constant 0 : index
    %443 = vector.load %arg20[%c0_200, %c0_201] : memref<32x10xf32, #tpu.memory_space<vmem>>, vector<32x10xf32>
    %cst_202 = arith.constant dense<0.000000e+00> : vector<1x10xf32>
    %444 = tpu.matmul %442, %443, %cst_202 {dimension_numbers = #tpu.dot_dimension_numbers<[1], [0], [0], [1], [0, 0, 1, 1], [], []>} : vector<1x32xf32>, vector<32x10xf32>, vector<1x10xf32> -> vector<1x10xf32>
    %c0_203 = arith.constant 0 : index
    %c0_204 = arith.constant 0 : index
    %445 = vector.load %arg21[%c0_203, %c0_204] : memref<1x10xf32, #tpu.memory_space<vmem>>, vector<1x10xf32>
    %446 = arith.addf %444, %445 : vector<1x10xf32>
    %c0_205 = arith.constant 0 : index
    %c0_206 = arith.constant 0 : index
    %c0_207 = arith.constant 0 : index
    %447 = vector.load %arg22[%c0_205, %c0_206, %c0_207] : memref<1x1x10xf32, #tpu.memory_space<vmem>>, vector<1x1x10xf32>
    %448 = vector.shape_cast %447 : vector<1x1x10xf32> to vector<1x10xf32>
    %449 = vector.shape_cast %446 : vector<1x10xf32> to vector<1x1x10xf32>
    tpu.vector_store %arg22[%c0_205, %c0_206, %c0_207], %449 {strides = array<i32>} : memref<1x1x10xf32, #tpu.memory_space<vmem>>, vector<1x1x10xf32>,
    return
  }
  func.func @transform_0(%arg0: i32, %arg1: memref<2x12xf32, #tpu.memory_space<smem>>) -> (i32, i32, i32) {
    %c0_i32 = arith.constant 0 : i32
    %c0_i32_0 = arith.constant 0 : i32
    %c0_i32_1 = arith.constant 0 : i32
    return %arg0, %c0_i32, %c0_i32_0 : i32, i32, i32
  }
  func.func @transform_1(%arg0: i32, %arg1: memref<2x12xf32, #tpu.memory_space<smem>>) -> (i32, i32) {
    %c0_i32 = arith.constant 0 : i32
    %c0_i32_0 = arith.constant 0 : i32
    %c0_i32_1 = arith.constant 0 : i32
    return %c0_i32, %c0_i32_0 : i32, i32
  }
  func.func @transform_2(%arg0: i32, %arg1: memref<2x12xf32, #tpu.memory_space<smem>>) -> (i32, i32) {
    %c0_i32 = arith.constant 0 : i32
    %c0_i32_0 = arith.constant 0 : i32
    %c0_i32_1 = arith.constant 0 : i32
    return %c0_i32, %c0_i32_0 : i32, i32
  }
  func.func @transform_3(%arg0: i32, %arg1: memref<2x12xf32, #tpu.memory_space<smem>>) -> (i32, i32) {
    %c0_i32 = arith.constant 0 : i32
    %c0_i32_0 = arith.constant 0 : i32
    %c0_i32_1 = arith.constant 0 : i32
    return %c0_i32, %c0_i32_0 : i32, i32
  }
  func.func @transform_4(%arg0: i32, %arg1: memref<2x12xf32, #tpu.memory_space<smem>>) -> (i32, i32) {
    %c0_i32 = arith.constant 0 : i32
    %c0_i32_0 = arith.constant 0 : i32
    %c0_i32_1 = arith.constant 0 : i32
    return %c0_i32, %c0_i32_0 : i32, i32
  }
  func.func @transform_5(%arg0: i32, %arg1: memref<2x12xf32, #tpu.memory_space<smem>>) -> (i32, i32, i32) {
    %c0_i32 = arith.constant 0 : i32
    %c0_i32_0 = arith.constant 0 : i32
    %c0_i32_1 = arith.constant 0 : i32
    %c0_i32_2 = arith.constant 0 : i32
    return %c0_i32, %c0_i32_0, %c0_i32_1 : i32, i32, i32
  }
  func.func @transform_6(%arg0: i32, %arg1: memref<2x12xf32, #tpu.memory_space<smem>>) -> (i32, i32, i32) {
    %c0_i32 = arith.constant 0 : i32
    %c0_i32_0 = arith.constant 0 : i32
    %c0_i32_1 = arith.constant 0 : i32
    %c0_i32_2 = arith.constant 0 : i32
    return %c0_i32, %c0_i32_0, %c0_i32_1 : i32, i32, i32
  }
  func.func @transform_7(%arg0: i32, %arg1: memref<2x12xf32, #tpu.memory_space<smem>>) -> (i32, i32, i32) {
    %c0_i32 = arith.constant 0 : i32
    %c0_i32_0 = arith.constant 0 : i32
    %c0_i32_1 = arith.constant 0 : i32
    %c0_i32_2 = arith.constant 0 : i32
    return %c0_i32, %c0_i32_0, %c0_i32_1 : i32, i32, i32
  }
  func.func @transform_8(%arg0: i32, %arg1: memref<2x12xf32, #tpu.memory_space<smem>>) -> (i32, i32, i32) {
    %c0_i32 = arith.constant 0 : i32
    %c0_i32_0 = arith.constant 0 : i32
    %c0_i32_1 = arith.constant 0 : i32
    %c0_i32_2 = arith.constant 0 : i32
    return %c0_i32, %c0_i32_0, %c0_i32_1 : i32, i32, i32
  }
  func.func @transform_9(%arg0: i32, %arg1: memref<2x12xf32, #tpu.memory_space<smem>>) -> (i32, i32, i32) {
    %c0_i32 = arith.constant 0 : i32
    %c0_i32_0 = arith.constant 0 : i32
    %c0_i32_1 = arith.constant 0 : i32
    %c0_i32_2 = arith.constant 0 : i32
    return %c0_i32, %c0_i32_0, %c0_i32_1 : i32, i32, i32
  }
  func.func @transform_10(%arg0: i32, %arg1: memref<2x12xf32, #tpu.memory_space<smem>>) -> (i32, i32, i32) {
    %c0_i32 = arith.constant 0 : i32
    %c0_i32_0 = arith.constant 0 : i32
    %c0_i32_1 = arith.constant 0 : i32
    %c0_i32_2 = arith.constant 0 : i32
    return %c0_i32, %c0_i32_0, %c0_i32_1 : i32, i32, i32
  }
  func.func @transform_11(%arg0: i32, %arg1: memref<2x12xf32, #tpu.memory_space<smem>>) -> (i32, i32, i32) {
    %c0_i32 = arith.constant 0 : i32
    %c0_i32_0 = arith.constant 0 : i32
    %c0_i32_1 = arith.constant 0 : i32
    %c0_i32_2 = arith.constant 0 : i32
    return %c0_i32, %c0_i32_0, %c0_i32_1 : i32, i32, i32
  }
  func.func @transform_12(%arg0: i32, %arg1: memref<2x12xf32, #tpu.memory_space<smem>>) -> (i32, i32, i32) {
    %c0_i32 = arith.constant 0 : i32
    %c0_i32_0 = arith.constant 0 : i32
    %c0_i32_1 = arith.constant 0 : i32
    %c0_i32_2 = arith.constant 0 : i32
    return %c0_i32, %c0_i32_0, %c0_i32_1 : i32, i32, i32
  }
  func.func @transform_13(%arg0: i32, %arg1: memref<2x12xf32, #tpu.memory_space<smem>>) -> (i32, i32, i32) {
    %c0_i32 = arith.constant 0 : i32
    %c0_i32_0 = arith.constant 0 : i32
    %c0_i32_1 = arith.constant 0 : i32
    %c0_i32_2 = arith.constant 0 : i32
    return %c0_i32, %c0_i32_0, %c0_i32_1 : i32, i32, i32
  }
  func.func @transform_14(%arg0: i32, %arg1: memref<2x12xf32, #tpu.memory_space<smem>>) -> (i32, i32, i32) {
    %c0_i32 = arith.constant 0 : i32
    %c0_i32_0 = arith.constant 0 : i32
    %c0_i32_1 = arith.constant 0 : i32
    %c0_i32_2 = arith.constant 0 : i32
    return %c0_i32, %c0_i32_0, %c0_i32_1 : i32, i32, i32
  }
  func.func @transform_15(%arg0: i32, %arg1: memref<2x12xf32, #tpu.memory_space<smem>>) -> (i32, i32, i32) {
    %c0_i32 = arith.constant 0 : i32
    %c0_i32_0 = arith.constant 0 : i32
    %c0_i32_1 = arith.constant 0 : i32
    %c0_i32_2 = arith.constant 0 : i32
    return %c0_i32, %c0_i32_0, %c0_i32_1 : i32, i32, i32
  }
  func.func @transform_16(%arg0: i32, %arg1: memref<2x12xf32, #tpu.memory_space<smem>>) -> (i32, i32) {
    %c0_i32 = arith.constant 0 : i32
    %c0_i32_0 = arith.constant 0 : i32
    %c0_i32_1 = arith.constant 0 : i32
    return %c0_i32, %c0_i32_0 : i32, i32
  }
  func.func @transform_17(%arg0: i32, %arg1: memref<2x12xf32, #tpu.memory_space<smem>>) -> (i32, i32) {
    %c0_i32 = arith.constant 0 : i32
    %c0_i32_0 = arith.constant 0 : i32
    %c0_i32_1 = arith.constant 0 : i32
    return %c0_i32, %c0_i32_0 : i32, i32
  }
  func.func @transform_18(%arg0: i32, %arg1: memref<2x12xf32, #tpu.memory_space<smem>>) -> (i32, i32) {
    %c0_i32 = arith.constant 0 : i32
    %c0_i32_0 = arith.constant 0 : i32
    %c0_i32_1 = arith.constant 0 : i32
    return %c0_i32, %c0_i32_0 : i32, i32
  }
  func.func @transform_19(%arg0: i32, %arg1: memref<2x12xf32, #tpu.memory_space<smem>>) -> (i32, i32) {
    %c0_i32 = arith.constant 0 : i32
    %c0_i32_0 = arith.constant 0 : i32
    %c0_i32_1 = arith.constant 0 : i32
    return %c0_i32, %c0_i32_0 : i32, i32
  }
  func.func @transform_20(%arg0: i32, %arg1: memref<2x12xf32, #tpu.memory_space<smem>>) -> (i32, i32, i32) {
    %c0_i32 = arith.constant 0 : i32
    %c0_i32_0 = arith.constant 0 : i32
    %c0_i32_1 = arith.constant 0 : i32
    return %arg0, %c0_i32, %c0_i32_0 : i32, i32, i32
  }
}

</mosaic_0001>

<bundles_post_ra>
// kernel: vit_forward.1
= control target key start
LH: loop header
LB: loop body
LE: loop exit
PB: predicated region body
PF: predicated region fallthrough
CT: control target
= control target key end

     0   :  { %s3545_s27 = smov [#allocation4]   ;;  %s4551_s0 = inlined_call_operand.vmem [shape: f32[2,12], index: 0, kind: input, shape index: {}]   ;;  %s4552_s1 = inlined_call_operand.vmem [shape: f32[2,16,64], index: 1, kind: input, shape index: {}]   ;;  %s4553_s2 = inlined_call_operand.vmem [shape: f32[64,32], index: 2, kind: input, shape index: {}]   ;;  %s4554_s3 = inlined_call_operand.vmem [shape: f32[1,32], index: 3, kind: input, shape index: {}]   ;;  %s4555_s4 = inlined_call_operand.vmem [shape: f32[1,32], index: 4, kind: input, shape index: {}]   ;;  %s4556_s5 = inlined_call_operand.vmem [shape: f32[17,32], index: 5, kind: input, shape index: {}]   ;;  %s4557_s6 = inlined_call_operand.vmem [shape: f32[2,1,32], index: 6, kind: input, shape index: {}]   ;;  %s4558_s7 = inlined_call_operand.vmem [shape: f32[2,1,32], index: 7, kind: input, shape index: {}]   ;;  %s4559_s8 = inlined_call_operand.vmem [shape: f32[2,32,96], index: 8, kind: input, shape index: {}]   ;;  %s4560_s9 = inlined_call_operand.vmem [shape: f32[2,32,32], index: 9, kind: input, shape index: {}]   ;;  %s4561_s10 = inlined_call_operand.vmem [shape: f32[2,1,32], index: 10, kind: input, shape index: {}]   ;;  %s4562_s11 = inlined_call_operand.vmem [shape: f32[2,1,32], index: 11, kind: input, shape index: {}]   ;;  %s4563_s12 = inlined_call_operand.vmem [shape: f32[2,1,32], index: 12, kind: input, shape index: {}]   ;;  %s4564_s13 = inlined_call_operand.vmem [shape: f32[2,32,64], index: 13, kind: input, shape index: {}]   ;;  %s4565_s14 = inlined_call_operand.vmem [shape: f32[2,1,64], index: 14, kind: input, shape index: {}]   ;;  %s4566_s15 = inlined_call_operand.vmem [shape: f32[2,64,32], index: 15, kind: input, shape index: {}]   ;;  %s4567_s16 = inlined_call_operand.vmem [shape: f32[2,1,32], index: 16, kind: input, shape index: {}]   ;;  %s4568_s17 = inlined_call_operand.vmem [shape: f32[1,32], index: 17, kind: input, shape index: {}]   ;;  %s4569_s18 = inlined_call_operand.vmem [shape: f32[1,32], index: 18, kind: input, shape index: {}]   ;;  %s4570_s19 = inlined_call_operand.vmem [shape: f32[32,10], index: 19, kind: input, shape index: {}]   ;;  %s4571_s20 = inlined_call_operand.vmem [shape: f32[1,10], index: 20, kind: input, shape index: {}]   ;;  %s4572_s21 = inlined_call_operand.hbm [shape: f32[2,1,10], index: 21, kind: output, shape index: {}]  }
   0x1   :  { %4602 = sst [smem:[#allocation16_spill]] %s4551_s0 }
   0x2   :  { %4603 = sst [smem:[#allocation17_spill]] %s4552_s1 }
   0x3   :  { %4604 = sst [smem:[#allocation18_spill]] %s4553_s2 }
   0x4   :  { %4605 = sst [smem:[#allocation19_spill]] %s4554_s3 }
   0x5   :  { %4606 = sst [smem:[#allocation20_spill]] %s4555_s4 }
   0x6   :  { %4607 = sst [smem:[#allocation21_spill]] %s4556_s5 }
   0x7   :  { %4608 = sst [smem:[#allocation22_spill]] %s4566_s15 }
   0x8   :  { %4609 = sst [smem:[#allocation23_spill]] %s4571_s20 }
   0x9   :  { %s4610_s26 = sld [smem:[#allocation16_spill]] }
   0xf   :  { %s27_s15 = sshll.u32 %s4610_s26, 4  ;;  %s28_s15 = int_to_ptr.vmem [resolvable:$true] %s27_s15 }
  0x10   :  { %30 = dma.vmem_to_smem %s28_s15, 32, %s3545_s27, [#allocation3] }
  0x11   :  { %3523 = dma.done.wait [#allocation3], 32 }
  0x12   :  { %3524 = vsyncadd [#allocation3], 4294967264 }
  0x13   :  { %33 = sfence }
  0x14   :  { %34 = vsyncpa [#allocation6], 0 }
  0x15   :  { %36 = vsyncpa [#allocation6 + $0x1], 0  ;;  %s3672_s3 = smov 0   ;;  %s3674_s28 = smov 0  }
  0x16   :  { %s3676_s29 = smov 0   ;;  %s3678_s0 = smov 0  }
  0x17 LB: > { %4611 = sst [smem:[#allocation9_spill]] %s3531_s3  ;;  %s3693_s15 = sadd.s32 4294967295, %s3543_s0   ;;  %s3543_s0 = sphi %s3678_s0, %s4640_s0   ;;  %s3539_s29 = sphi %s3676_s29, %s4642_s29   ;;  %s3535_s28 = sphi %s3674_s28, %s4644_s28   ;;  %s3531_s3 = sphi %s3672_s3, %s4643_s3  }
  0x18   : > { %4612 = sst [smem:[#allocation10_spill]] %s3539_s29  ;;  %s3049_s4 = sadd.s32 4294967294, %s3543_s0  }
  0x19   : > { %4613 = sst [smem:[#allocation11_spill]] %s3543_s0  ;;  %s3697_s30 = sadd.s32 1, %s3543_s0  }
  0x1a   : > { %4614 = sst [smem:[#allocation12_spill]] %s3697_s30  ;;  %s474_s5 = sadd.s32 1, %s3539_s29 }
  0x1b   : > { %s471_s22 = ssub.s32 %s3543_s0, %s3697_s30  ;;  %p484_p0 = scmp.ne.s32.totalorder %s3539_s29, %s3535_s28 }
  0x1c   : > { %p472_p1 = scmp.eq.s32.totalorder %s471_s22, 0  ;;  %p485_p2 = scmp.eq.s32.totalorder %s3693_s15, 1 }
  0x1d   : > { %p490_p3 = scmp.ne.s32.totalorder %s3535_s28, %s3531_s3  ;;  %p491_p4 = scmp.eq.s32.totalorder %s3049_s4, 1 }
  0x1e   : > { %s3708_s23 = scalar_select %p472_p1, %s3539_s29, %s474_s5  }
  0x1f   : > { %p3710_p5 = por %p485_p2, %p484_p0  ;;  %p3714_p6 = por %p491_p4, %p490_p3 }
  0x20   : > { %4615 = sst [smem:[#allocation13_spill]] %s3708_s23  ;;  %p3052_p7 = scmp.ge.s32.totalorder %s3543_s0, 1 }
  0x21   : > { %s4616_s1 = scalar_select %p3710_p5, 1, 0 }
  0x22   : > { %s4618_s24 = scalar_select %p3714_p6, 1, 0 }
  0x23   : > { %4617 = sst [smem:[#allocation14_spill]] %s4616_s1  ;;  %p574_p8 = scmp.lt.s32.totalorder %s3543_s0, 3 }
  0x24   : > { %4619 = sst [smem:[#allocation15_spill]] %s4618_s24 }
  0x25   : > { %p575_p9 = pnand %p3052_p7, %p574_p8 }
  0x26   : > { %s4620_s26 = sld [smem:[#allocation18_spill]] (!%p575_p9)  ;;  %p631_p10 = scmp.lt.s32.totalorder (!%p575_p9), %s3693_s15, 1 }
  0x27   : > { %578 = sbr.rel (%p575_p9) target bundleno = 5314 (0x14c2), region = 100  ;;  %s4621_s29 = sld [smem:[#allocation17_spill]] (!%p575_p9) }
  0x28   : > { %s4622_s2 = sld [smem:[#allocation21_spill]] (!%p575_p9)  ;;  %s4598_s24 = smov (!%p575_p9), 120  }
  0x29   : > { %s4623_s25 = sld [smem:[#allocation20_spill]] (!%p575_p9)  ;;  %s4594_s3 = smov (!%p575_p9), 72  }
  0x2a   : > { %s4624_s5 = sld [smem:[#allocation19_spill]] (!%p575_p9)  ;;  %s4590_s0 = smov (!%p575_p9), 104  }
  0x2b   : > { %s4596_s27 = smov (!%p575_p9), 80   ;;  %s4584_s22 = smov (!%p575_p9), 48  }
  0x2c   : > { %v645_v0 = vld [vmem:[%s4620_s26 + $0x38] sm:$0xff]  ;;  %v644_v1 = vld [vmem:[%s4620_s26 + $0x30] sm:$0xff]  ;;  %v643_v2 = vld [vmem:[%s4620_s26 + $0x28] sm:$0xff]  ;;  %s632_s23 = scalar_select %p631_p10, %s3693_s15, 1  ;;  %vm650_vm0 = vcmask 523264   ;;  %vm685_vm1 = vcmask 253952  }
  0x2d   : > { %665 = vmatpush.msra.mxu0 %v645_v0  ;;  %v642_v3 = vld [vmem:[%s4620_s26 + $0x20] sm:$0xff]  ;;  %v641_v4 = vld [vmem:[%s4620_s26 + $0x18] sm:$0xff]  ;;  %v640_v5 = vld [vmem:[%s4620_s26 + $0x10] sm:$0xff]  ;;  %vm690_vm2 = vcmask 1046528   ;;  %vm700_vm3 = vcmask 261120   ;;  %v3546_v33 = vmov 32.0   ;;  %s2990_s1 = scalar_lea.hbm %s4572_s21, %s3693_s15 }
  0x2e   : > { %s3210_s4 = sshll.u32 %s632_s23, 4  ;;  %v639_v6 = vld [vmem:[%s4620_s26 + $0x8] sm:$0xff]  ;;  %v638_v7 = vld [vmem:[%s4620_s26] sm:$0xff]  ;;  %v682_v20 = vld [vmem:[%s4622_s2 + $0x10] sm:$0x1]  ;;  %3319 = vrcp.f32 %v3546_v33  ;;  %vm845_vm14 = vcmask 64512  }
  0x2f   : > { %666 = vmatpush.msra.mxu0 %v644_v1  ;;  %s635_s30 = scalar_lea.vmem %s4621_s29, %s3210_s4  ;;  %v680_v10 = vld [vmem:[%s4622_s2] sm:$0xff]  ;;  %v681_v13 = vld [vmem:[%s4622_s2 + $0x8] sm:$0xff]  ;;  %v694_v22 = vrot.slane %v682_v20, 1  ;;  %v796_v55 = vld [vmem:[%s4559_s8 + $0x18] sm:$0xff]  ;;  %s3547_s29 = smov 96   ;;  %vm887_vm15 = vcmask 138240  }
  0x30   : > { %v636_v8 = vld [vmem:[%s635_s30] sm:$0xff]  ;;  %v637_v9 = vld [vmem:[%s635_s30 + $0x8] sm:$0xff]  ;;  %v691_v14 = vrot.slane %v680_v10, 1  ;;  %v692_v15 = vrot.slane %v681_v13, 1  ;;  %818 = vmatpush.msra.mxu1 %v796_v55  ;;  %v795_v56 = vld [vmem:[%s4559_s8 + $0x10] sm:$0xff]  ;;  %s3548_s30 = smov 64  }
  0x31   : > { %667 = vmatpush.msra.mxu0 %v643_v2  ;;  %v683_v11 = vld [vmem:[%s4623_s25] sm:$0x1]  ;;  %v794_v57 = vld [vmem:[%s4559_s8 + $0x8] sm:$0xff]  ;;  %s3549_s23 = smov 88   ;;  %s4592_s25 = smov 112  }
  0x32   : > { %v684_v12 = vadd.f32 %v683_v11, %v680_v10  ;;  %v3304_v16 = vld [vmem:[%s4624_s5] ss:$0 sm:$0xff]  ;;  %v693_v18 = vsel %vm690_vm2, %v691_v14, %v692_v15  ;;  %v695_v24 = vsel %vm690_vm2, %v692_v15, %v694_v22  ;;  %819 = vmatpush.msra.mxu1 %v795_v56  ;;  %vm894_vm2 = vcmask 131072   ;;  %s4588_s4 = smov 56   ;;  %s4586_s5 = smov 40  }
  0x33   : > { %668 = vmatpush.msra.mxu0 %v642_v3  ;;  %v793_v58 = vld [vmem:[%s4559_s8] sm:$0xff]  ;;  %s4628_s20 = smov 80   ;;  %s2994_s2 = sshll.u32 %s2990_s1, 4  ;;  %s2995_s2 = int_to_ptr.hbm [resolvable:$true] %s2994_s2 }
  0x34   : > { %686 = vst.msk [vmem:[#allocation2] sm:$0x1] %vm685_vm1, %v684_v12  ;;  %v3320_v34 = vpop.eup %3319  ;;  %820 = vmatpush.msra.mxu1 %v794_v57  ;;  %v3305_v12 = vld [vmem:[%s4557_s6] ss:$0 sm:$0xff] }
  0x35   : > { %669 = vmatpush.msra.mxu0 %v641_v4  ;;  %v718_v35 = vmul.f32 32.0, %v3320_v34  ;;  %vm722_vm4 = vweird.f32 %v3320_v34  ;;  %v832_v57 = vld [vmem:[%s4560_s9] sm:$0xff] }
  0x36   : > { %821 = vmatpush.msra.mxu1 %v793_v58 }
  0x37   : > { %670 = vmatpush.msra.mxu0 %v640_v5  ;;  %v719_v36 = vsub.f32 1.0, %v718_v35 }
  0x39   : > { %671 = vmatpush.msra.mxu0 %v639_v6  ;;  %v720_v37 = vmul.f32 %v3320_v34, %v719_v36 }
  0x3b   : > { %672 = vmatpush.msra.mxu0 %v638_v7  ;;  %v721_v38 = vadd.f32 %v3320_v34, %v720_v37 }
  0x3c   : > { %3055 = vmatmul.msk.f32.vlgmr.msra.gmra.mxu0 %vm650_vm0, %v636_v8 }
  0x3d   : > { %v3781_v39 = vsel %vm722_vm4, %v3320_v34, %v721_v38  ;;  %vm939_vm4 = vcmask 1040384  }
  0x44   : > { %3056 = vmatmul.msk.f32.gmra.mxu0 %vm650_vm0, %v637_v9 }
  0xb9   : > { %v674_v17 = vpop.f32.mrf.mxu0 }
  0xba   : > { %v675_v19 = vadd.f32 %v3304_v16, %v674_v17 }
  0xbc   : > { %v698_v21 = vadd.f32 %v693_v18, %v675_v19 }
  0xbe   : > { %701 = vst.msk [vmem:[#allocation2 + $0x1] sm:$0xff] %vm700_vm3, %v698_v21 }
  0xc1   : > { %v677_v23 = vpop.f32.mrf.mxu0 }
  0xc2   : > { %v678_v25 = vadd.f32 %v3304_v16, %v677_v23  ;;  %v3306_v16 = vld [vmem:[%s4558_s7] ss:$0 sm:$0xff] }
  0xc4   : > { %v699_v26 = vadd.f32 %v695_v24, %v678_v25 }
  0xc5   : > { %v3768_v27 = vld [vmem:[#allocation2] sm:$0xff] }
  0xc6   : > { %702 = vst.msk [vmem:[#allocation2 + $0x9] sm:$0xff] %vm700_vm3, %v699_v26  ;;  %v708_v28 = vsel %vm700_vm3, %v3768_v27, 0.0 }
  0xc7   : > { %709 = vadd.xlane.f32.xlu0 %v708_v28 }
  0xcd   : > { %v3773_v29 = vld [vmem:[#allocation2 + $0x10] sm:$0x1]  ;;  %v3775_v30 = vld [vmem:[#allocation2 + $0x8] sm:$0xff] }
  0xce   : > { %v714_v31 = vsel %vm685_vm1, %v3773_v29, 0.0  ;;  %v711_v32 = vsel %vm700_vm3, %v3775_v30, 0.0 }
  0xcf   : > { %715 = vadd.xlane.f32.xlu1 %v714_v31  ;;  %712 = vadd.xlane.f32.xlu0 %v711_v32 }
 0x13a   : > { %v710_v40 = vpop.xlane.xlu0 %709 }
 0x13b   : > { %v724_v41 = vmul.f32 %v3781_v39, %v710_v40 }
 0x13d   : > { %v727_v42 = vsub.f32 %v3768_v27, %v724_v41 }
 0x13f   : > { %v730_v43 = vmul.f32 %v727_v42, %v727_v42 }
 0x141   : > { %v733_v44 = vsel %vm700_vm3, %v730_v43, 0.0 }
 0x142   : > { %v716_v45 = vpop.xlane.xlu1 %715  ;;  %734 = vadd.xlane.f32.xlu1 %v733_v44  ;;  %v713_v46 = vpop.xlane.xlu0 %712 }
 0x143   : > { %v725_v47 = vmul.f32 %v3781_v39, %v713_v46  ;;  %v726_v48 = vmul.f32 %v3781_v39, %v716_v45 }
 0x145   : > { %v728_v49 = vsub.f32 %v3775_v30, %v725_v47  ;;  %v3790_v51 = vsub.f32 %v3773_v29, %v726_v48 }
 0x147   : > { %v731_v50 = vmul.f32 %v728_v49, %v728_v49  ;;  %v732_v53 = vmul.f32 %v3790_v51, %v3790_v51 }
 0x149   : > { %v736_v52 = vsel %vm700_vm3, %v731_v50, 0.0  ;;  %v739_v54 = vsel %vm685_vm1, %v732_v53, 0.0 }
 0x14a   : > { %737 = vadd.xlane.f32.xlu2 %v736_v52 }
 0x152   : > { %740 = vadd.xlane.f32.xlu2 %v739_v54 }
 0x1b5   : > { %v735_v59 = vpop.xlane.xlu1 %734 }
 0x1b6   : > { %v742_v60 = vmul.f32 %v735_v59, %v3781_v39 }
 0x1b8   : > { %v745_v61 = vadd.f32 1e-05, %v742_v60 }
 0x1ba   : > { %3321 = vrsqrt.f32 %v745_v61  ;;  %vm754_vm6 = vweird.f32 %v745_v61 }
 0x1bd   : > { %v738_v62 = vpop.xlane.xlu2 %737 }
 0x1be   : > { %v743_v63 = vmul.f32 %v738_v62, %v3781_v39 }
 0x1c0   : > { %v3322_v0 = vpop.eup %3321  ;;  %v746_v1 = vadd.f32 1e-05, %v743_v63 }
 0x1c1   : > { %v749_v2 = vmul.f32 %v3322_v0, %v745_v61  ;;  %vm755_vm5 = vweird.f32 %v3322_v0 }
 0x1c2   : > { %3323 = vrsqrt.f32 %v746_v1  ;;  %vm756_vm7 = vmor %vm754_vm6, %vm755_vm5  ;;  %vm764_vm9 = vweird.f32 %v746_v1 }
 0x1c3   : > { %v750_v3 = vmul.f32 %v3322_v0, %v749_v2 }
 0x1c5   : > { %v751_v4 = vmul.f32 0.5, %v750_v3  ;;  %v741_v5 = vpop.xlane.xlu2 %740 }
 0x1c6   : > { %v744_v6 = vmul.f32 %v741_v5, %v3781_v39 }
 0x1c7   : > { %v752_v7 = vsub.f32 1.5, %v751_v4 }
 0x1c8   : > { %v3324_v8 = vpop.eup %3323  ;;  %v747_v9 = vadd.f32 1e-05, %v744_v6 }
 0x1c9   : > { %v753_v10 = vmul.f32 %v3322_v0, %v752_v7  ;;  %v759_v11 = vmul.f32 %v3324_v8, %v746_v1  ;;  %vm765_vm8 = vweird.f32 %v3324_v8 }
 0x1ca   : > { %3325 = vrsqrt.f32 %v747_v9  ;;  %vm766_vm10 = vmor %vm764_vm9, %vm765_vm8  ;;  %vm774_vm12 = vweird.f32 %v747_v9 }
 0x1cb   : > { %v757_v13 = vsel %vm756_vm7, %v3322_v0, %v753_v10  ;;  %v760_v14 = vmul.f32 %v3324_v8, %v759_v11 }
 0x1cc   : > { %v778_v15 = vmul.f32 %v757_v13, %v727_v42 }
 0x1cd   : > { %v761_v17 = vmul.f32 0.5, %v760_v14 }
 0x1ce   : > { %v784_v18 = vmul.f32 %v3305_v12, %v778_v15 }
 0x1cf   : > { %v762_v19 = vsub.f32 1.5, %v761_v17 }
 0x1d0   : > { %v3326_v20 = vpop.eup %3325  ;;  %v790_v21 = vadd.f32 %v3306_v16, %v784_v18 }
 0x1d1   : > { %v763_v22 = vmul.f32 %v3324_v8, %v762_v19  ;;  %v769_v23 = vmul.f32 %v3326_v20, %v747_v9  ;;  %vm775_vm11 = vweird.f32 %v3326_v20 }
 0x1d2   : > { %3057 = vmatmul.msk.f32.vlgmr.msra.gmra.mxu1 %vm700_vm3, %v790_v21  ;;  %vm776_vm13 = vmor %vm774_vm12, %vm775_vm11 }
 0x1d3   : > { %v767_v24 = vsel %vm766_vm10, %v3324_v8, %v763_v22  ;;  %v770_v25 = vmul.f32 %v3326_v20, %v769_v23 }
 0x1d4   : > { %v779_v26 = vmul.f32 %v767_v24, %v728_v49 }
 0x1d5   : > { %v771_v28 = vmul.f32 0.5, %v770_v25 }
 0x1d6   : > { %v785_v31 = vmul.f32 %v3305_v12, %v779_v26 }
 0x1d7   : > { %v772_v32 = vsub.f32 1.5, %v771_v28 }
 0x1d8   : > { %v791_v33 = vadd.f32 %v3306_v16, %v785_v31 }
 0x1d9   : > { %v773_v34 = vmul.f32 %v3326_v20, %v772_v32 }
 0x1da   : > { %3058 = vmatmul.msk.f32.gmra.mxu1 %vm700_vm3, %v791_v33 }
 0x1db   : > { %v777_v35 = vsel %vm776_vm13, %v3326_v20, %v773_v34 }
 0x1dc   : > { %v780_v36 = vmul.f32 %v777_v35, %v3790_v51 }
 0x1de   : > { %v786_v37 = vmul.f32 %v3305_v12, %v780_v36 }
 0x1e0   : > { %v792_v38 = vadd.f32 %v3306_v16, %v786_v37 }
 0x1e2   : > { %3059 = vmatmul.msk.f32.gmra.mxu1 %vm700_vm3, %v792_v38 }
 0x24f   : > { %v3821_v40 = vpop.f32.mrf.mxu1 }
 0x250   : > { %839 = vrot.lane.b32.xlu2 %v3821_v40, %s3547_s29 }
 0x257   : > { %v3825_v41 = vpop.f32.mrf.mxu1 }
 0x258   : > { %841 = vrot.lane.b32.xlu1 %v3825_v41, %s3547_s29  ;;  %v3849_v55 = vpack.i.bf16 %v3821_v40, %v3825_v41 }
 0x25f   : > { %v3829_v42 = vpop.f32.mrf.mxu1 }
 0x260   : > { %843 = vrot.lane.b32.xlu0 %v3829_v42, %s3547_s29 }
 0x2aa   : > { %v840_v45 = vpop.permute.xlu2 %839 }
 0x2ca   : > { %v842_v44 = vpop.permute.xlu1 %841 }
 0x2d2   : > { %v844_v43 = vpop.permute.xlu0 %843 }
 0x2d3   : > { %3060 = vmatpush.xpose.msk.msra.mxu2 %vm845_vm14, %v844_v43 }
 0x2d7   : > { %3061 = vmatpush.xpose.msk.msra.mxu2 %vm845_vm14, %v842_v44 }
 0x2db   : > { %3062 = vmatpush.xpose.msk.msra.mxu2 %vm845_vm14, %v840_v45 }
 0x2de   : > { %3063 = vmatmul.msk.f32.vlgmr.msra.gmra.mxu2 %vm845_vm14, %v3821_v40 }
 0x2df   : > { %1158 = vmatpush.msrb.mxu2 %v832_v57 }
 0x2e6   : > { %3064 = vmatmul.msk.f32.gmra.mxu2 %vm845_vm14, %v3825_v41 }
 0x2ee   : > { %3065 = vmatmul.msk.f32.gmra.mxu2 %vm845_vm14, %v3829_v42 }
 0x361   : > { %v875_v46 = vpop.f32.mrf.mxu2 }
 0x362   : > { %v884_v47 = vmul.f32 0.35355338, %v875_v46 }
 0x364   : > { %v888_v48 = vsel %vm887_vm15, %v884_v47, -inf }
 0x365   : > { %889 = vmax.xlane.f32.xlu0 %v888_v48 }
 0x369   : > { %v878_v49 = vpop.f32.mrf.mxu2 }
 0x36a   : > { %v885_v50 = vmul.f32 0.35355338, %v878_v49 }
 0x36c   : > { %v891_v51 = vsel %vm887_vm15, %v885_v50, -inf }
 0x36d   : > { %892 = vmax.xlane.f32.xlu2 %v891_v51 }
 0x371   : > { %v881_v52 = vpop.f32.mrf.mxu2 }
 0x372   : > { %v886_v53 = vmul.f32 0.35355338, %v881_v52 }
 0x374   : > { %v895_v54 = vsel %vm894_vm2, %v886_v53, -inf }
 0x375   : > { %896 = vmax.xlane.f32.xlu1 %v895_v54 }
 0x385   : > { %926 = vrot.lane.b32.xlu2 %v3829_v42, %s3548_s30 }
 0x38d   : > { %976 = vrot.lane.b32.xlu2 %v3825_v41, %s3549_s23 }
 0x38e   : > { %3265 = vrot.lane.b32.xlu1 %v3849_v55, %s3548_s30 }
 0x395   : > { %968 = vrot.lane.b32.xlu2 %v3821_v40, %s4598_s24 }
 0x396   : > { %974 = vrot.lane.b32.xlu1 %v3821_v40, %s3549_s23 }
 0x39d   : > { %1348 = vrot.lane.b32.xlu2 %v3829_v42, %s4594_s3 }
 0x39e   : > { %970 = vrot.lane.b32.xlu1 %v3825_v41, %s4598_s24 }
 0x3a5   : > { %972 = vrot.lane.b32.xlu2 %v3829_v42, %s4598_s24  ;;  %s4629_s24 = smov 72  }
 0x3a6   : > { %1346 = vrot.lane.b32.xlu1 %v3825_v41, %s4594_s3 }
 0x3ad   : > { %1338 = vrot.lane.b32.xlu2 %v3821_v40, %s4590_s0 }
 0x3ae   : > { %1344 = vrot.lane.b32.xlu1 %v3821_v40, %s4594_s3 }
 0x3b5   : > { %1340 = vrot.lane.b32.xlu2 %v3825_v41, %s4590_s0 }
 0x3b6   : > { %1169 = vrot.lane.b32.xlu1 %v3821_v40, %s4592_s25 }
 0x3bd   : > { %1173 = vrot.lane.b32.xlu2 %v3829_v42, %s4592_s25 }
 0x3be   : > { %1342 = vrot.lane.b32.xlu1 %v3829_v42, %s4590_s0  ;;  %s4625_s0 = sld [smem:[#allocation22_spill]] }
 0x3d8   : > { %v890_v56 = vpop.xlane.xlu0 %889 }
 0x3d9   : > { %v898_v58 = vsub.f32 %v884_v47, %v890_v56 }
 0x3db   : > { %v901_v59 = vmul.f32 1.442695, %v898_v58 }
 0x3dd   : > { %3327 = vpow2.f32 %v901_v59 }
 0x3e0   : > { %v893_v60 = vpop.xlane.xlu2 %892 }
 0x3e1   : > { %v899_v61 = vsub.f32 %v885_v50, %v893_v60 }
 0x3e3   : > { %v3328_v62 = vpop.eup %3327  ;;  %v903_v63 = vmul.f32 1.442695, %v899_v61 }
 0x3e4   : > { %v907_v0 = vsel %vm887_vm15, %v3328_v62, 0.0 }
 0x3e5   : > { %3329 = vpow2.f32 %v903_v63  ;;  %908 = vadd.xlane.f32.xlu0 %v907_v0 }
 0x3e8   : > { %v927_v1 = vpop.permute.xlu2 %926  ;;  %v897_v2 = vpop.xlane.xlu1 %896 }
 0x3e9   : > { %v900_v3 = vsub.f32 %v886_v53, %v897_v2  ;;  %3066 = vmatpush.msk.msra.mxu3 %vm939_vm4, %v927_v1 }
 0x3eb   : > { %v3330_v4 = vpop.eup %3329  ;;  %v905_v5 = vmul.f32 1.442695, %v900_v3 }
 0x3ec   : > { %v910_v6 = vsel %vm887_vm15, %v3330_v4, 0.0 }
 0x3ed   : > { %3331 = vpow2.f32 %v905_v5  ;;  %911 = vadd.xlane.f32.xlu0 %v910_v6 }
 0x3f0   : > { %v977_v7 = vpop.permute.xlu2 %976 }
 0x3f3   : > { %v3332_v8 = vpop.eup %3331 }
 0x3f4   : > { %v913_v9 = vsel %vm894_vm2, %v3332_v8, 0.0 }
 0x3f5   : > { %914 = vadd.xlane.f32.xlu0 %v913_v9 }
 0x3f8   : > { %v969_v10 = vpop.permute.xlu2 %968 }
 0x400   : > { %v1349_v11 = vpop.permute.xlu2 %1348  ;;  %v3266_v12 = vpop.permute.xlu1 %3265 }
 0x401   : > { %3099 = vmatpush.xpose.msk.msra.mxu2 %vm845_vm14, %v1349_v11  ;;  %v3267_v13 = vunpack.i.l.bf16 %v3266_v12  ;;  %v3268_v14 = vunpack.i.h.bf16 %v3266_v12 }
 0x403   : > { %956 = vmatpush.msra.mxu3 %v3267_v13 }
 0x405   : > { %957 = vmatpush.msra.mxu3 %v3268_v14 }
 0x408   : > { %v975_v15 = vpop.permute.xlu1 %974  ;;  %v973_v34 = vpop.permute.xlu2 %972 }
 0x409   : > { %978 = vrot.lane.b32.xlu0 %v3829_v42, %s3549_s23 }
 0x410   : > { %v971_v16 = vpop.permute.xlu1 %970  ;;  %v1339_v36 = vpop.permute.xlu2 %1338 }
 0x411   : > { %1179 = vrot.lane.b32.xlu0 %v3829_v42, %s4596_s27 }
 0x418   : > { %v1347_v17 = vpop.permute.xlu1 %1346  ;;  %v1341_v38 = vpop.permute.xlu2 %1340 }
 0x419   : > { %1177 = vrot.lane.b32.xlu0 %v3825_v41, %s4596_s27  ;;  %3100 = vmatpush.xpose.msk.msra.mxu2 %vm845_vm14, %v1347_v17 }
 0x420   : > { %v1345_v18 = vpop.permute.xlu1 %1344  ;;  %v1174_v44 = vpop.permute.xlu2 %1173 }
 0x421   : > { %1175 = vrot.lane.b32.xlu0 %v3821_v40, %s4596_s27  ;;  %3101 = vmatpush.xpose.msk.msra.mxu2 %vm845_vm14, %v1345_v18  ;;  %s4631_s27 = smov 104  }
 0x428   : > { %v1170_v37 = vpop.permute.xlu1 %1169 }
 0x429   : > { %1171 = vrot.lane.b32.xlu0 %v3825_v41, %s4592_s25  ;;  %s3127_s25 = sld [smem:[#allocation4 + $0x80]] }
 0x430   : > { %v1343_v50 = vpop.permute.xlu1 %1342 }
 0x458   : > { %v909_v19 = vpop.xlane.xlu0 %908 }
 0x459   : > { %3333 = vrcp.f32 %v909_v19 }
 0x45f   : > { %v3334_v20 = vpop.eup %3333 }
 0x460   : > { %v912_v21 = vpop.xlane.xlu0 %911  ;;  %v919_v22 = vmul.f32 %v3334_v20, %v3328_v62 }
 0x461   : > { %3335 = vrcp.f32 %v912_v21 }
 0x462   : > { %3067 = vmatmul.msk.f32.vlgmr.msra.gmra.mxu3 %vm887_vm15, %v919_v22 }
 0x467   : > { %v3336_v23 = vpop.eup %3335 }
 0x468   : > { %v915_v24 = vpop.xlane.xlu0 %914  ;;  %v920_v25 = vmul.f32 %v3336_v23, %v3330_v4 }
 0x469   : > { %3337 = vrcp.f32 %v915_v24 }
 0x46a   : > { %3068 = vmatmul.msk.f32.gmra.mxu3 %vm887_vm15, %v920_v25 }
 0x46f   : > { %v3338_v26 = vpop.eup %3337 }
 0x470   : > { %v921_v28 = vmul.f32 %v3338_v26, %v3332_v8 }
 0x472   : > { %3069 = vmatmul.msk.f32.gmra.mxu3 %vm887_vm15, %v921_v28 }
 0x47b   : > { %v979_v31 = vpop.permute.xlu0 %978 }
 0x47c   : > { %3070 = vmatpush.xpose.msk.msrb.mxu3 %vm845_vm14, %v979_v31 }
 0x480   : > { %3071 = vmatpush.xpose.msk.msrb.mxu3 %vm845_vm14, %v977_v7 }
 0x483   : > { %v1180_v32 = vpop.permute.xlu0 %1179 }
 0x484   : > { %3072 = vmatpush.xpose.msk.msrb.mxu3 %vm845_vm14, %v975_v15 }
 0x487   : > { %3073 = vmatmul.msk.f32.vlgmr.msrb.gmra.mxu3 %vm845_vm14, %v969_v10 }
 0x488   : > { %3086 = vmatpush.xpose.msk.msra.mxu3 %vm845_vm14, %v1180_v32 }
 0x48b   : > { %v1178_v33 = vpop.permute.xlu0 %1177 }
 0x48c   : > { %3087 = vmatpush.xpose.msk.msra.mxu3 %vm845_vm14, %v1178_v33 }
 0x48f   : > { %3074 = vmatmul.msk.f32.gmra.mxu3 %vm845_vm14, %v971_v16 }
 0x493   : > { %v1176_v35 = vpop.permute.xlu0 %1175 }
 0x494   : > { %3088 = vmatpush.xpose.msk.msra.mxu3 %vm845_vm14, %v1176_v35 }
 0x497   : > { %3075 = vmatmul.msk.f32.gmra.mxu3 %vm845_vm14, %v973_v34 }
 0x49b   : > { %v1172_v43 = vpop.permute.xlu0 %1171 }
 0x49f   : > { %3089 = vmatmul.msk.f32.vlgmr.msra.gmra.mxu3 %vm845_vm14, %v1170_v37 }
 0x4a7   : > { %3090 = vmatmul.msk.f32.gmra.mxu3 %vm845_vm14, %v1172_v43 }
 0x4af   : > { %3091 = vmatmul.msk.f32.gmra.mxu3 %vm845_vm14, %v1174_v44 }
 0x4e5   : > { %v959_v45 = vpop.f32.mrf.mxu3 }
 0x4e6   : > { %3083 = vmatmul.msk.f32.vlgmr.msrb.gmra.mxu2 %vm845_vm14, %v959_v45 }
 0x4ed   : > { %v962_v46 = vpop.f32.mrf.mxu3 }
 0x4ee   : > { %3084 = vmatmul.msk.f32.gmra.mxu2 %vm845_vm14, %v962_v46 }
 0x4f5   : > { %v965_v47 = vpop.f32.mrf.mxu3 }
 0x4f6   : > { %3085 = vmatmul.msk.f32.gmra.mxu2 %vm845_vm14, %v965_v47 }
 0x4fe   : > { %3102 = vmatmul.msk.f32.vlgmr.msra.gmra.mxu2 %vm845_vm14, %v1339_v36 }
 0x506   : > { %3103 = vmatmul.msk.f32.gmra.mxu2 %vm845_vm14, %v1341_v38 }
 0x50a   : > { %v1009_v48 = vpop.f32.mrf.mxu3 }
 0x50b   : > { %v1018_v49 = vmul.f32 0.35355338, %v1009_v48 }
 0x50d   : > { %v1021_v51 = vsel %vm887_vm15, %v1018_v49, -inf }
 0x50e   : > { %3104 = vmatmul.msk.f32.gmra.mxu2 %vm845_vm14, %v1343_v50  ;;  %1022 = vmax.xlane.f32.xlu0 %v1021_v51 }
 0x512   : > { %v1012_v52 = vpop.f32.mrf.mxu3 }
 0x513   : > { %v1019_v53 = vmul.f32 0.35355338, %v1012_v52 }
 0x515   : > { %v1024_v54 = vsel %vm887_vm15, %v1019_v53, -inf }
 0x516   : > { %1025 = vmax.xlane.f32.xlu1 %v1024_v54 }
 0x51a   : > { %v1015_v56 = vpop.f32.mrf.mxu3 }
 0x51b   : > { %v1020_v57 = vmul.f32 0.35355338, %v1015_v56 }
 0x51d   : > { %v1027_v58 = vsel %vm894_vm2, %v1020_v57, -inf }
 0x51e   : > { %1028 = vmax.xlane.f32.xlu2 %v1027_v58 }
 0x522   : > { %v1210_v59 = vpop.f32.mrf.mxu3 }
 0x523   : > { %v1219_v60 = vmul.f32 0.35355338, %v1210_v59 }
 0x525   : > { %v1222_v61 = vsel %vm887_vm15, %v1219_v60, -inf }
 0x526   : > { %1223 = vmax.xlane.f32.xlu1 %v1222_v61 }
 0x52a   : > { %v1213_v62 = vpop.f32.mrf.mxu3 }
 0x52b   : > { %v3924_v63 = vmul.f32 0.35355338, %v1213_v62 }
 0x52d   : > { %v1225_v0 = vsel %vm887_vm15, %v3924_v63, -inf }
 0x52e   : > { %1226 = vmax.xlane.f32.xlu0 %v1225_v0 }
 0x532   : > { %v1216_v1 = vpop.f32.mrf.mxu3 }
 0x533   : > { %v3928_v2 = vmul.f32 0.35355338, %v1216_v1 }
 0x535   : > { %v1228_v3 = vsel %vm894_vm2, %v3928_v2, -inf }
 0x536   : > { %1229 = vmax.xlane.f32.xlu2 %v1228_v3 }
 0x569   : > { %v3932_v4 = vpop.f32.mrf.mxu2 }
 0x571   : > { %v3934_v5 = vpop.f32.mrf.mxu2 }
 0x579   : > { %v3936_v6 = vpop.f32.mrf.mxu2 }
 0x581   : > { %v1379_v7 = vpop.f32.mrf.mxu2  ;;  %v1023_v8 = vpop.xlane.xlu0 %1022 }
 0x582   : > { %v1030_v9 = vsub.f32 %v1018_v49, %v1023_v8  ;;  %v1388_v19 = vmul.f32 0.35355338, %v1379_v7 }
 0x584   : > { %v1033_v10 = vmul.f32 1.442695, %v1030_v9  ;;  %v1391_v25 = vsel %vm887_vm15, %v1388_v19, -inf }
 0x586   : > { %3339 = vpow2.f32 %v1033_v10 }
 0x589   : > { %v1382_v11 = vpop.f32.mrf.mxu2  ;;  %v1026_v12 = vpop.xlane.xlu1 %1025 }
 0x58a   : > { %v1389_v13 = vmul.f32 0.35355338, %v1382_v11  ;;  %v1031_v15 = vsub.f32 %v1019_v53, %v1026_v12 }
 0x58c   : > { %v3938_v14 = vpop.eup %3339  ;;  %v1394_v16 = vsel %vm887_vm15, %v1389_v13, -inf  ;;  %v1035_v18 = vmul.f32 1.442695, %v1031_v15 }
 0x58d   : > { %1395 = vmax.xlane.f32.xlu2 %v1394_v16  ;;  %v1039_v17 = vsel %vm887_vm15, %v3938_v14, 0.0 }
 0x58e   : > { %1040 = vadd.xlane.f32.xlu0 %v1039_v17  ;;  %3341 = vpow2.f32 %v1035_v18 }
 0x591   : > { %v1385_v20 = vpop.f32.mrf.mxu2  ;;  %v1029_v21 = vpop.xlane.xlu2 %1028 }
 0x592   : > { %v1390_v22 = vmul.f32 0.35355338, %v1385_v20  ;;  %v1032_v23 = vsub.f32 %v1020_v57, %v1029_v21 }
 0x594   : > { %v1397_v24 = vsel %vm894_vm2, %v1390_v22, -inf  ;;  %v1037_v26 = vmul.f32 1.442695, %v1032_v23  ;;  %v3945_v28 = vpop.eup %3341 }
 0x595   : > { %1398 = vmax.xlane.f32.xlu1 %v1397_v24  ;;  %v1042_v31 = vsel %vm887_vm15, %v3945_v28, 0.0 }
 0x596   : > { %1392 = vmax.xlane.f32.xlu0 %v1391_v25  ;;  %3343 = vpow2.f32 %v1037_v26  ;;  %v833_v26 = vld [vmem:[%s4560_s9 + $0x8] sm:$0xff] }
 0x597   : > { %1123 = vmatpush.msrb.mxu1 %v833_v26 }
 0x599   : > { %v1224_v34 = vpop.xlane.xlu1 %1223 }
 0x59a   : > { %v1231_v35 = vsub.f32 %v1219_v60, %v1224_v34 }
 0x59c   : > { %v3949_v32 = vpop.eup %3343  ;;  %v1234_v36 = vmul.f32 1.442695, %v1231_v35 }
 0x59d   : > { %v1045_v33 = vsel %vm894_vm2, %v3949_v32, 0.0 }
 0x59e   : > { %1043 = vadd.xlane.f32.xlu0 %v1042_v31  ;;  %3345 = vpow2.f32 %v1234_v36 }
 0x5a1   : > { %v1227_v44 = vpop.xlane.xlu0 %1226 }
 0x5a4   : > { %v3961_v37 = vpop.eup %3345 }
 0x5a5   : > { %3270 = vrot.lane.b32.xlu2 %v3849_v55, %s4588_s4  ;;  %v1240_v38 = vsel %vm887_vm15, %v3961_v37, 0.0 }
 0x5a6   : > { %1046 = vadd.xlane.f32.xlu0 %v1045_v33 }
 0x5a9   : > { %v1230_v43 = vpop.xlane.xlu2 %1229 }
 0x5aa   : > { %v1233_v56 = vsub.f32 %v3928_v2, %v1230_v43 }
 0x5ac   : > { %v1238_v60 = vmul.f32 1.442695, %v1233_v56 }
 0x5ad   : > { %1428 = vrot.lane.b32.xlu2 %v3829_v42, %s4586_s5 }
 0x5ae   : > { %1058 = vrot.lane.b32.xlu1 %v3829_v42, %s4588_s4  ;;  %s4626_s4 = smov %s4625_s0 }
 0x5ba   : > { %3275 = vrot.lane.b32.xlu0 %v3849_v55, %s4586_s5 }
 0x5d8   : > { %1241 = vadd.xlane.f32.xlu1 %v1240_v38 }
 0x600   : > { %v1396_v45 = vpop.xlane.xlu2 %1395 }
 0x601   : > { %v1401_v46 = vsub.f32 %v1389_v13, %v1396_v45  ;;  %v1041_v47 = vpop.xlane.xlu0 %1040 }
 0x603   : > { %v1405_v48 = vmul.f32 1.442695, %v1401_v46 }
 0x605   : > { %3347 = vpow2.f32 %v1405_v48 }
 0x608   : > { %v1399_v49 = vpop.xlane.xlu1 %1398  ;;  %v3271_v50 = vpop.permute.xlu2 %3270 }
 0x609   : > { %v1402_v51 = vsub.f32 %v1390_v22, %v1399_v49  ;;  %v1393_v52 = vpop.xlane.xlu0 %1392  ;;  %v3272_v11 = vunpack.i.l.bf16 %v3271_v50  ;;  %v3273_v12 = vunpack.i.h.bf16 %v3271_v50  ;;  %v1232_v22 = vsub.f32 %v3924_v63, %v1227_v44 }
 0x60a   : > { %v1400_v53 = vsub.f32 %v1388_v19, %v1393_v52 }
 0x60b   : > { %v3965_v54 = vpop.eup %3347  ;;  %v1407_v57 = vmul.f32 1.442695, %v1402_v51  ;;  %v1236_v23 = vmul.f32 1.442695, %v1232_v22 }
 0x60c   : > { %v1403_v58 = vmul.f32 1.442695, %v1400_v53  ;;  %v1412_v59 = vsel %vm887_vm15, %v3965_v54, 0.0 }
 0x60d   : > { %3349 = vpow2.f32 %v1407_v57  ;;  %1413 = vadd.xlane.f32.xlu2 %v1412_v59  ;;  %v834_v59 = vld [vmem:[%s4560_s9 + $0x10] sm:$0xff] }
 0x60e   : > { %3351 = vpow2.f32 %v1403_v58  ;;  %v835_v58 = vld [vmem:[%s4560_s9 + $0x18] sm:$0xff]  ;;  %1324 = vmatpush.msra.mxu1 %v834_v59 }
 0x60f   : > { %3353 = vpow2.f32 %v1238_v60 }
 0x610   : > { %v1429_v61 = vpop.permute.xlu2 %1428  ;;  %3355 = vrcp.f32 %v1041_v47 }
 0x611   : > { %3105 = vmatpush.msk.msrb.mxu3 %vm939_vm4, %v1429_v61  ;;  %v1044_v7 = vpop.xlane.xlu0 %1043 }
 0x612   : > { %3357 = vrcp.f32 %v1044_v7 }
 0x613   : > { %v3971_v62 = vpop.eup %3349 }
 0x614   : > { %v3352_v0 = vpop.eup %3351  ;;  %v1415_v1 = vsel %vm894_vm2, %v3971_v62, 0.0 }
 0x615   : > { %1416 = vadd.xlane.f32.xlu1 %v1415_v1  ;;  %v1409_v2 = vsel %vm887_vm15, %v3352_v0, 0.0  ;;  %v3976_v3 = vpop.eup %3353 }
 0x616   : > { %1410 = vadd.xlane.f32.xlu0 %v1409_v2  ;;  %v1246_v8 = vsel %vm894_vm2, %v3976_v3, 0.0  ;;  %v3356_v10 = vpop.eup %3355 }
 0x617   : > { %v1051_v15 = vmul.f32 %v3356_v10, %v3938_v14 }
 0x618   : > { %v3358_v16 = vpop.eup %3357 }
 0x619   : > { %v1047_v13 = vpop.xlane.xlu0 %1046  ;;  %v1052_v18 = vmul.f32 %v3358_v16, %v3945_v28 }
 0x61a   : > { %3359 = vrcp.f32 %v1047_v13 }
 0x61b   : > { %3361 = vpow2.f32 %v1236_v23 }
 0x61d   : > { %1247 = vadd.xlane.f32.xlu1 %v1246_v8 }
 0x620   : > { %v1059_v9 = vpop.permute.xlu1 %1058  ;;  %v3360_v21 = vpop.eup %3359 }
 0x621   : > { %3076 = vmatpush.msk.msrb.mxu0 %vm939_vm4, %v1059_v9  ;;  %v1053_v14 = vmul.f32 %v3360_v21, %v3949_v32  ;;  %v3362_v24 = vpop.eup %3361 }
 0x622   : > { %v1243_v25 = vsel %vm887_vm15, %v3362_v24, 0.0 }
 0x623   : > { %1087 = vmatpush.msrb.mxu0 %v3272_v11 }
 0x625   : > { %1088 = vmatpush.msrb.mxu0 %v3273_v12 }
 0x626   : > { %3077 = vmatmul.msk.f32.vlgmr.msrb.gmra.mxu0 %vm887_vm15, %v1051_v15  ;;  %v3307_v15 = vld [vmem:[%s4561_s10] ss:$0 sm:$0xff] }
 0x62a   : > { %1259 = vrot.lane.b32.xlu0 %v3829_v42, %s4584_s22 }
 0x62c   : > { %v3276_v17 = vpop.permute.xlu0 %3275 }
 0x62d   : > { %v3277_v19 = vunpack.i.l.bf16 %v3276_v17  ;;  %v3278_v20 = vunpack.i.h.bf16 %v3276_v17 }
 0x62e   : > { %3078 = vmatmul.msk.f32.gmra.mxu0 %vm887_vm15, %v1052_v18 }
 0x62f   : > { %1457 = vmatpush.msrb.mxu3 %v3277_v19 }
 0x631   : > { %1458 = vmatpush.msrb.mxu3 %v3278_v20 }
 0x632   : > { %3280 = vrot.lane.b32.xlu0 %v3849_v55, %s4584_s22  ;;  %s4633_s22 = smov 40  }
 0x636   : > { %3079 = vmatmul.msk.f32.gmra.mxu0 %vm887_vm15, %v1053_v14 }
 0x64b   : > { %v1242_v55 = vpop.xlane.xlu1 %1241 }
 0x65c   : > { %1244 = vadd.xlane.f32.xlu0 %v1243_v25 }
 0x680   : > { %v1414_v31 = vpop.xlane.xlu2 %1413 }
 0x688   : > { %v1417_v63 = vpop.xlane.xlu1 %1416 }
 0x689   : > { %v1411_v28 = vpop.xlane.xlu0 %1410 }
 0x68a   : > { %3363 = vrcp.f32 %v1411_v28 }
 0x68b   : > { %3365 = vrcp.f32 %v1414_v31 }
 0x68c   : > { %3367 = vrcp.f32 %v1417_v63 }
 0x68d   : > { %3369 = vrcp.f32 %v1242_v55 }
 0x690   : > { %v3364_v32 = vpop.eup %3363  ;;  %v1248_v53 = vpop.xlane.xlu1 %1247 }
 0x691   : > { %v1421_v33 = vmul.f32 %v3364_v32, %v3352_v0  ;;  %v3366_v34 = vpop.eup %3365 }
 0x692   : > { %v1422_v35 = vmul.f32 %v3366_v34, %v3965_v54  ;;  %v3368_v38 = vpop.eup %3367 }
 0x693   : > { %3106 = vmatmul.msk.f32.vlgmr.msrb.gmra.mxu3 %vm887_vm15, %v1421_v33  ;;  %v1423_v43 = vmul.f32 %v3368_v38, %v3971_v62  ;;  %v3370_v46 = vpop.eup %3369 }
 0x694   : > { %v1252_v49 = vmul.f32 %v3370_v46, %v3961_v37 }
 0x69b   : > { %3107 = vmatmul.msk.f32.gmra.mxu3 %vm887_vm15, %v1422_v35 }
 0x69c   : > { %v1260_v36 = vpop.permute.xlu0 %1259 }
 0x69d   : > { %3092 = vmatpush.msk.msra.mxu0 %vm939_vm4, %v1260_v36 }
 0x6a3   : > { %v1090_v44 = vpop.f32.mrf.mxu0  ;;  %3108 = vmatmul.msk.f32.gmra.mxu3 %vm887_vm15, %v1423_v43 }
 0x6a4   : > { %v3281_v45 = vpop.permute.xlu0 %3280  ;;  %3080 = vmatmul.msk.f32.vlgmr.msrb.gmra.mxu1 %vm845_vm14, %v1090_v44 }
 0x6a5   : > { %v3282_v47 = vunpack.i.l.bf16 %v3281_v45  ;;  %v3283_v48 = vunpack.i.h.bf16 %v3281_v45 }
 0x6a7   : > { %1288 = vmatpush.msra.mxu0 %v3282_v47 }
 0x6a9   : > { %1289 = vmatpush.msra.mxu0 %v3283_v48 }
 0x6aa   : > { %3093 = vmatmul.msk.f32.vlgmr.msra.gmra.mxu0 %vm887_vm15, %v1252_v49  ;;  %v1600_v49 = vld [vmem:[%s4564_s13 + $0x18] sm:$0xff] }
 0x6ab   : > { %v1093_v50 = vpop.f32.mrf.mxu0  ;;  %1493 = vmatpush.msrb.mxu0 %v835_v58  ;;  %1626 = vmatpush.msrb.mxu1 %v1600_v49  ;;  %v1763_v49 = vld [vmem:[%s4626_s4 + $0x18] sm:$0xff] }
 0x6ac   : > { %3081 = vmatmul.msk.f32.gmra.mxu1 %vm845_vm14, %v1093_v50  ;;  %v1599_v50 = vld [vmem:[%s4564_s13 + $0x10] sm:$0xff] }
 0x6ad   : > { %1627 = vmatpush.msrb.mxu1 %v1599_v50 }
 0x6b3   : > { %v1096_v51 = vpop.f32.mrf.mxu0 }
 0x6b4   : > { %3082 = vmatmul.msk.f32.gmra.mxu1 %vm845_vm14, %v1096_v51  ;;  %v1598_v51 = vld [vmem:[%s4564_s13 + $0x8] sm:$0xff] }
 0x6b5   : > { %1628 = vmatpush.msrb.mxu1 %v1598_v51  ;;  %v1762_v51 = vld [vmem:[%s4626_s4 + $0x10] sm:$0xff] }
 0x6cf   : > { %v1245_v52 = vpop.xlane.xlu0 %1244 }
 0x6d0   : > { %3371 = vrcp.f32 %v1245_v52  ;;  %v1597_v52 = vld [vmem:[%s4564_s13] sm:$0xff] }
 0x6d1   : > { %3373 = vrcp.f32 %v1248_v53  ;;  %1629 = vmatpush.msrb.mxu1 %v1597_v52 }
 0x6d6   : > { %v3372_v54 = vpop.eup %3371 }
 0x6d7   : > { %v1253_v56 = vmul.f32 %v3372_v54, %v3362_v24  ;;  %v3374_v57 = vpop.eup %3373 }
 0x6d8   : > { %v1254_v37 = vmul.f32 %v3374_v57, %v3976_v3 }
 0x6d9   : > { %3094 = vmatmul.msk.f32.gmra.mxu0 %vm887_vm15, %v1253_v56 }
 0x6e1   : > { %3095 = vmatmul.msk.f32.gmra.mxu0 %vm887_vm15, %v1254_v37 }
 0x716   : > { %v1460_v60 = vpop.f32.mrf.mxu3 }
 0x717   : > { %3109 = vmatmul.msk.f32.vlgmr.msrb.gmra.mxu0 %vm845_vm14, %v1460_v60 }
 0x71e   : > { %v1463_v61 = vpop.f32.mrf.mxu3 }
 0x71f   : > { %3110 = vmatmul.msk.f32.gmra.mxu0 %vm845_vm14, %v1463_v61 }
 0x721   : > { %v1125_v3 = vpop.f32.mrf.mxu1 }
 0x722   : > { %v1161_v9 = vadd.f32 %v3932_v4, %v1125_v3 }
 0x726   : > { %v1466_v62 = vpop.f32.mrf.mxu3 }
 0x727   : > { %v1291_v0 = vpop.f32.mrf.mxu0  ;;  %3111 = vmatmul.msk.f32.gmra.mxu0 %vm845_vm14, %v1466_v62  ;;  %v3308_v62 = vld [vmem:[%s4562_s11] ss:$0 sm:$0xff] }
 0x728   : > { %3096 = vmatmul.msk.f32.vlgmr.msra.gmra.mxu1 %vm845_vm14, %v1291_v0 }
 0x729   : > { %v1128_v7 = vpop.f32.mrf.mxu1 }
 0x72a   : > { %v1164_v19 = vadd.f32 %v3934_v5, %v1128_v7 }
 0x731   : > { %v1131_v8 = vpop.f32.mrf.mxu1 }
 0x732   : > { %v1167_v23 = vadd.f32 %v3936_v6, %v1131_v8 }
 0x756   : > { %v1294_v1 = vpop.f32.mrf.mxu0 }
 0x757   : > { %3097 = vmatmul.msk.f32.gmra.mxu1 %vm845_vm14, %v1294_v1 }
 0x75e   : > { %v1297_v2 = vpop.f32.mrf.mxu0 }
 0x75f   : > { %3098 = vmatmul.msk.f32.gmra.mxu1 %vm845_vm14, %v1297_v2  ;;  %v3309_v2 = vld [vmem:[%s4563_s12] ss:$0 sm:$0xff] }
 0x794   : > { %v1495_v12 = vpop.f32.mrf.mxu0 }
 0x79c   : > { %v1498_v20 = vpop.f32.mrf.mxu0 }
 0x7a4   : > { %v1501_v28 = vpop.f32.mrf.mxu0 }
 0x7a5   : > { %v1326_v10 = vpop.f32.mrf.mxu1 }
 0x7a6   : > { %v1335_v11 = vadd.f32 %v1326_v10, %v1161_v9 }
 0x7a8   : > { %v1504_v13 = vadd.f32 %v1495_v12, %v1335_v11 }
 0x7aa   : > { %v1507_v16 = vadd.f32 %v1504_v13, %v3768_v27 }
 0x7ac   : > { %v4027_v17 = vadd.f32 %v3307_v15, %v1507_v16 }
 0x7ae   : > { %v1519_v18 = vsel %vm700_vm3, %v4027_v17, 0.0 }
 0x7af   : > { %1520 = vadd.xlane.f32.xlu2 %v1519_v18 }
 0x7d4   : > { %v1329_v4 = vpop.f32.mrf.mxu1 }
 0x7d5   : > { %v1336_v21 = vadd.f32 %v1329_v4, %v1164_v19 }
 0x7d7   : > { %v1505_v14 = vadd.f32 %v1498_v20, %v1336_v21 }
 0x7d9   : > { %v1508_v22 = vadd.f32 %v1505_v14, %v3775_v30 }
 0x7db   : > { %v4034_v24 = vadd.f32 %v3307_v15, %v1508_v22 }
 0x7dc   : > { %v1332_v25 = vpop.f32.mrf.mxu1 }
 0x7dd   : > { %v1337_v27 = vadd.f32 %v1332_v25, %v1167_v23  ;;  %v1522_v26 = vsel %vm700_vm3, %v4034_v24, 0.0 }
 0x7de   : > { %1523 = vadd.xlane.f32.xlu1 %v1522_v26 }
 0x7df   : > { %v1506_v55 = vadd.f32 %v1501_v28, %v1337_v27 }
 0x7e1   : > { %v1509_v5 = vadd.f32 %v1506_v55, %v3773_v29 }
 0x7e3   : > { %v4039_v31 = vadd.f32 %v3307_v15, %v1509_v5 }
 0x7e5   : > { %v1525_v32 = vsel %vm685_vm1, %v4039_v31, 0.0 }
 0x7e6   : > { %1526 = vadd.xlane.f32.xlu2 %v1525_v32 }
 0x822   : > { %v1521_v30 = vpop.xlane.xlu2 %1520 }
 0x823   : > { %v1528_v6 = vmul.f32 %v1521_v30, %v3781_v39 }
 0x825   : > { %v1531_v33 = vsub.f32 %v4027_v17, %v1528_v6 }
 0x827   : > { %v1534_v63 = vmul.f32 %v1531_v33, %v1531_v33 }
 0x829   : > { %v1537_v34 = vsel %vm700_vm3, %v1534_v63, 0.0  ;;  %v4084_v63 = vld [vmem:[%s4565_s14] ss:$0 sm:$0xff] }
 0x82a   : > { %1538 = vadd.xlane.f32.xlu1 %v1537_v34 }
 0x851   : > { %v1524_v35 = vpop.xlane.xlu1 %1523 }
 0x852   : > { %v1529_v36 = vmul.f32 %v1524_v35, %v3781_v39 }
 0x854   : > { %v1532_v29 = vsub.f32 %v4034_v24, %v1529_v36 }
 0x856   : > { %v1535_v38 = vmul.f32 %v1532_v29, %v1532_v29 }
 0x858   : > { %v1540_v43 = vsel %vm700_vm3, %v1535_v38, 0.0 }
 0x859   : > { %1541 = vadd.xlane.f32.xlu2 %v1540_v43  ;;  %v1527_v44 = vpop.xlane.xlu2 %1526 }
 0x85a   : > { %v1530_v45 = vmul.f32 %v1527_v44, %v3781_v39  ;;  %v1767_v44 = vld [vmem:[%s4625_s0 + $0x38] sm:$0xff]  ;;  %s4634_s0 = smov 48  }
 0x85b   : > { %1785 = vmatpush.msrb.mxu2 %v1767_v44 }
 0x85c   : > { %v4051_v46 = vsub.f32 %v4039_v31, %v1530_v45  ;;  %v1766_v45 = vld [vmem:[%s4626_s4 + $0x30] sm:$0xff] }
 0x85d   : > { %1786 = vmatpush.msrb.mxu2 %v1766_v45 }
 0x85e   : > { %v1536_v47 = vmul.f32 %v4051_v46, %v4051_v46 }
 0x860   : > { %v1543_v48 = vsel %vm685_vm1, %v1536_v47, 0.0  ;;  %v1764_v47 = vld [vmem:[%s4626_s4 + $0x20] sm:$0xff] }
 0x861   : > { %1544 = vadd.xlane.f32.xlu1 %v1543_v48 }
 0x89d   : > { %v1539_v53 = vpop.xlane.xlu1 %1538 }
 0x89e   : > { %v1546_v54 = vmul.f32 %v1539_v53, %v3781_v39 }
 0x8a0   : > { %v1549_v56 = vadd.f32 1e-05, %v1546_v54  ;;  %v1761_v54 = vld [vmem:[%s4626_s4 + $0x8] sm:$0xff] }
 0x8a2   : > { %3375 = vrsqrt.f32 %v1549_v56  ;;  %vm1558_vm6 = vweird.f32 %v1549_v56 }
 0x8a8   : > { %v3376_v57 = vpop.eup %3375 }
 0x8a9   : > { %v1553_v37 = vmul.f32 %v3376_v57, %v1549_v56  ;;  %vm1559_vm5 = vweird.f32 %v3376_v57 }
 0x8aa   : > { %vm1560_vm7 = vmor %vm1558_vm6, %vm1559_vm5 }
 0x8ab   : > { %v1554_v58 = vmul.f32 %v3376_v57, %v1553_v37 }
 0x8ad   : > { %v1555_v59 = vmul.f32 0.5, %v1554_v58  ;;  %v1760_v58 = vld [vmem:[%s4626_s4] sm:$0xff] }
 0x8af   : > { %v1556_v60 = vsub.f32 1.5, %v1555_v59 }
 0x8b1   : > { %v1557_v61 = vmul.f32 %v3376_v57, %v1556_v60 }
 0x8b3   : > { %v1561_v0 = vsel %vm1560_vm7, %v3376_v57, %v1557_v61 }
 0x8b4   : > { %v1582_v1 = vmul.f32 %v1561_v0, %v1531_v33 }
 0x8b6   : > { %v1588_v3 = vmul.f32 %v3308_v62, %v1582_v1 }
 0x8b8   : > { %v1594_v7 = vadd.f32 %v3309_v2, %v1588_v3 }
 0x8ba   : > { %3112 = vmatmul.msk.f32.vlgmr.msrb.gmra.mxu1 %vm700_vm3, %v1594_v7 }
 0x8cc   : > { %v1542_v8 = vpop.xlane.xlu2 %1541 }
 0x8cd   : > { %v1547_v9 = vmul.f32 %v1542_v8, %v3781_v39 }
 0x8cf   : > { %v1550_v10 = vadd.f32 1e-05, %v1547_v9 }
 0x8d1   : > { %3377 = vrsqrt.f32 %v1550_v10  ;;  %vm1568_vm9 = vweird.f32 %v1550_v10 }
 0x8d4   : > { %v1545_v11 = vpop.xlane.xlu1 %1544 }
 0x8d5   : > { %v1548_v12 = vmul.f32 %v1545_v11, %v3781_v39 }
 0x8d7   : > { %v3378_v13 = vpop.eup %3377  ;;  %v1551_v15 = vadd.f32 1e-05, %v1548_v12 }
 0x8d8   : > { %v1563_v16 = vmul.f32 %v3378_v13, %v1550_v10  ;;  %vm1569_vm8 = vweird.f32 %v3378_v13 }
 0x8d9   : > { %3379 = vrsqrt.f32 %v1551_v15  ;;  %vm1570_vm10 = vmor %vm1568_vm9, %vm1569_vm8  ;;  %vm1578_vm12 = vweird.f32 %v1551_v15 }
 0x8da   : > { %v1564_v18 = vmul.f32 %v3378_v13, %v1563_v16 }
 0x8dc   : > { %v1565_v19 = vmul.f32 0.5, %v1564_v18 }
 0x8de   : > { %v1566_v20 = vsub.f32 1.5, %v1565_v19 }
 0x8df   : > { %v3380_v4 = vpop.eup %3379 }
 0x8e0   : > { %v1567_v21 = vmul.f32 %v3378_v13, %v1566_v20  ;;  %v1573_v14 = vmul.f32 %v3380_v4, %v1551_v15  ;;  %vm1579_vm11 = vweird.f32 %v3380_v4 }
 0x8e1   : > { %vm1580_vm13 = vmor %vm1578_vm12, %vm1579_vm11 }
 0x8e2   : > { %v1571_v22 = vsel %vm1570_vm10, %v3378_v13, %v1567_v21  ;;  %v1574_v23 = vmul.f32 %v3380_v4, %v1573_v14 }
 0x8e3   : > { %v1583_v25 = vmul.f32 %v1571_v22, %v1532_v29 }
 0x8e4   : > { %v1575_v27 = vmul.f32 0.5, %v1574_v23 }
 0x8e5   : > { %v1589_v26 = vmul.f32 %v3308_v62, %v1583_v25 }
 0x8e6   : > { %v1576_v28 = vsub.f32 1.5, %v1575_v27 }
 0x8e7   : > { %v1595_v55 = vadd.f32 %v3309_v2, %v1589_v26 }
 0x8e8   : > { %v1577_v5 = vmul.f32 %v3380_v4, %v1576_v28 }
 0x8e9   : > { %3113 = vmatmul.msk.f32.gmra.mxu1 %vm700_vm3, %v1595_v55 }
 0x8ea   : > { %v1581_v32 = vsel %vm1580_vm13, %v3380_v4, %v1577_v5  ;;  %v3558_v4 = vmov -1.0  }
 0x8eb   : > { %v1584_v30 = vmul.f32 %v1581_v32, %v4051_v46  ;;  %v1765_v46 = vld [vmem:[%s4626_s4 + $0x28] sm:$0xff] }
 0x8ec   : > { %1787 = vmatpush.msrb.mxu2 %v1765_v46 }
 0x8ed   : > { %v1590_v6 = vmul.f32 %v3308_v62, %v1584_v30 }
 0x8ee   : > { %1788 = vmatpush.msrb.mxu2 %v1764_v47 }
 0x8ef   : > { %v1596_v33 = vadd.f32 %v3309_v2, %v1590_v6 }
 0x8f0   : > { %1789 = vmatpush.msrb.mxu2 %v1763_v49 }
 0x8f1   : > { %3114 = vmatmul.msk.f32.gmra.mxu1 %vm700_vm3, %v1596_v33 }
 0x8f2   : > { %1790 = vmatpush.msrb.mxu2 %v1762_v51 }
 0x8f4   : > { %1791 = vmatpush.msrb.mxu2 %v1761_v54 }
 0x8f6   : > { %1792 = vmatpush.msrb.mxu2 %v1760_v58 }
 0x937   : > { %v1631_v34 = vpop.f32.mrf.mxu1 }
 0x938   : > { %v1632_v35 = vadd.f32 %v4084_v63, %v1631_v34 }
 0x93a   : > { %v1643_v36 = vmul.f32 0.70710677, %v1632_v35  ;;  %v1640_v23 = vmul.f32 0.5, %v1632_v35 }
 0x93c   : > { %v1652_v29 = vand.u32 2147483647, %v1643_v36  ;;  %vm1646_vm9 = vcmp.ge.f32.partialorder %v1643_v36, 0.0 }
 0x93d   : > { %v1649_v21 = vsel %vm1646_vm9, 1.0, %v3558_v4 }
 0x93e   : > { %v1655_v38 = vmul.f32 0.3275911, %v1652_v29  ;;  %v1733_v62 = vsub.f32 0.0, %v1652_v29 }
 0x940   : > { %v1658_v43 = vadd.f32 1.0, %v1655_v38  ;;  %v1736_v2 = vmul.f32 %v1733_v62, %v1652_v29 }
 0x942   : > { %3381 = vrcp.f32 %v1658_v43  ;;  %v1672_v53 = vand.u32 2147483648, %v1658_v43  ;;  %v1670_v57 = vand.u32 2147483647, %v1658_v43  ;;  %vm1666_vm6 = vweird.f32 %v1658_v43 }
 0x943   : > { %v1739_v8 = vmul.f32 1.442695, %v1736_v2 }
 0x944   : > { %v1673_v59 = vor.u32 1.1754944e-38, %v1672_v53  ;;  %vm1671_vm8 = vcmp.eq.f32.partialorder %v1670_v57, 8.507059e+37 }
 0x945   : > { %3383 = vpow2.f32 %v1739_v8 }
 0x948   : > { %v3382_v48 = vpop.eup %3381 }
 0x949   : > { %v1662_v50 = vmul.f32 %v3382_v48, %v1658_v43  ;;  %vm1667_vm5 = vweird.f32 %v3382_v48 }
 0x94a   : > { %vm1668_vm7 = vmor %vm1666_vm6, %vm1667_vm5 }
 0x94b   : > { %v1663_v52 = vsub.f32 1.0, %v1662_v50  ;;  %v3384_v15 = vpop.eup %3383 }
 0x94d   : > { %v1664_v56 = vmul.f32 %v3382_v48, %v1663_v52 }
 0x94f   : > { %v1665_v37 = vadd.f32 %v3382_v48, %v1664_v56 }
 0x951   : > { %v1669_v60 = vsel %vm1668_vm7, %v3382_v48, %v1665_v37 }
 0x952   : > { %v1674_v61 = vsel %vm1671_vm8, %v1673_v59, %v1669_v60 }
 0x953   : > { %v1706_v0 = vmul.f32 1.0614054, %v1674_v61 }
 0x955   : > { %v1709_v1 = vadd.f32 -1.4531521, %v1706_v0 }
 0x957   : > { %v1712_v3 = vmul.f32 %v1709_v1, %v1674_v61 }
 0x959   : > { %v1715_v7 = vadd.f32 1.4214138, %v1712_v3 }
 0x95b   : > { %v1718_v9 = vmul.f32 %v1715_v7, %v1674_v61 }
 0x95d   : > { %v1721_v10 = vadd.f32 -0.28449672, %v1718_v9 }
 0x95f   : > { %v1724_v11 = vmul.f32 %v1721_v10, %v1674_v61 }
 0x961   : > { %v1727_v12 = vadd.f32 0.2548296, %v1724_v11 }
 0x963   : > { %v1730_v13 = vmul.f32 %v1727_v12, %v1674_v61 }
 0x965   : > { %v1745_v16 = vmul.f32 %v3384_v15, %v1730_v13 }
 0x966   : > { %v1634_v18 = vpop.f32.mrf.mxu1 }
 0x967   : > { %v1748_v19 = vsub.f32 1.0, %v1745_v16  ;;  %v4112_v20 = vadd.f32 %v4084_v63, %v1634_v18 }
 0x969   : > { %v1751_v14 = vmul.f32 %v1748_v19, %v1649_v21  ;;  %v4116_v22 = vmul.f32 0.70710677, %v4112_v20 }
 0x96b   : > { %v1754_v25 = vadd.f32 1.0, %v1751_v14  ;;  %v1653_v27 = vand.u32 2147483647, %v4116_v22  ;;  %vm1647_vm9 = vcmp.ge.f32.partialorder %v4116_v22, 0.0 }
 0x96d   : > { %v1757_v26 = vmul.f32 %v1754_v25, %v1640_v23  ;;  %v1656_v28 = vmul.f32 0.3275911, %v1653_v27  ;;  %v1734_v48 = vsub.f32 0.0, %v1653_v27 }
 0x96e   : > { %v1637_v55 = vpop.f32.mrf.mxu1 }
 0x96f   : > { %v1659_v5 = vadd.f32 1.0, %v1656_v28  ;;  %v4120_v32 = vadd.f32 %v4084_v63, %v1637_v55  ;;  %3115 = vmatmul.msk.f32.vlgmr.msrb.gmra.mxu2 %vm650_vm0, %v1757_v26  ;;  %v1737_v56 = vmul.f32 %v1734_v48, %v1653_v27  ;;  %v1650_v27 = vsel %vm1647_vm9, 1.0, %v3558_v4 }
 0x971   : > { %3385 = vrcp.f32 %v1659_v5  ;;  %v4124_v30 = vmul.f32 0.70710677, %v4120_v32  ;;  %v1687_v38 = vand.u32 2147483648, %v1659_v5  ;;  %v1685_v44 = vand.u32 2147483647, %v1659_v5 }
 0x972   : > { %vm1681_vm11 = vweird.f32 %v1659_v5  ;;  %v1741_v62 = vmul.f32 1.442695, %v1737_v56 }
 0x973   : > { %v1654_v6 = vand.u32 2147483647, %v4124_v30  ;;  %v1688_v45 = vor.u32 1.1754944e-38, %v1687_v38  ;;  %vm1686_vm13 = vcmp.eq.f32.partialorder %v1685_v44, 8.507059e+37 }
 0x975   : > { %v1657_v33 = vmul.f32 0.3275911, %v1654_v6  ;;  %v1735_v1 = vsub.f32 0.0, %v1654_v6 }
 0x977   : > { %v3386_v34 = vpop.eup %3385  ;;  %v1660_v36 = vadd.f32 1.0, %v1657_v33  ;;  %v1738_v10 = vmul.f32 %v1735_v1, %v1654_v6 }
 0x978   : > { %v1677_v35 = vmul.f32 %v3386_v34, %v1659_v5  ;;  %vm1682_vm10 = vweird.f32 %v3386_v34  ;;  %v1641_v5 = vmul.f32 0.5, %v4112_v20  ;;  %v3311_v20 = vld [vmem:[%s4567_s16] ss:$0 sm:$0xff] }
 0x979   : > { %3387 = vrcp.f32 %v1660_v36  ;;  %vm1683_vm12 = vmor %vm1681_vm11, %vm1682_vm10  ;;  %v1702_v53 = vand.u32 2147483648, %v1660_v36  ;;  %v1700_v37 = vand.u32 2147483647, %v1660_v36  ;;  %vm1696_vm6 = vweird.f32 %v1660_v36 }
 0x97a   : > { %v1678_v29 = vsub.f32 1.0, %v1677_v35  ;;  %3389 = vpow2.f32 %v1741_v62  ;;  %v1743_v16 = vmul.f32 1.442695, %v1738_v10  ;;  %vm1648_vm10 = vcmp.ge.f32.partialorder %v4124_v30, 0.0  ;;  %v3120_v10 = vld [vmem:[%s4559_s8 + $0x20] sm:$0xff] }
 0x97b   : > { %v1703_v61 = vor.u32 1.1754944e-38, %v1702_v53  ;;  %vm1701_vm8 = vcmp.eq.f32.partialorder %v1700_v37, 8.507059e+37 }
 0x97c   : > { %v1679_v43 = vmul.f32 %v3386_v34, %v1678_v29  ;;  %3391 = vpow2.f32 %v1743_v16  ;;  %v1651_v29 = vsel %vm1648_vm10, 1.0, %v3558_v4 }
 0x97e   : > { %v1680_v63 = vadd.f32 %v3386_v34, %v1679_v43  ;;  %v1642_v43 = vmul.f32 0.5, %v4120_v32 }
 0x97f   : > { %v3388_v46 = vpop.eup %3387 }
 0x980   : > { %v1684_v47 = vsel %vm1683_vm12, %v3386_v34, %v1680_v63  ;;  %v1692_v49 = vmul.f32 %v3388_v46, %v1660_v36  ;;  %vm1697_vm5 = vweird.f32 %v3388_v46  ;;  %v3390_v19 = vpop.eup %3389 }
 0x981   : > { %v1689_v50 = vsel %vm1686_vm13, %v1688_v45, %v1684_v47  ;;  %vm1698_vm7 = vmor %vm1696_vm6, %vm1697_vm5 }
 0x982   : > { %v1707_v51 = vmul.f32 1.0614054, %v1689_v50  ;;  %v1693_v52 = vsub.f32 1.0, %v1692_v49  ;;  %v3392_v34 = vpop.eup %3391 }
 0x984   : > { %v1710_v54 = vadd.f32 -1.4531521, %v1707_v51  ;;  %v1694_v57 = vmul.f32 %v3388_v46, %v1693_v52 }
 0x986   : > { %v1713_v58 = vmul.f32 %v1710_v54, %v1689_v50  ;;  %v1695_v59 = vadd.f32 %v3388_v46, %v1694_v57 }
 0x988   : > { %v1716_v60 = vadd.f32 1.4214138, %v1713_v58  ;;  %v1699_v0 = vsel %vm1698_vm7, %v3388_v46, %v1695_v59 }
 0x989   : > { %v1704_v3 = vsel %vm1701_vm8, %v1703_v61, %v1699_v0 }
 0x98a   : > { %v1719_v2 = vmul.f32 %v1716_v60, %v1689_v50  ;;  %v1708_v7 = vmul.f32 1.0614054, %v1704_v3 }
 0x98c   : > { %v1722_v8 = vadd.f32 -0.28449672, %v1719_v2  ;;  %v1711_v9 = vadd.f32 -1.4531521, %v1708_v7  ;;  %v3123_v7 = vld [vmem:[%s4559_s8 + $0x38] sm:$0xff] }
 0x98d   : > { %1921 = vmatpush.msra.mxu3 %v3123_v7 }
 0x98e   : > { %v1725_v11 = vmul.f32 %v1722_v8, %v1689_v50  ;;  %v1714_v12 = vmul.f32 %v1711_v9, %v1704_v3  ;;  %v3122_v8 = vld [vmem:[%s4559_s8 + $0x30] sm:$0xff]  ;;  %v3121_v9 = vld [vmem:[%s4559_s8 + $0x28] sm:$0xff] }
 0x98f   : > { %1922 = vmatpush.msra.mxu3 %v3122_v8 }
 0x990   : > { %v1728_v13 = vadd.f32 0.2548296, %v1725_v11  ;;  %v1717_v15 = vadd.f32 1.4214138, %v1714_v12 }
 0x991   : > { %1923 = vmatpush.msra.mxu3 %v3121_v9 }
 0x992   : > { %v1731_v18 = vmul.f32 %v1728_v13, %v1689_v50  ;;  %v1720_v21 = vmul.f32 %v1717_v15, %v1704_v3 }
 0x993   : > { %1924 = vmatpush.msra.mxu3 %v3120_v10 }
 0x994   : > { %v1746_v14 = vmul.f32 %v3390_v19, %v1731_v18  ;;  %v1723_v23 = vadd.f32 -0.28449672, %v1720_v21 }
 0x996   : > { %v1749_v25 = vsub.f32 1.0, %v1746_v14  ;;  %v1726_v26 = vmul.f32 %v1723_v23, %v1704_v3  ;;  %v3312_v23 = vld [vmem:[%s4557_s6 + $0x1] ss:$0 sm:$0xff] }
 0x998   : > { %v1752_v28 = vmul.f32 %v1749_v25, %v1650_v27  ;;  %v1729_v55 = vadd.f32 0.2548296, %v1726_v26  ;;  %v3313_v26 = vld [vmem:[%s4558_s7 + $0x1] ss:$0 sm:$0xff] }
 0x99a   : > { %v1755_v6 = vadd.f32 1.0, %v1752_v28  ;;  %v1732_v33 = vmul.f32 %v1729_v55, %v1704_v3 }
 0x99c   : > { %v1758_v35 = vmul.f32 %v1755_v6, %v1641_v5  ;;  %v1747_v36 = vmul.f32 %v3392_v34, %v1732_v33 }
 0x99e   : > { %3116 = vmatmul.msk.f32.gmra.mxu2 %vm650_vm0, %v1758_v35  ;;  %v1750_v22 = vsub.f32 1.0, %v1747_v36 }
 0x9a0   : > { %v1753_v38 = vmul.f32 %v1750_v22, %v1651_v29 }
 0x9a2   : > { %v1756_v44 = vadd.f32 1.0, %v1753_v38 }
 0x9a4   : > { %v1759_v63 = vmul.f32 %v1756_v44, %v1642_v43 }
 0x9a6   : > { %3117 = vmatmul.msk.f32.gmra.mxu2 %vm650_vm0, %v1759_v63 }
 0x9f2   : > { %v1794_v45 = vpop.f32.mrf.mxu2 }
 0x9f3   : > { %v1803_v30 = vadd.f32 %v1794_v45, %v4027_v17 }
 0x9f5   : > { %v4139_v46 = vadd.f32 %v3311_v20, %v1803_v30 }
 0x9f7   : > { %v1817_v47 = vsel %vm700_vm3, %v4139_v46, 0.0 }
 0x9f8   : > { %1818 = vadd.xlane.f32.xlu2 %v1817_v47 }
 0xa21   : > { %v1797_v48 = vpop.f32.mrf.mxu2 }
 0xa22   : > { %v1804_v32 = vadd.f32 %v1797_v48, %v4034_v24 }
 0xa24   : > { %v4144_v49 = vadd.f32 %v3311_v20, %v1804_v32 }
 0xa26   : > { %v1820_v50 = vsel %vm700_vm3, %v4144_v49, 0.0 }
 0xa27   : > { %1821 = vadd.xlane.f32.xlu1 %v1820_v50 }
 0xa29   : > { %v1800_v51 = vpop.f32.mrf.mxu2 }
 0xa2a   : > { %v1805_v52 = vadd.f32 %v1800_v51, %v4039_v31 }
 0xa2c   : > { %v4149_v53 = vadd.f32 %v3311_v20, %v1805_v52 }
 0xa2e   : > { %v1823_v17 = vsel %vm685_vm1, %v4149_v53, 0.0 }
 0xa2f   : > { %1824 = vadd.xlane.f32.xlu0 %v1823_v17 }
 0xa6b   : > { %v1819_v54 = vpop.xlane.xlu2 %1818 }
 0xa6c   : > { %v1826_v56 = vmul.f32 %v1819_v54, %v3781_v39 }
 0xa6e   : > { %v1829_v24 = vsub.f32 %v4139_v46, %v1826_v56 }
 0xa70   : > { %v1832_v57 = vmul.f32 %v1829_v24, %v1829_v24 }
 0xa72   : > { %v1835_v37 = vsel %vm700_vm3, %v1832_v57, 0.0 }
 0xa73   : > { %1836 = vadd.xlane.f32.xlu2 %v1835_v37 }
 0xa9a   : > { %v1822_v58 = vpop.xlane.xlu1 %1821 }
 0xa9b   : > { %v1827_v59 = vmul.f32 %v1822_v58, %v3781_v39  ;;  %v1936_v58 = vstv %s3127_s25 }
 0xa9d   : > { %v1830_v31 = vsub.f32 %v4144_v49, %v1827_v59  ;;  %v1937_v59 = vmul.f32 %v1936_v58, %v3821_v40 }
 0xa9f   : > { %v1833_v60 = vmul.f32 %v1830_v31, %v1830_v31 }
 0xaa1   : > { %v1838_v61 = vsel %vm700_vm3, %v1833_v60, 0.0 }
 0xaa2   : > { %1839 = vadd.xlane.f32.xlu1 %v1838_v61  ;;  %v1825_v62 = vpop.xlane.xlu0 %1824 }
 0xaa3   : > { %v1828_v0 = vmul.f32 %v1825_v62, %v3781_v39 }
 0xaa5   : > { %v4161_v1 = vsub.f32 %v4149_v53, %v1828_v0 }
 0xaa7   : > { %v1834_v2 = vmul.f32 %v4161_v1, %v4161_v1 }
 0xaa9   : > { %v1841_v3 = vsel %vm685_vm1, %v1834_v2, 0.0 }
 0xaaa   : > { %1842 = vadd.xlane.f32.xlu0 %v1841_v3 }
 0xae6   : > { %v1837_v11 = vpop.xlane.xlu2 %1836 }
 0xae7   : > { %v1844_v12 = vmul.f32 %v1837_v11, %v3781_v39 }
 0xae9   : > { %v1847_v13 = vadd.f32 1e-05, %v1844_v12 }
 0xaeb   : > { %3393 = vrsqrt.f32 %v1847_v13  ;;  %vm1856_vm12 = vweird.f32 %v1847_v13 }
 0xaf1   : > { %v3394_v15 = vpop.eup %3393 }
 0xaf2   : > { %v1851_v16 = vmul.f32 %v3394_v15, %v1847_v13  ;;  %vm1857_vm11 = vweird.f32 %v3394_v15 }
 0xaf3   : > { %vm1858_vm13 = vmor %vm1856_vm12, %vm1857_vm11 }
 0xaf4   : > { %v1852_v18 = vmul.f32 %v3394_v15, %v1851_v16  ;;  %v1939_v16 = vmul.f32 %v1936_v58, %v3829_v42 }
 0xaf6   : > { %v1853_v19 = vmul.f32 0.5, %v1852_v18 }
 0xaf8   : > { %v1854_v21 = vsub.f32 1.5, %v1853_v19 }
 0xafa   : > { %v1855_v14 = vmul.f32 %v3394_v15, %v1854_v21 }
 0xafc   : > { %v1859_v25 = vsel %vm1858_vm13, %v3394_v15, %v1855_v14 }
 0xafd   : > { %v1880_v27 = vmul.f32 %v1859_v25, %v1829_v24 }
 0xaff   : > { %v1886_v28 = vmul.f32 %v3312_v23, %v1880_v27 }
 0xb01   : > { %v1892_v55 = vadd.f32 %v3313_v26, %v1886_v28 }
 0xb03   : > { %3124 = vmatmul.msk.f32.vlgmr.msra.gmra.mxu3 %vm700_vm3, %v1892_v55 }
 0xb15   : > { %v1840_v5 = vpop.xlane.xlu1 %1839 }
 0xb16   : > { %v1845_v6 = vmul.f32 %v1840_v5, %v3781_v39 }
 0xb18   : > { %v1848_v33 = vadd.f32 1e-05, %v1845_v6 }
 0xb1a   : > { %3395 = vrsqrt.f32 %v1848_v33  ;;  %vm1866_vm6 = vweird.f32 %v1848_v33 }
 0xb1d   : > { %v1843_v34 = vpop.xlane.xlu0 %1842 }
 0xb1e   : > { %v1846_v35 = vmul.f32 %v1843_v34, %v3781_v39 }
 0xb20   : > { %v3396_v36 = vpop.eup %3395  ;;  %v1849_v29 = vadd.f32 1e-05, %v1846_v35 }
 0xb21   : > { %v1861_v22 = vmul.f32 %v3396_v36, %v1848_v33  ;;  %vm1867_vm5 = vweird.f32 %v3396_v36 }
 0xb22   : > { %3397 = vrsqrt.f32 %v1849_v29  ;;  %vm1868_vm7 = vmor %vm1866_vm6, %vm1867_vm5  ;;  %vm1876_vm9 = vweird.f32 %v1849_v29 }
 0xb23   : > { %v1862_v38 = vmul.f32 %v3396_v36, %v1861_v22 }
 0xb25   : > { %v1863_v43 = vmul.f32 0.5, %v1862_v38 }
 0xb27   : > { %v1864_v44 = vsub.f32 1.5, %v1863_v43 }
 0xb28   : > { %v3398_v63 = vpop.eup %3397 }
 0xb29   : > { %v1865_v20 = vmul.f32 %v3396_v36, %v1864_v44  ;;  %v1871_v45 = vmul.f32 %v3398_v63, %v1849_v29  ;;  %vm1877_vm8 = vweird.f32 %v3398_v63  ;;  %v3128_v44 = vld [vmem:[%s4560_s9 + $0x20] sm:$0xff] }
 0xb2a   : > { %vm1878_vm10 = vmor %vm1876_vm9, %vm1877_vm8 }
 0xb2b   : > { %v1869_v30 = vsel %vm1868_vm7, %v3396_v36, %v1865_v20  ;;  %v1872_v47 = vmul.f32 %v3398_v63, %v1871_v45 }
 0xb2c   : > { %v1881_v48 = vmul.f32 %v1869_v30, %v1830_v31  ;;  %v1938_v31 = vmul.f32 %v1936_v58, %v3825_v41 }
 0xb2d   : > { %v1873_v32 = vmul.f32 0.5, %v1872_v47 }
 0xb2e   : > { %v1887_v50 = vmul.f32 %v3312_v23, %v1881_v48 }
 0xb2f   : > { %v1874_v51 = vsub.f32 1.5, %v1873_v32 }
 0xb30   : > { %v1893_v52 = vadd.f32 %v3313_v26, %v1887_v50 }
 0xb31   : > { %v1875_v17 = vmul.f32 %v3398_v63, %v1874_v51 }
 0xb32   : > { %3125 = vmatmul.msk.f32.gmra.mxu3 %vm700_vm3, %v1893_v52 }
 0xb33   : > { %v1879_v54 = vsel %vm1878_vm10, %v3398_v63, %v1875_v17 }
 0xb34   : > { %v1882_v56 = vmul.f32 %v1879_v54, %v4161_v1 }
 0xb36   : > { %v1888_v24 = vmul.f32 %v3312_v23, %v1882_v56 }
 0xb38   : > { %v1894_v57 = vadd.f32 %v3313_v26, %v1888_v24 }
 0xb3a   : > { %3126 = vmatmul.msk.f32.gmra.mxu3 %vm700_vm3, %v1894_v57 }
 0xb86   : > { %v4191_v37 = vpop.f32.mrf.mxu3 }
 0xb87   : > { %1951 = vrot.lane.b32.xlu0 %v4191_v37, %s3547_s29  ;;  %v1940_v61 = vadd.f32 %v1937_v59, %v4191_v37 }
 0xbb5   : > { %v4197_v60 = vpop.f32.mrf.mxu3 }
 0xbb6   : > { %1953 = vrot.lane.b32.xlu1 %v4197_v60, %s3547_s29  ;;  %v1941_v62 = vadd.f32 %v1938_v31, %v4197_v60 }
 0xbb8   : > { %v4203_v0 = vpack.i.bf16 %v1940_v61, %v1941_v62 }
 0xbbd   : > { %v4205_v1 = vpop.f32.mrf.mxu3 }
 0xbbe   : > { %1955 = vrot.lane.b32.xlu2 %v4205_v1, %s3547_s29  ;;  %v4223_v18 = vadd.f32 %v1939_v16, %v4205_v1  ;;  %s4627_s29 = smov 120  }
 0xbf9   : > { %v1952_v41 = vpop.permute.xlu0 %1951 }
 0xc18   : > { %v1956_v2 = vpop.permute.xlu2 %1955 }
 0xc19   : > { %3132 = vmatpush.xpose.msk.msra.mxu0 %vm845_vm14, %v1956_v2 }
 0xc28   : > { %v1954_v40 = vpop.permute.xlu1 %1953 }
 0xc29   : > { %3133 = vmatpush.xpose.msk.msra.mxu0 %vm845_vm14, %v1954_v40 }
 0xc2d   : > { %3134 = vmatpush.xpose.msk.msra.mxu0 %vm845_vm14, %v1952_v41 }
 0xc30   : > { %3135 = vmatmul.msk.f32.vlgmr.msra.gmra.mxu0 %vm845_vm14, %v4191_v37 }
 0xc38   : > { %3136 = vmatmul.msk.f32.gmra.mxu0 %vm845_vm14, %v4197_v60 }
 0xc40   : > { %3137 = vmatmul.msk.f32.gmra.mxu0 %vm845_vm14, %v4205_v1 }
 0xcad   : > { %v1986_v3 = vpop.f32.mrf.mxu0 }
 0xcae   : > { %v1995_v7 = vmul.f32 0.35355338, %v1986_v3 }
 0xcb0   : > { %v1998_v8 = vsel %vm887_vm15, %v1995_v7, -inf }
 0xcb1   : > { %1999 = vmax.xlane.f32.xlu2 %v1998_v8 }
 0xcb5   : > { %v1989_v9 = vpop.f32.mrf.mxu0 }
 0xcb6   : > { %v1996_v10 = vmul.f32 0.35355338, %v1989_v9 }
 0xcb8   : > { %v2001_v11 = vsel %vm887_vm15, %v1996_v10, -inf }
 0xcb9   : > { %2002 = vmax.xlane.f32.xlu0 %v2001_v11 }
 0xcbd   : > { %v1992_v12 = vpop.f32.mrf.mxu0 }
 0xcbe   : > { %v1997_v13 = vmul.f32 0.35355338, %v1992_v12 }
 0xcc0   : > { %v2004_v15 = vsel %vm894_vm2, %v1997_v13, -inf }
 0xcc1   : > { %2005 = vmax.xlane.f32.xlu1 %v2004_v15 }
 0xccd   : > { %2038 = vrot.lane.b32.xlu0 %v4223_v18, %s3548_s30 }
 0xcd5   : > { %2089 = vrot.lane.b32.xlu0 %v4205_v1, %s3549_s23 }
 0xcda   : > { %3285 = vrot.lane.b32.xlu1 %v4203_v0, %s3548_s30  ;;  %s4630_s30 = smov 112  }
 0xcdd   : > { %2085 = vrot.lane.b32.xlu0 %v4191_v37, %s3549_s23 }
 0xce2   : > { %2079 = vrot.lane.b32.xlu1 %v4191_v37, %s4627_s29 }
 0xce5   : > { %2081 = vrot.lane.b32.xlu0 %v4197_v60, %s4627_s29 }
 0xcea   : > { %2290 = vrot.lane.b32.xlu1 %v4205_v1, %s4628_s20 }
 0xced   : > { %2459 = vrot.lane.b32.xlu0 %v4205_v1, %s4629_s24 }
 0xcf2   : > { %2288 = vrot.lane.b32.xlu1 %v4197_v60, %s4628_s20 }
 0xcf5   : > { %2457 = vrot.lane.b32.xlu0 %v4197_v60, %s4629_s24 }
 0xcfa   : > { %2455 = vrot.lane.b32.xlu1 %v4191_v37, %s4629_s24  ;;  %s629_s24 = sand.u32 1, %s3535_s28  }
 0xcfb   : > { %s630_s3 = scalar_lea.vmem [#allocation5], %s629_s24 }
 0xcfc   : > { %s2992_s25 = sshll.u32 %s630_s3, 4  ;;  %s2993_s25 = int_to_ptr.vmem [resolvable:$true] %s2992_s25 }
 0xcfd   : > { %2280 = vrot.lane.b32.xlu0 %v4191_v37, %s4630_s30 }
 0xd02   : > { %2282 = vrot.lane.b32.xlu1 %v4197_v60, %s4630_s30 }
 0xd05   : > { %2284 = vrot.lane.b32.xlu0 %v4205_v1, %s4630_s30 }
 0xd24   : > { %v2000_v42 = vpop.xlane.xlu2 %1999 }
 0xd25   : > { %v2007_v19 = vsub.f32 %v1995_v7, %v2000_v42 }
 0xd27   : > { %v2010_v21 = vmul.f32 1.442695, %v2007_v19 }
 0xd29   : > { %3399 = vpow2.f32 %v2010_v21 }
 0xd2c   : > { %v2003_v14 = vpop.xlane.xlu0 %2002 }
 0xd2d   : > { %v2008_v23 = vsub.f32 %v1996_v10, %v2003_v14 }
 0xd2f   : > { %v3400_v25 = vpop.eup %3399  ;;  %v2012_v27 = vmul.f32 1.442695, %v2008_v23 }
 0xd30   : > { %v2016_v26 = vsel %vm887_vm15, %v3400_v25, 0.0 }
 0xd31   : > { %3401 = vpow2.f32 %v2012_v27  ;;  %2017 = vadd.xlane.f32.xlu2 %v2016_v26 }
 0xd34   : > { %v2006_v28 = vpop.xlane.xlu1 %2005 }
 0xd35   : > { %v2009_v55 = vsub.f32 %v1997_v13, %v2006_v28 }
 0xd37   : > { %v3402_v5 = vpop.eup %3401  ;;  %v2014_v6 = vmul.f32 1.442695, %v2009_v55 }
 0xd38   : > { %v2019_v33 = vsel %vm887_vm15, %v3402_v5, 0.0 }
 0xd39   : > { %3403 = vpow2.f32 %v2014_v6  ;;  %2020 = vadd.xlane.f32.xlu2 %v2019_v33 }
 0xd3f   : > { %v3404_v34 = vpop.eup %3403  ;;  %v2039_v35 = vpop.permute.xlu0 %2038 }
 0xd40   : > { %3138 = vmatpush.msk.msra.mxu1 %vm939_vm4, %v2039_v35  ;;  %v2022_v36 = vsel %vm894_vm2, %v3404_v34, 0.0 }
 0xd41   : > { %2023 = vadd.xlane.f32.xlu2 %v2022_v36 }
 0xd47   : > { %v2090_v22 = vpop.permute.xlu0 %2089 }
 0xd48   : > { %3142 = vmatpush.xpose.msk.msra.mxu2 %vm845_vm14, %v2090_v22 }
 0xd4c   : > { %v3286_v29 = vpop.permute.xlu1 %3285 }
 0xd4d   : > { %v3287_v38 = vunpack.i.l.bf16 %v3286_v29  ;;  %v3288_v43 = vunpack.i.h.bf16 %v3286_v29 }
 0xd4f   : > { %2067 = vmatpush.msra.mxu1 %v3287_v38  ;;  %v2086_v63 = vpop.permute.xlu0 %2085 }
 0xd51   : > { %2068 = vmatpush.msra.mxu1 %v3288_v43 }
 0xd53   : > { %2269 = vmatpush.msrb.mxu1 %v3128_v44 }
 0xd54   : > { %v2080_v20 = vpop.permute.xlu1 %2079 }
 0xd57   : > { %v2082_v45 = vpop.permute.xlu0 %2081 }
 0xd59   : > { %2087 = vrot.lane.b32.xlu2 %v4197_v60, %s3549_s23  ;;  %s4632_s23 = smov 56  }
 0xd5c   : > { %v2291_v30 = vpop.permute.xlu1 %2290 }
 0xd5f   : > { %v2460_v48 = vpop.permute.xlu0 %2459 }
 0xd61   : > { %2083 = vrot.lane.b32.xlu2 %v4205_v1, %s4627_s29  ;;  %s2982_s29 = scalar_lea.sflag [#allocation6], %s629_s24 }
 0xd64   : > { %v2289_v50 = vpop.permute.xlu1 %2288 }
 0xd67   : > { %v2458_v17 = vpop.permute.xlu0 %2457 }
 0xd69   : > { %2286 = vrot.lane.b32.xlu2 %v4191_v37, %s4628_s20  ;;  %s3493_s20 = sshra.s32 %s2995_s2, 4  ;;  %s3494_s20 = int_to_ptr.hbm [resolvable:$true] %s3493_s20 }
 0xd6a   : > { %p3500_p0 = scmp.lt.s32.totalorder %s3494_s20, %s4572_s21 }
 0xd6c   : > { %v2456_v57 = vpop.permute.xlu1 %2455 }
 0xd6f   : > { %v2281_v62 = vpop.permute.xlu0 %2280 }
 0xd71   : > { %2449 = vrot.lane.b32.xlu2 %v4191_v37, %s4631_s27 }
 0xd74   : > { %v2283_v2 = vpop.permute.xlu1 %2282 }
 0xd77   : > { %v2285_v40 = vpop.permute.xlu0 %2284 }
 0xda4   : > { %v2018_v47 = vpop.xlane.xlu2 %2017 }
 0xda5   : > { %3405 = vrcp.f32 %v2018_v47 }
 0xdab   : > { %v3406_v32 = vpop.eup %3405 }
 0xdac   : > { %v2028_v51 = vmul.f32 %v3406_v32, %v3400_v25  ;;  %v2021_v52 = vpop.xlane.xlu2 %2020 }
 0xdad   : > { %3407 = vrcp.f32 %v2021_v52 }
 0xdae   : > { %3139 = vmatmul.msk.f32.vlgmr.msra.gmra.mxu1 %vm887_vm15, %v2028_v51 }
 0xdaf   : > { %3171 = vmatpush.xpose.msk.msra.mxu1 %vm845_vm14, %v2460_v48 }
 0xdb3   : > { %v3408_v54 = vpop.eup %3407  ;;  %3172 = vmatpush.xpose.msk.msra.mxu1 %vm845_vm14, %v2458_v17 }
 0xdb4   : > { %v2024_v56 = vpop.xlane.xlu2 %2023  ;;  %v2029_v24 = vmul.f32 %v3408_v54, %v3402_v5 }
 0xdb5   : > { %3409 = vrcp.f32 %v2024_v56 }
 0xdb6   : > { %3140 = vmatmul.msk.f32.gmra.mxu1 %vm887_vm15, %v2029_v24 }
 0xdb7   : > { %3173 = vmatpush.xpose.msk.msra.mxu1 %vm845_vm14, %v2456_v57 }
 0xdbb   : > { %v3410_v37 = vpop.eup %3409 }
 0xdbc   : > { %v2088_v58 = vpop.permute.xlu2 %2087  ;;  %v2030_v59 = vmul.f32 %v3410_v37, %v3404_v34 }
 0xdbd   : > { %3143 = vmatpush.xpose.msk.msra.mxu2 %vm845_vm14, %v2088_v58 }
 0xdbe   : > { %3141 = vmatmul.msk.f32.gmra.mxu1 %vm887_vm15, %v2030_v59 }
 0xdc1   : > { %3144 = vmatpush.xpose.msk.msra.mxu2 %vm845_vm14, %v2086_v63 }
 0xdc4   : > { %v2084_v31 = vpop.permute.xlu2 %2083  ;;  %3145 = vmatmul.msk.f32.vlgmr.msra.gmra.mxu2 %vm845_vm14, %v2080_v20 }
 0xdc5   : > { %3158 = vmatpush.xpose.msk.msrb.mxu2 %vm845_vm14, %v2291_v30 }
 0xdc9   : > { %3159 = vmatpush.xpose.msk.msrb.mxu2 %vm845_vm14, %v2289_v50 }
 0xdcc   : > { %v2287_v61 = vpop.permute.xlu2 %2286  ;;  %3146 = vmatmul.msk.f32.gmra.mxu2 %vm845_vm14, %v2082_v45 }
 0xdcd   : > { %3160 = vmatpush.xpose.msk.msrb.mxu2 %vm845_vm14, %v2287_v61 }
 0xdd4   : > { %3147 = vmatmul.msk.f32.gmra.mxu2 %vm845_vm14, %v2084_v31  ;;  %v2450_v8 = vpop.permute.xlu2 %2449 }
 0xddc   : > { %3161 = vmatmul.msk.f32.vlgmr.msrb.gmra.mxu2 %vm845_vm14, %v2281_v62 }
 0xde4   : > { %3162 = vmatmul.msk.f32.gmra.mxu2 %vm845_vm14, %v2283_v2 }
 0xdec   : > { %3163 = vmatmul.msk.f32.gmra.mxu2 %vm845_vm14, %v2285_v40 }
 0xe2b   : > { %v2070_v41 = vpop.f32.mrf.mxu1 }
 0xe2c   : > { %3155 = vmatmul.msk.f32.vlgmr.msrb.gmra.mxu1 %vm845_vm14, %v2070_v41 }
 0xe33   : > { %v2073_v3 = vpop.f32.mrf.mxu1 }
 0xe34   : > { %3156 = vmatmul.msk.f32.gmra.mxu1 %vm845_vm14, %v2073_v3 }
 0xe3b   : > { %v2076_v7 = vpop.f32.mrf.mxu1 }
 0xe3c   : > { %3157 = vmatmul.msk.f32.gmra.mxu1 %vm845_vm14, %v2076_v7 }
 0xe44   : > { %3174 = vmatmul.msk.f32.vlgmr.msra.gmra.mxu1 %vm845_vm14, %v2450_v8 }
 0xe47   : > { %v2120_v9 = vpop.f32.mrf.mxu2 }
 0xe48   : > { %v2129_v10 = vmul.f32 0.35355338, %v2120_v9 }
 0xe4a   : > { %v2132_v11 = vsel %vm887_vm15, %v2129_v10, -inf }
 0xe4b   : > { %2133 = vmax.xlane.f32.xlu2 %v2132_v11 }
 0xe4f   : > { %v2123_v12 = vpop.f32.mrf.mxu2 }
 0xe50   : > { %v2130_v13 = vmul.f32 0.35355338, %v2123_v12 }
 0xe52   : > { %v2135_v15 = vsel %vm887_vm15, %v2130_v13, -inf }
 0xe53   : > { %2136 = vmax.xlane.f32.xlu1 %v2135_v15 }
 0xe57   : > { %v2126_v16 = vpop.f32.mrf.mxu2 }
 0xe58   : > { %v2131_v42 = vmul.f32 0.35355338, %v2126_v16 }
 0xe5a   : > { %v2138_v19 = vsel %vm894_vm2, %v2131_v42, -inf }
 0xe5b   : > { %2139 = vmax.xlane.f32.xlu0 %v2138_v19 }
 0xe5f   : > { %v2321_v21 = vpop.f32.mrf.mxu2 }
 0xe60   : > { %v2330_v14 = vmul.f32 0.35355338, %v2321_v21 }
 0xe62   : > { %v2333_v23 = vsel %vm887_vm15, %v2330_v14, -inf }
 0xe63   : > { %2334 = vmax.xlane.f32.xlu1 %v2333_v23 }
 0xe67   : > { %v2324_v26 = vpop.f32.mrf.mxu2 }
 0xe68   : > { %v2331_v5 = vmul.f32 0.35355338, %v2324_v26 }
 0xe6f   : > { %2169 = vrot.lane.b32.xlu0 %v4223_v18, %s4632_s23  ;;  %v2327_v16 = vpop.f32.mrf.mxu2 }
 0xe70   : > { %v2332_v19 = vmul.f32 0.35355338, %v2327_v16 }
 0xe72   : > { %v2339_v23 = vsel %vm894_vm2, %v2332_v19, -inf }
 0xe7c   : > { %3290 = vrot.lane.b32.xlu1 %v4203_v0, %s4632_s23 }
 0xe84   : > { %2539 = vrot.lane.b32.xlu1 %v4223_v18, %s4633_s22 }
 0xe8c   : > { %2370 = vrot.lane.b32.xlu1 %v4223_v18, %s4634_s0  ;;  %v2336_v18 = vsel %vm887_vm15, %v2331_v5, -inf }
 0xe94   : > { %3300 = vrot.lane.b32.xlu1 %v4203_v0, %s4634_s0 }
 0xe9c   : > { %2451 = vrot.lane.b32.xlu1 %v4197_v60, %s4631_s27 }
 0xea9   : > { %v4306_v25 = vpop.f32.mrf.mxu1 }
 0xeb1   : > { %v4308_v27 = vpop.f32.mrf.mxu1 }
 0xeb9   : > { %v4310_v6 = vpop.f32.mrf.mxu1 }
 0xebe   : > { %v2134_v28 = vpop.xlane.xlu2 %2133 }
 0xebf   : > { %v2141_v55 = vsub.f32 %v2129_v10, %v2134_v28 }
 0xec1   : > { %v2144_v33 = vmul.f32 1.442695, %v2141_v55  ;;  %v2490_v22 = vpop.f32.mrf.mxu1 }
 0xec2   : > { %v2499_v38 = vmul.f32 0.35355338, %v2490_v22 }
 0xec3   : > { %3411 = vpow2.f32 %v2144_v33 }
 0xec4   : > { %v2502_v63 = vsel %vm887_vm15, %v2499_v38, -inf }
 0xec6   : > { %v2137_v34 = vpop.xlane.xlu1 %2136  ;;  %2337 = vmax.xlane.f32.xlu1 %v2336_v18 }
 0xec7   : > { %v2142_v36 = vsub.f32 %v2130_v13, %v2137_v34 }
 0xec9   : > { %v3412_v35 = vpop.eup %3411  ;;  %v2146_v29 = vmul.f32 1.442695, %v2142_v36 }
 0xeca   : > { %v2150_v60 = vsel %vm887_vm15, %v3412_v35, 0.0 }
 0xecb   : > { %2151 = vadd.xlane.f32.xlu2 %v2150_v60  ;;  %3413 = vpow2.f32 %v2146_v29  ;;  %v3129_v60 = vld [vmem:[%s4560_s9 + $0x28] sm:$0xff] }
 0xecc   : > { %2234 = vmatpush.msrb.mxu0 %v3129_v60 }
 0xece   : > { %v2140_v43 = vpop.xlane.xlu0 %2139 }
 0xecf   : > { %v2143_v44 = vsub.f32 %v2131_v42, %v2140_v43 }
 0xed1   : > { %v2148_v20 = vmul.f32 1.442695, %v2143_v44  ;;  %v3414_v30 = vpop.eup %3413 }
 0xed2   : > { %v2153_v48 = vsel %vm887_vm15, %v3414_v30, 0.0 }
 0xed3   : > { %2503 = vmax.xlane.f32.xlu2 %v2502_v63  ;;  %3415 = vpow2.f32 %v2148_v20  ;;  %v3130_v63 = vld [vmem:[%s4560_s9 + $0x30] sm:$0xff] }
 0xed4   : > { %2435 = vmatpush.msra.mxu0 %v3130_v63 }
 0xed6   : > { %v2335_v45 = vpop.xlane.xlu1 %2334 }
 0xed7   : > { %v2342_v47 = vsub.f32 %v2330_v14, %v2335_v45 }
 0xed9   : > { %v2345_v32 = vmul.f32 1.442695, %v2342_v47  ;;  %v3416_v50 = vpop.eup %3415 }
 0xeda   : > { %v2156_v52 = vsel %vm894_vm2, %v3416_v50, 0.0 }
 0xedb   : > { %2154 = vadd.xlane.f32.xlu2 %v2153_v48  ;;  %3417 = vpow2.f32 %v2345_v32 }
 0xee1   : > { %v2170_v51 = vpop.permute.xlu0 %2169  ;;  %v3418_v17 = vpop.eup %3417 }
 0xee2   : > { %3148 = vmatpush.msk.msrb.mxu3 %vm939_vm4, %v2170_v51  ;;  %v2351_v54 = vsel %vm887_vm15, %v3418_v17, 0.0 }
 0xee3   : > { %2157 = vadd.xlane.f32.xlu2 %v2156_v52 }
 0xeeb   : > { %2352 = vadd.xlane.f32.xlu2 %v2351_v54 }
 0xeee   : > { %v3291_v56 = vpop.permute.xlu1 %3290 }
 0xeef   : > { %v3292_v24 = vunpack.i.l.bf16 %v3291_v56  ;;  %v3293_v57 = vunpack.i.h.bf16 %v3291_v56 }
 0xef1   : > { %2198 = vmatpush.msrb.mxu3 %v3292_v24 }
 0xef3   : > { %2199 = vmatpush.msrb.mxu3 %v3293_v57 }
 0xef6   : > { %v2540_v37 = vpop.permute.xlu1 %2539 }
 0xef7   : > { %3177 = vmatpush.msk.msra.mxu2 %vm939_vm4, %v2540_v37 }
 0xefe   : > { %v2371_v58 = vpop.permute.xlu1 %2370 }
 0xeff   : > { %3164 = vmatpush.msk.msra.mxu3 %vm939_vm4, %v2371_v58 }
 0xf03   : > { %3295 = vrot.lane.b32.xlu2 %v4203_v0, %s4633_s22  ;;  %s4635_s22 = sld [smem:[#allocation23_spill]] }
 0xf06   : > { %v3301_v59 = vpop.permute.xlu1 %3300 }
 0xf07   : > { %v3302_v31 = vunpack.i.l.bf16 %v3301_v59  ;;  %v3303_v61 = vunpack.i.h.bf16 %v3301_v59  ;;  %v3131_v59 = vld [vmem:[%s4560_s9 + $0x38] sm:$0xff] }
 0xf09   : > { %2399 = vmatpush.msra.mxu3 %v3302_v31 }
 0xf0b   : > { %2453 = vrot.lane.b32.xlu2 %v4205_v1, %s4631_s27  ;;  %2400 = vmatpush.msra.mxu3 %v3303_v61  ;;  %s3499_s27 = scalar_lea.hbm %s4572_s21, 2 }
 0xf0e   : > { %v2452_v62 = vpop.permute.xlu1 %2451 }
 0xf0f   : > { %3175 = vmatmul.msk.f32.gmra.mxu1 %vm845_vm14, %v2452_v62 }
 0xf39   : > { %v2338_v2 = vpop.xlane.xlu1 %2337 }
 0xf3a   : > { %v2343_v40 = vsub.f32 %v2331_v5, %v2338_v2 }
 0xf3c   : > { %v2347_v41 = vmul.f32 1.442695, %v2343_v40 }
 0xf3e   : > { %3419 = vpow2.f32 %v2347_v41  ;;  %v2152_v3 = vpop.xlane.xlu2 %2151 }
 0xf3f   : > { %3421 = vrcp.f32 %v2152_v3 }
 0xf44   : > { %v3420_v7 = vpop.eup %3419 }
 0xf45   : > { %v3422_v8 = vpop.eup %3421  ;;  %v2354_v0 = vsel %vm887_vm15, %v3420_v7, 0.0 }
 0xf46   : > { %v2162_v9 = vmul.f32 %v3422_v8, %v3412_v35  ;;  %v2504_v10 = vpop.xlane.xlu2 %2503  ;;  %2355 = vadd.xlane.f32.xlu2 %v2354_v0 }
 0xf47   : > { %v2511_v11 = vsub.f32 %v2499_v38, %v2504_v10 }
 0xf48   : > { %3149 = vmatmul.msk.f32.vlgmr.msrb.gmra.mxu3 %vm887_vm15, %v2162_v9 }
 0xf49   : > { %v2514_v1 = vmul.f32 1.442695, %v2511_v11  ;;  %2604 = vmatpush.msrb.mxu3 %v3131_v59 }
 0xf4b   : > { %3423 = vpow2.f32 %v2514_v1 }
 0xf4e   : > { %v2155_v12 = vpop.xlane.xlu2 %2154 }
 0xf4f   : > { %3425 = vrcp.f32 %v2155_v12 }
 0xf51   : > { %v3424_v13 = vpop.eup %3423 }
 0xf52   : > { %v2520_v15 = vsel %vm887_vm15, %v3424_v13, 0.0 }
 0xf53   : > { %2521 = vadd.xlane.f32.xlu0 %v2520_v15 }
 0xf55   : > { %v3426_v42 = vpop.eup %3425 }
 0xf56   : > { %v2158_v21 = vpop.xlane.xlu2 %2157  ;;  %v2163_v14 = vmul.f32 %v3426_v42, %v3414_v30 }
 0xf57   : > { %3427 = vrcp.f32 %v2158_v21 }
 0xf58   : > { %3150 = vmatmul.msk.f32.gmra.mxu3 %vm887_vm15, %v2163_v14 }
 0xf5b   : > { %2340 = vmax.xlane.f32.xlu0 %v2339_v23 }
 0xf5d   : > { %v3428_v26 = vpop.eup %3427 }
 0xf5e   : > { %v2353_v28 = vpop.xlane.xlu2 %2352  ;;  %v2164_v55 = vmul.f32 %v3428_v26, %v3416_v50 }
 0xf5f   : > { %3429 = vrcp.f32 %v2353_v28 }
 0xf60   : > { %3151 = vmatmul.msk.f32.gmra.mxu3 %vm887_vm15, %v2164_v55 }
 0xf65   : > { %v3430_v5 = vpop.eup %3429 }
 0xf66   : > { %v2363_v33 = vmul.f32 %v3430_v5, %v3418_v17  ;;  %v3296_v18 = vpop.permute.xlu2 %3295 }
 0xf67   : > { %v3297_v34 = vunpack.i.l.bf16 %v3296_v18  ;;  %v3298_v35 = vunpack.i.h.bf16 %v3296_v18  ;;  %v3314_v18 = vld [vmem:[%s4561_s10 + $0x1] ss:$0 sm:$0xff] }
 0xf68   : > { %3165 = vmatmul.msk.f32.vlgmr.msra.gmra.mxu3 %vm887_vm15, %v2363_v33 }
 0xf69   : > { %2568 = vmatpush.msra.mxu2 %v3297_v34 }
 0xf6b   : > { %2569 = vmatpush.msra.mxu2 %v3298_v35 }
 0xf6e   : > { %v2454_v36 = vpop.permute.xlu2 %2453 }
 0xf6f   : > { %3176 = vmatmul.msk.f32.gmra.mxu1 %vm845_vm14, %v2454_v36 }
 0xf8c   : > { %v2493_v51 = vpop.f32.mrf.mxu1 }
 0xf8d   : > { %v2500_v17 = vmul.f32 0.35355338, %v2493_v51 }
 0xf8f   : > { %v2505_v54 = vsel %vm887_vm15, %v2500_v17, -inf }
 0xfb9   : > { %v2356_v22 = vpop.xlane.xlu2 %2355 }
 0xfba   : > { %3431 = vrcp.f32 %v2356_v22 }
 0xfc0   : > { %v3432_v29 = vpop.eup %3431 }
 0xfc1   : > { %v2364_v38 = vmul.f32 %v3432_v29, %v3420_v7 }
 0xfc3   : > { %3166 = vmatmul.msk.f32.gmra.mxu3 %vm887_vm15, %v2364_v38 }
 0xfc6   : > { %v2522_v43 = vpop.xlane.xlu0 %2521 }
 0xfc7   : > { %3433 = vrcp.f32 %v2522_v43 }
 0xfcb   : > { %v2201_v44 = vpop.f32.mrf.mxu3 }
 0xfcc   : > { %3152 = vmatmul.msk.f32.vlgmr.msrb.gmra.mxu0 %vm845_vm14, %v2201_v44 }
 0xfcd   : > { %v3434_v20 = vpop.eup %3433 }
 0xfce   : > { %v2532_v45 = vmul.f32 %v3434_v20, %v3424_v13  ;;  %v2341_v30 = vpop.xlane.xlu0 %2340  ;;  %v3190_v20 = vld [vmem:[%s4564_s13 + $0x38] sm:$0xff] }
 0xfcf   : > { %v2344_v47 = vsub.f32 %v2332_v19, %v2341_v30  ;;  %2742 = vmatpush.msrb.mxu0 %v3190_v20  ;;  %v3188_v30 = vld [vmem:[%s4564_s13 + $0x28] sm:$0xff] }
 0xfd0   : > { %3178 = vmatmul.msk.f32.vlgmr.msra.gmra.mxu2 %vm887_vm15, %v2532_v45  ;;  %v3189_v45 = vld [vmem:[%s4564_s13 + $0x30] sm:$0xff] }
 0xfd1   : > { %v2349_v48 = vmul.f32 1.442695, %v2344_v47  ;;  %2743 = vmatpush.msrb.mxu0 %v3189_v45  ;;  %v3187_v47 = vld [vmem:[%s4564_s13 + $0x20] sm:$0xff] }
 0xfd3   : > { %3435 = vpow2.f32 %v2349_v48  ;;  %2744 = vmatpush.msrb.mxu0 %v3188_v30 }
 0xfd5   : > { %2745 = vmatpush.msrb.mxu0 %v3187_v47  ;;  %v3196_v47 = vld [vmem:[%s4626_s4 + $0x48] sm:$0xff] }
 0xfd9   : > { %v3436_v32 = vpop.eup %3435 }
 0xfda   : > { %v2357_v50 = vsel %vm894_vm2, %v3436_v32, 0.0 }
 0xfdb   : > { %v2204_v52 = vpop.f32.mrf.mxu3  ;;  %2358 = vadd.xlane.f32.xlu0 %v2357_v50 }
 0xfdc   : > { %3153 = vmatmul.msk.f32.gmra.mxu0 %vm845_vm14, %v2204_v52 }
 0xfe3   : > { %v2207_v56 = vpop.f32.mrf.mxu3  ;;  %2506 = vmax.xlane.f32.xlu0 %v2505_v54 }
 0xfe4   : > { %3154 = vmatmul.msk.f32.gmra.mxu0 %vm845_vm14, %v2207_v56 }
 0xfeb   : > { %v2402_v24 = vpop.f32.mrf.mxu3 }
 0xfec   : > { %3168 = vmatmul.msk.f32.vlgmr.msra.gmra.mxu0 %vm845_vm14, %v2402_v24  ;;  %v2496_v57 = vpop.f32.mrf.mxu1 }
 0xfed   : > { %v2501_v37 = vmul.f32 0.35355338, %v2496_v57 }
 0xfef   : > { %v2508_v58 = vsel %vm894_vm2, %v2501_v37, -inf }
 0xff0   : > { %2509 = vmax.xlane.f32.xlu0 %v2508_v58 }
0x1046   : > { %v2405_v31 = vpop.f32.mrf.mxu3 }
0x1047   : > { %3169 = vmatmul.msk.f32.gmra.mxu0 %vm845_vm14, %v2405_v31 }
0x1049   : > { %v2236_v13 = vpop.f32.mrf.mxu0 }
0x104a   : > { %v2272_v26 = vadd.f32 %v4306_v25, %v2236_v13 }
0x104e   : > { %v2359_v61 = vpop.xlane.xlu0 %2358 }
0x104f   : > { %3437 = vrcp.f32 %v2359_v61 }
0x1053   : > { %v2571_v7 = vpop.f32.mrf.mxu2 }
0x1055   : > { %v3438_v62 = vpop.eup %3437 }
0x1056   : > { %v2507_v2 = vpop.xlane.xlu0 %2506  ;;  %v2365_v40 = vmul.f32 %v3438_v62, %v3436_v32 }
0x1057   : > { %v2512_v41 = vsub.f32 %v2500_v17, %v2507_v2  ;;  %v4394_v2 = vld [vmem:[%s4562_s11 + $0x1] ss:$0 sm:$0xff] }
0x1058   : > { %3167 = vmatmul.msk.f32.gmra.mxu3 %vm887_vm15, %v2365_v40 }
0x1059   : > { %v2516_v3 = vmul.f32 1.442695, %v2512_v41  ;;  %v2239_v15 = vpop.f32.mrf.mxu0 }
0x105a   : > { %v2275_v17 = vadd.f32 %v4308_v27, %v2239_v15 }
0x105b   : > { %3439 = vpow2.f32 %v2516_v3 }
0x1060   : > { %3181 = vmatmul.msk.f32.vlgmr.msrb.gmra.mxu3 %vm845_vm14, %v2571_v7 }
0x1061   : > { %v3440_v8 = vpop.eup %3439  ;;  %v4357_v16 = vpop.f32.mrf.mxu0 }
0x1062   : > { %v2523_v0 = vsel %vm887_vm15, %v3440_v8, 0.0  ;;  %v2278_v7 = vadd.f32 %v4310_v6, %v4357_v16 }
0x1063   : > { %2524 = vadd.xlane.f32.xlu0 %v2523_v0  ;;  %v2510_v9 = vpop.xlane.xlu0 %2509 }
0x1064   : > { %v2513_v10 = vsub.f32 %v2501_v37, %v2510_v9 }
0x1066   : > { %v2518_v11 = vmul.f32 1.442695, %v2513_v10 }
0x1068   : > { %3441 = vpow2.f32 %v2518_v11 }
0x1069   : > { %v2437_v23 = vpop.f32.mrf.mxu0 }
0x106a   : > { %v2446_v28 = vadd.f32 %v2437_v23, %v2272_v26 }
0x106e   : > { %v3442_v1 = vpop.eup %3441 }
0x106f   : > { %v2526_v12 = vsel %vm894_vm2, %v3442_v1, 0.0 }
0x1070   : > { %2527 = vadd.xlane.f32.xlu1 %v2526_v12 }
0x10c4   : > { %v2440_v51 = vpop.f32.mrf.mxu0 }
0x10c5   : > { %v2447_v56 = vadd.f32 %v2440_v51, %v2275_v17 }
0x10d6   : > { %v2525_v42 = vpop.xlane.xlu0 %2524 }
0x10d7   : > { %3443 = vrcp.f32 %v2525_v42 }
0x10db   : > { %v2408_v19 = vpop.f32.mrf.mxu3 }
0x10dc   : > { %3170 = vmatmul.msk.f32.gmra.mxu0 %vm845_vm14, %v2408_v19 }
0x10dd   : > { %v3444_v21 = vpop.eup %3443 }
0x10de   : > { %v2533_v14 = vmul.f32 %v3444_v21, %v3440_v8 }
0x10e0   : > { %3179 = vmatmul.msk.f32.gmra.mxu2 %vm887_vm15, %v2533_v14 }
0x10e3   : > { %v2606_v55 = vpop.f32.mrf.mxu3  ;;  %v2528_v5 = vpop.xlane.xlu1 %2527 }
0x10e4   : > { %v2615_v33 = vadd.f32 %v2606_v55, %v2446_v28  ;;  %3445 = vrcp.f32 %v2528_v5 }
0x10e6   : > { %v2618_v34 = vadd.f32 %v2615_v33, %v4139_v46 }
0x10e8   : > { %v4366_v35 = vadd.f32 %v3314_v18, %v2618_v34 }
0x10ea   : > { %v3446_v36 = vpop.eup %3445  ;;  %v2633_v60 = vsel %vm700_vm3, %v4366_v35, 0.0 }
0x10eb   : > { %2634 = vadd.xlane.f32.xlu0 %v2633_v60  ;;  %v2534_v25 = vmul.f32 %v3446_v36, %v3442_v1  ;;  %v3202_v60 = vld [vmem:[%s4626_s4 + $0x78] sm:$0xff] }
0x10ec   : > { %2902 = vmatpush.msrb.mxu1 %v3202_v60 }
0x10ed   : > { %3180 = vmatmul.msk.f32.gmra.mxu2 %vm887_vm15, %v2534_v25  ;;  %v3201_v25 = vld [vmem:[%s4626_s4 + $0x70] sm:$0xff] }
0x10ee   : > { %2903 = vmatpush.msrb.mxu1 %v3201_v25 }
0x1159   : > { %v2443_v41 = vpop.f32.mrf.mxu0 }
0x115a   : > { %v2448_v0 = vadd.f32 %v2443_v41, %v2278_v7 }
0x115e   : > { %v2635_v22 = vpop.xlane.xlu0 %2634 }
0x115f   : > { %v2642_v29 = vmul.f32 %v2635_v22, %v3781_v39  ;;  %v3200_v22 = vld [vmem:[%s4626_s4 + $0x68] sm:$0xff] }
0x1160   : > { %2904 = vmatpush.msrb.mxu1 %v3200_v22 }
0x1161   : > { %v2645_v38 = vsub.f32 %v4366_v35, %v2642_v29  ;;  %v3199_v29 = vld [vmem:[%s4626_s4 + $0x60] sm:$0xff] }
0x1162   : > { %2905 = vmatpush.msrb.mxu1 %v3199_v29 }
0x1163   : > { %v2574_v43 = vpop.f32.mrf.mxu2  ;;  %v2648_v44 = vmul.f32 %v2645_v38, %v2645_v38 }
0x1164   : > { %3182 = vmatmul.msk.f32.gmra.mxu3 %vm845_vm14, %v2574_v43 }
0x1165   : > { %v2651_v46 = vsel %vm700_vm3, %v2648_v44, 0.0  ;;  %v3198_v44 = vld [vmem:[%s4626_s4 + $0x58] sm:$0xff] }
0x1166   : > { %2652 = vadd.xlane.f32.xlu2 %v2651_v46  ;;  %2906 = vmatpush.msrb.mxu1 %v3198_v44 }
0x1170   : > { %v2577_v63 = vpop.f32.mrf.mxu2 }
0x1171   : > { %3183 = vmatmul.msk.f32.gmra.mxu3 %vm845_vm14, %v2577_v63  ;;  %v3197_v63 = vld [vmem:[%s4626_s4 + $0x50] sm:$0xff] }
0x1172   : > { %2907 = vmatpush.msrb.mxu1 %v3197_v63 }
0x1174   : > { %2908 = vmatpush.msrb.mxu1 %v3196_v47 }
0x11d9   : > { %v2653_v48 = vpop.xlane.xlu2 %2652 }
0x11da   : > { %v2660_v32 = vmul.f32 %v2653_v48, %v3781_v39  ;;  %v3195_v48 = vld [vmem:[%s4626_s4 + $0x40] sm:$0xff]  ;;  %s3495_s4 = scalar_lea.hbm %s3494_s20, 1 }
0x11db   : > { %2909 = vmatpush.msrb.mxu1 %v3195_v48  ;;  %p3496_p11 = scmp.ne.s32.totalorder %s3494_s20, %s3495_s4  ;;  %p3501_p1 = scmp.lt.s32.totalorder %s3499_s27, %s3495_s4 }
0x11dc   : > { %v2663_v50 = vadd.f32 1e-05, %v2660_v32 }
0x11dd   : > { %p3497_p12 = pnand %p3496_p11, %p3710_p5  ;;  %p3502_p2 = por %p3501_p1, %p3500_p0 }
0x11de   : > { %3447 = vrsqrt.f32 %v2663_v50  ;;  %vm2672_vm15 = vweird.f32 %v2663_v50 }
0x11df   : > { %p3498_p13 = pneg %p3497_p12 }
0x11e1   : > { %p3503_p3 = pnand %p3502_p2, %p3498_p13 }
0x11e4   : > { %v3448_v52 = vpop.eup %3447 }
0x11e5   : > { %v2667_v54 = vmul.f32 %v3448_v52, %v2663_v50  ;;  %vm2673_vm14 = vweird.f32 %v3448_v52 }
0x11e6   : > { %vm2674_vm2 = vmor %vm2672_vm15, %vm2673_vm14 }
0x11e7   : > { %v2668_v24 = vmul.f32 %v3448_v52, %v2667_v54  ;;  %v2609_v57 = vpop.f32.mrf.mxu3 }
0x11e8   : > { %v2616_v37 = vadd.f32 %v2609_v57, %v2447_v56 }
0x11e9   : > { %v2669_v58 = vmul.f32 0.5, %v2668_v24 }
0x11ea   : > { %v2619_v59 = vadd.f32 %v2616_v37, %v4144_v49  ;;  %v4400_v49 = vld [vmem:[%s4563_s12 + $0x1] ss:$0 sm:$0xff] }
0x11eb   : > { %v2670_v31 = vsub.f32 1.5, %v2669_v58 }
0x11ec   : > { %v2627_v61 = vadd.f32 %v3314_v18, %v2619_v59 }
0x11ed   : > { %v2671_v62 = vmul.f32 %v3448_v52, %v2670_v31 }
0x11ee   : > { %v2636_v27 = vsel %vm700_vm3, %v2627_v61, 0.0 }
0x11ef   : > { %v2675_v40 = vsel %vm2674_vm2, %v3448_v52, %v2671_v62  ;;  %2637 = vadd.xlane.f32.xlu1 %v2636_v27 }
0x11f0   : > { %v2696_v3 = vmul.f32 %v2675_v40, %v2645_v38 }
0x11f2   : > { %v2702_v8 = vmul.f32 %v4394_v2, %v2696_v3 }
0x11f4   : > { %v2612_v9 = vpop.f32.mrf.mxu3  ;;  %v2708_v10 = vadd.f32 %v4400_v49, %v2702_v8 }
0x11f5   : > { %v2617_v11 = vadd.f32 %v2612_v9, %v2448_v0 }
0x11f6   : > { %3192 = vmatmul.msk.f32.vlgmr.msrb.gmra.mxu0 %vm700_vm3, %v2708_v10 }
0x11f7   : > { %v2620_v1 = vadd.f32 %v2617_v11, %v4149_v53  ;;  %v4419_v53 = vld [vmem:[%s4565_s14 + $0x1] ss:$0 sm:$0xff] }
0x11f9   : > { %v2628_v12 = vadd.f32 %v3314_v18, %v2620_v1 }
0x11fb   : > { %v2639_v13 = vsel %vm685_vm1, %v2628_v12, 0.0 }
0x11fc   : > { %2640 = vadd.xlane.f32.xlu0 %v2639_v13 }
0x1262   : > { %v2638_v15 = vpop.xlane.xlu1 %2637 }
0x1263   : > { %v2643_v42 = vmul.f32 %v2638_v15, %v3781_v39 }
0x1265   : > { %v4410_v19 = vsub.f32 %v2627_v61, %v2643_v42 }
0x1267   : > { %v2649_v6 = vmul.f32 %v4410_v19, %v4410_v19 }
0x1269   : > { %v2654_v16 = vsel %vm700_vm3, %v2649_v6, 0.0 }
0x126a   : > { %2655 = vadd.xlane.f32.xlu2 %v2654_v16 }
0x126f   : > { %v2641_v21 = vpop.xlane.xlu0 %2640 }
0x1270   : > { %v2644_v14 = vmul.f32 %v2641_v21, %v3781_v39 }
0x1272   : > { %v4421_v23 = vsub.f32 %v2628_v12, %v2644_v14 }
0x1273   : > { %v2747_v26 = vpop.f32.mrf.mxu0 }
0x1274   : > { %v2748_v28 = vadd.f32 %v4419_v53, %v2747_v26  ;;  %v2650_v55 = vmul.f32 %v4421_v23, %v4421_v23 }
0x1276   : > { %v2759_v5 = vmul.f32 0.70710677, %v2748_v28  ;;  %v2657_v33 = vsel %vm685_vm1, %v2650_v55, 0.0  ;;  %v2756_v0 = vmul.f32 0.5, %v2748_v28 }
0x1277   : > { %2658 = vadd.xlane.f32.xlu1 %v2657_v33 }
0x1278   : > { %v2768_v18 = vand.u32 2147483647, %v2759_v5  ;;  %vm2762_vm5 = vcmp.ge.f32.partialorder %v2759_v5, 0.0 }
0x1279   : > { %v2765_v7 = vsel %vm2762_vm5, 1.0, %v3558_v4 }
0x127a   : > { %v2771_v34 = vmul.f32 0.3275911, %v2768_v18  ;;  %v2849_v17 = vsub.f32 0.0, %v2768_v18 }
0x127c   : > { %v2774_v36 = vadd.f32 1.0, %v2771_v34  ;;  %v2852_v24 = vmul.f32 %v2849_v17, %v2768_v18 }
0x127e   : > { %3449 = vrcp.f32 %v2774_v36  ;;  %v2788_v20 = vand.u32 2147483648, %v2774_v36  ;;  %v2786_v30 = vand.u32 2147483647, %v2774_v36  ;;  %vm2782_vm11 = vweird.f32 %v2774_v36 }
0x127f   : > { %v2855_v58 = vmul.f32 1.442695, %v2852_v24 }
0x1280   : > { %v2789_v50 = vor.u32 1.1754944e-38, %v2788_v20  ;;  %vm2787_vm13 = vcmp.eq.f32.partialorder %v2786_v30, 8.507059e+37 }
0x1281   : > { %3451 = vpow2.f32 %v2855_v58 }
0x1284   : > { %v3450_v38 = vpop.eup %3449 }
0x1285   : > { %v2778_v43 = vmul.f32 %v3450_v38, %v2774_v36  ;;  %vm2783_vm4 = vweird.f32 %v3450_v38 }
0x1286   : > { %vm2784_vm12 = vmor %vm2782_vm11, %vm2783_vm4 }
0x1287   : > { %v2779_v46 = vsub.f32 1.0, %v2778_v43  ;;  %v3452_v40 = vpop.eup %3451 }
0x1289   : > { %v2780_v45 = vmul.f32 %v3450_v38, %v2779_v46  ;;  %v3318_v46 = vld [vmem:[%s4567_s16 + $0x1] ss:$0 sm:$0xff] }
0x128b   : > { %v2781_v32 = vadd.f32 %v3450_v38, %v2780_v45 }
0x128d   : > { %v2785_v51 = vsel %vm2784_vm12, %v3450_v38, %v2781_v32 }
0x128e   : > { %v2790_v52 = vsel %vm2787_vm13, %v2789_v50, %v2785_v51 }
0x128f   : > { %v2822_v54 = vmul.f32 1.0614054, %v2790_v52 }
0x1291   : > { %v2825_v56 = vadd.f32 -1.4531521, %v2822_v54 }
0x1293   : > { %v2828_v57 = vmul.f32 %v2825_v56, %v2790_v52 }
0x1295   : > { %v2831_v37 = vadd.f32 1.4214138, %v2828_v57 }
0x1297   : > { %v2834_v59 = vmul.f32 %v2831_v37, %v2790_v52 }
0x1299   : > { %v2837_v31 = vadd.f32 -0.28449672, %v2834_v59 }
0x129b   : > { %v2840_v61 = vmul.f32 %v2837_v31, %v2790_v52 }
0x129d   : > { %v2843_v62 = vadd.f32 0.2548296, %v2840_v61 }
0x129f   : > { %v2846_v27 = vmul.f32 %v2843_v62, %v2790_v52 }
0x12a1   : > { %v2861_v41 = vmul.f32 %v3452_v40, %v2846_v27 }
0x12a3   : > { %v2864_v3 = vsub.f32 1.0, %v2861_v41 }
0x12a5   : > { %v2867_v8 = vmul.f32 %v2864_v3, %v2765_v7 }
0x12a7   : > { %v2870_v9 = vadd.f32 1.0, %v2867_v8 }
0x12a9   : > { %v2873_v10 = vmul.f32 %v2870_v9, %v2756_v0 }
0x12ab   : > { %3203 = vmatmul.msk.f32.vlgmr.msrb.gmra.mxu1 %vm650_vm0, %v2873_v10 }
0x12dd   : > { %v2656_v11 = vpop.xlane.xlu2 %2655 }
0x12de   : > { %v2661_v1 = vmul.f32 %v2656_v11, %v3781_v39 }
0x12e0   : > { %v2664_v12 = vadd.f32 1e-05, %v2661_v1 }
0x12e2   : > { %3453 = vrsqrt.f32 %v2664_v12  ;;  %vm2682_vm7 = vweird.f32 %v2664_v12 }
0x12e8   : > { %v3454_v13 = vpop.eup %3453 }
0x12e9   : > { %v2677_v15 = vmul.f32 %v3454_v13, %v2664_v12  ;;  %vm2683_vm6 = vweird.f32 %v3454_v13 }
0x12ea   : > { %v2659_v42 = vpop.xlane.xlu1 %2658  ;;  %vm2684_vm8 = vmor %vm2682_vm7, %vm2683_vm6 }
0x12eb   : > { %v2678_v6 = vmul.f32 %v3454_v13, %v2677_v15  ;;  %v2662_v16 = vmul.f32 %v2659_v42, %v3781_v39 }
0x12ed   : > { %v2679_v21 = vmul.f32 0.5, %v2678_v6  ;;  %v2665_v14 = vadd.f32 1e-05, %v2662_v16 }
0x12ef   : > { %v2680_v26 = vsub.f32 1.5, %v2679_v21  ;;  %3455 = vrsqrt.f32 %v2665_v14  ;;  %vm2692_vm10 = vweird.f32 %v2665_v14 }
0x12f1   : > { %v2681_v28 = vmul.f32 %v3454_v13, %v2680_v26 }
0x12f3   : > { %v2685_v55 = vsel %vm2684_vm8, %v3454_v13, %v2681_v28 }
0x12f4   : > { %v2697_v5 = vmul.f32 %v2685_v55, %v4410_v19 }
0x12f5   : > { %v3456_v33 = vpop.eup %3455 }
0x12f6   : > { %v2687_v18 = vmul.f32 %v3456_v33, %v2665_v14  ;;  %v2703_v34 = vmul.f32 %v4394_v2, %v2697_v5  ;;  %vm2693_vm9 = vweird.f32 %v3456_v33 }
0x12f7   : > { %vm2694_vm14 = vmor %vm2692_vm10, %vm2693_vm9  ;;  %vm2979_vm10 = vcmask 73728  }
0x12f8   : > { %v2688_v36 = vmul.f32 %v3456_v33, %v2687_v18  ;;  %v2709_v60 = vadd.f32 %v4400_v49, %v2703_v34 }
0x12fa   : > { %v2689_v25 = vmul.f32 0.5, %v2688_v36  ;;  %3193 = vmatmul.msk.f32.gmra.mxu0 %vm700_vm3, %v2709_v60 }
0x12fc   : > { %v2690_v22 = vsub.f32 1.5, %v2689_v25 }
0x12fe   : > { %v2691_v29 = vmul.f32 %v3456_v33, %v2690_v22 }
0x1300   : > { %v2695_v38 = vsel %vm2694_vm14, %v3456_v33, %v2691_v29 }
0x1301   : > { %v2698_v43 = vmul.f32 %v2695_v38, %v4421_v23 }
0x1303   : > { %v2704_v19 = vmul.f32 %v4394_v2, %v2698_v43 }
0x1305   : > { %v2710_v44 = vadd.f32 %v4400_v49, %v2704_v19 }
0x1307   : > { %3194 = vmatmul.msk.f32.gmra.mxu0 %vm700_vm3, %v2710_v44 }
0x1328   : > { %v2911_v63 = vpop.f32.mrf.mxu1 }
0x1329   : > { %v2918_v20 = vadd.f32 %v2911_v63, %v4366_v35 }
0x132b   : > { %v4467_v45 = vadd.f32 %v3318_v46, %v2918_v20 }
0x132d   : > { %v2927_v30 = vsel %vm685_vm1, %v4467_v45, 0.0 }
0x132e   : > { %2928 = vadd.xlane.f32.xlu0 %v2927_v30 }
0x1377   : > { %v2750_v23 = vpop.f32.mrf.mxu0 }
0x1378   : > { %v4472_v2 = vadd.f32 %v4419_v53, %v2750_v23 }
0x137a   : > { %v4475_v49 = vmul.f32 0.70710677, %v4472_v2 }
0x137c   : > { %v2769_v47 = vand.u32 2147483647, %v4475_v49  ;;  %vm2763_vm7 = vcmp.ge.f32.partialorder %v4475_v49, 0.0 }
0x137d   : > { %v2766_v30 = vsel %vm2763_vm7, 1.0, %v3558_v4 }
0x137e   : > { %v2772_v48 = vmul.f32 0.3275911, %v2769_v47  ;;  %v2850_v62 = vsub.f32 0.0, %v2769_v47 }
0x1380   : > { %v2775_v32 = vadd.f32 1.0, %v2772_v48  ;;  %v2853_v8 = vmul.f32 %v2850_v62, %v2769_v47 }
0x1382   : > { %3457 = vrcp.f32 %v2775_v32  ;;  %v2803_v37 = vand.u32 2147483648, %v2775_v32  ;;  %v2801_v59 = vand.u32 2147483647, %v2775_v32  ;;  %vm2797_vm2 = vweird.f32 %v2775_v32 }
0x1383   : > { %v2857_v13 = vmul.f32 1.442695, %v2853_v8 }
0x1384   : > { %v2753_v50 = vpop.f32.mrf.mxu0  ;;  %vm2802_vm11 = vcmp.eq.f32.partialorder %v2801_v59, 8.507059e+37 }
0x1385   : > { %v4479_v35 = vadd.f32 %v4419_v53, %v2753_v50  ;;  %v2804_v53 = vor.u32 1.1754944e-38, %v2803_v37 }
0x1387   : > { %v4482_v51 = vmul.f32 0.70710677, %v4479_v35  ;;  %v2758_v37 = vmul.f32 0.5, %v4479_v35  ;;  %v2951_v35 = vld [vmem:[%s4570_s19] sm:$0xff] }
0x1388   : > { %v3458_v52 = vpop.eup %3457 }
0x1389   : > { %v2793_v17 = vmul.f32 %v3458_v52, %v2775_v32  ;;  %v2770_v54 = vand.u32 2147483647, %v4482_v51  ;;  %vm2798_vm15 = vweird.f32 %v3458_v52 }
0x138a   : > { %vm2799_vm4 = vmor %vm2797_vm2, %vm2798_vm15 }
0x138b   : > { %v2794_v56 = vsub.f32 1.0, %v2793_v17  ;;  %v2773_v24 = vmul.f32 0.3275911, %v2770_v54  ;;  %v2851_v14 = vsub.f32 0.0, %v2770_v54 }
0x138d   : > { %v2795_v57 = vmul.f32 %v3458_v52, %v2794_v56  ;;  %v2776_v58 = vadd.f32 1.0, %v2773_v24  ;;  %v2854_v36 = vmul.f32 %v2851_v14, %v2770_v54 }
0x138f   : > { %3459 = vrcp.f32 %v2776_v58  ;;  %v2796_v31 = vadd.f32 %v3458_v52, %v2795_v57  ;;  %v2818_v10 = vand.u32 2147483648, %v2776_v58  ;;  %v2816_v12 = vand.u32 2147483647, %v2776_v58 }
0x1390   : > { %vm2812_vm13 = vweird.f32 %v2776_v58  ;;  %3461 = vpow2.f32 %v2857_v13  ;;  %v2859_v44 = vmul.f32 1.442695, %v2854_v36  ;;  %v2955_v13 = vld [vmem:[%s4635_s22] sm:$0x1] }
0x1391   : > { %v2800_v61 = vsel %vm2799_vm4, %v3458_v52, %v2796_v31  ;;  %v2819_v6 = vor.u32 1.1754944e-38, %v2818_v10  ;;  %vm2817_vm6 = vcmp.eq.f32.partialorder %v2816_v12, 8.507059e+37  ;;  %v2926_v10 = vld [vmem:[%s4569_s18] sm:$0x1] }
0x1392   : > { %v2805_v27 = vsel %vm2802_vm11, %v2804_v53, %v2800_v61  ;;  %3463 = vpow2.f32 %v2859_v44 }
0x1393   : > { %v2823_v40 = vmul.f32 1.0614054, %v2805_v27 }
0x1395   : > { %v3460_v41 = vpop.eup %3459  ;;  %v2826_v7 = vadd.f32 -1.4531521, %v2823_v40 }
0x1396   : > { %v2808_v3 = vmul.f32 %v3460_v41, %v2776_v58  ;;  %vm2813_vm12 = vweird.f32 %v3460_v41  ;;  %v3462_v29 = vpop.eup %3461 }
0x1397   : > { %v2829_v9 = vmul.f32 %v2826_v7, %v2805_v27  ;;  %vm2814_vm5 = vmor %vm2812_vm13, %vm2813_vm12 }
0x1398   : > { %v2809_v0 = vsub.f32 1.0, %v2808_v3  ;;  %v3464_v17 = vpop.eup %3463 }
0x1399   : > { %v2832_v1 = vadd.f32 1.4214138, %v2829_v9 }
0x139a   : > { %v2810_v11 = vmul.f32 %v3460_v41, %v2809_v0  ;;  %v2925_v0 = vld [vmem:[%s4568_s17] sm:$0x1] }
0x139b   : > { %v2835_v15 = vmul.f32 %v2832_v1, %v2805_v27 }
0x139c   : > { %v2811_v42 = vadd.f32 %v3460_v41, %v2810_v11 }
0x139d   : > { %v2838_v16 = vadd.f32 -0.28449672, %v2835_v15 }
0x139e   : > { %v2815_v21 = vsel %vm2814_vm5, %v3460_v41, %v2811_v42 }
0x139f   : > { %v2820_v26 = vsel %vm2817_vm6, %v2819_v6, %v2815_v21  ;;  %v2841_v28 = vmul.f32 %v2838_v16, %v2805_v27 }
0x13a0   : > { %v2824_v55 = vmul.f32 1.0614054, %v2820_v26 }
0x13a1   : > { %v2929_v5 = vpop.xlane.xlu0 %2928  ;;  %v2844_v18 = vadd.f32 0.2548296, %v2841_v28 }
0x13a2   : > { %v2930_v33 = vmul.f32 %v2929_v5, %v3781_v39  ;;  %v2827_v34 = vadd.f32 -1.4531521, %v2824_v55 }
0x13a3   : > { %v2847_v25 = vmul.f32 %v2844_v18, %v2805_v27 }
0x13a4   : > { %v2931_v60 = vsub.f32 %v4467_v45, %v2930_v33  ;;  %v2830_v22 = vmul.f32 %v2827_v34, %v2820_v26  ;;  %v2757_v45 = vmul.f32 0.5, %v4472_v2  ;;  %v2954_v2 = vld [vmem:[%s4570_s19 + $0x18] sm:$0xff] }
0x13a5   : > { %v2862_v43 = vmul.f32 %v3462_v29, %v2847_v25  ;;  %2971 = vmatpush.msrb.mxu2 %v2954_v2 }
0x13a6   : > { %v2932_v38 = vmul.f32 %v2931_v60, %v2931_v60  ;;  %v2833_v19 = vadd.f32 1.4214138, %v2830_v22 }
0x13a7   : > { %v2865_v63 = vsub.f32 1.0, %v2862_v43 }
0x13a8   : > { %v2933_v46 = vsel %vm685_vm1, %v2932_v38, 0.0  ;;  %v2836_v20 = vmul.f32 %v2833_v19, %v2820_v26  ;;  %vm2764_vm1 = vcmp.ge.f32.partialorder %v4482_v51, 0.0  ;;  %v2953_v51 = vld [vmem:[%s4570_s19 + $0x10] sm:$0xff] }
0x13a9   : > { %2934 = vadd.xlane.f32.xlu2 %v2933_v46  ;;  %v2868_v23 = vmul.f32 %v2865_v63, %v2766_v30  ;;  %v2767_v24 = vsel %vm2764_vm1, 1.0, %v3558_v4  ;;  %v2952_v4 = vld [vmem:[%s4570_s19 + $0x8] sm:$0xff]  ;;  %2972 = vmatpush.msrb.mxu2 %v2953_v51 }
0x13aa   : > { %v2839_v47 = vadd.f32 -0.28449672, %v2836_v20 }
0x13ab   : > { %v2871_v48 = vadd.f32 1.0, %v2868_v23  ;;  %2973 = vmatpush.msrb.mxu2 %v2952_v4 }
0x13ac   : > { %v2842_v32 = vmul.f32 %v2839_v47, %v2820_v26 }
0x13ad   : > { %v2874_v50 = vmul.f32 %v2871_v48, %v2757_v45  ;;  %2974 = vmatpush.msrb.mxu2 %v2951_v35 }
0x13ae   : > { %v2845_v49 = vadd.f32 0.2548296, %v2842_v32 }
0x13af   : > { %3204 = vmatmul.msk.f32.gmra.mxu1 %vm650_vm0, %v2874_v50 }
0x13b0   : > { %v2848_v52 = vmul.f32 %v2845_v49, %v2820_v26 }
0x13b2   : > { %v2863_v54 = vmul.f32 %v3464_v17, %v2848_v52 }
0x13b4   : > { %v2866_v56 = vsub.f32 1.0, %v2863_v54 }
0x13b6   : > { %v2869_v57 = vmul.f32 %v2866_v56, %v2767_v24 }
0x13b8   : > { %v2872_v58 = vadd.f32 1.0, %v2869_v57 }
0x13ba   : > { %v2875_v59 = vmul.f32 %v2872_v58, %v2758_v37 }
0x13bc   : > { %3205 = vmatmul.msk.f32.gmra.mxu1 %vm650_vm0, %v2875_v59 }
0x141c   : > { %v2935_v31 = vpop.xlane.xlu2 %2934 }
0x141d   : > { %v2936_v53 = vmul.f32 %v2935_v31, %v3781_v39 }
0x141f   : > { %v2937_v61 = vadd.f32 1e-05, %v2936_v53 }
0x1421   : > { %3465 = vrsqrt.f32 %v2937_v61  ;;  %vm2944_vm8 = vweird.f32 %v2937_v61 }
0x1427   : > { %v3466_v62 = vpop.eup %3465 }
0x1428   : > { %v2939_v27 = vmul.f32 %v3466_v62, %v2937_v61  ;;  %vm2945_vm0 = vweird.f32 %v3466_v62 }
0x1429   : > { %vm2946_vm9 = vmor %vm2944_vm8, %vm2945_vm0 }
0x142a   : > { %v2940_v40 = vmul.f32 %v3466_v62, %v2939_v27 }
0x142c   : > { %v2941_v41 = vmul.f32 0.5, %v2940_v40  ;;  %v2914_v3 = vpop.f32.mrf.mxu1 }
0x142e   : > { %v2942_v7 = vsub.f32 1.5, %v2941_v41 }
0x1430   : > { %v2943_v8 = vmul.f32 %v3466_v62, %v2942_v7 }
0x1432   : > { %v2947_v9 = vsel %vm2946_vm9, %v3466_v62, %v2943_v8 }
0x1433   : > { %v2948_v39 = vmul.f32 %v2947_v9, %v2931_v60 }
0x1435   : > { %v2949_v11 = vmul.f32 %v2948_v39, %v2925_v0 }
0x1437   : > { %v2950_v1 = vadd.f32 %v2949_v11, %v2926_v10 }
0x1439   : > { %v2916_v12 = vpop.f32.mrf.mxu1  ;;  %3207 = vmatmul.msk.f32.vlgmr.msrb.gmra.mxu2 %vm700_vm3, %v2950_v1 }
0x14bc   : > { %v2976_v15 = vpop.f32.mrf.mxu2 }
0x14bd   : > { %v2977_v42 = vadd.f32 %v2976_v15, %v2955_v13 }
0x14bf   : > { %2980 = vst.msk [vmem:[%s630_s3] sm:$0x1] %vm2979_vm10, %v2977_v42 }
0x14c0   : > { %3506 = shalt.err (!%p3503_p3)
}
0x14c1   : > { %3211 = dma.vmem_to_hbm [thread:$0]  (%p3710_p5), %s2993_s25, 16, %s2995_s2, %s2982_s29  }
0x14c2 PF: > { %s4637_s24 = sld [smem:[#allocation11_spill]] }
0x14c3   : > { %s4638_s23 = sld [smem:[#allocation9_spill]] }
0x14c8   : > { %p3217_p4 = scmp.ge.s32.totalorder %s4637_s24, 2 }
0x14c9   : > { %s3006_s3 = sand.u32 1, %s4638_s23  }
0x14ca   : > { %p3214_p7 = pnand %p3217_p4, %p3714_p6  ;;  %s3007_s15 = scalar_lea.sflag [#allocation6], %s3006_s3 }
0x14cc   : > { %p3215_p8 = pneg %p3214_p7 }
0x14ce   : > { %3526 = dma.done.wait (%p3215_p8), %s3007_s15, 16  }
0x14cf   : > { %3528 = vsyncadd (%p3215_p8), %s3007_s15, 4294967280  ;;  %s4640_s0 = sld [smem:[#allocation12_spill]]  ;;  %s4643_s3 = smov %s3535_s28 }
0x14d0   : > { %s4641_s4 = sld [smem:[#allocation10_spill]] }
0x14d1   : > { %s4642_s29 = sld [smem:[#allocation13_spill]] }
0x14d5   : > { %p39_p9 = scmp.ge.s32.totalorder %s4640_s0, 4  }
0x14d6   : > { %s4644_s28 = smov %s4641_s4 }
0x14d7   :  { %41 = sbr.rel (!%p39_p9) target bundleno = 23 (0x17), region = 146 }
0x14dc   :  { %3012 = vsyncpa [#allocation6], 1 }
0x14dd   :  { %3014 = vsyncpa [#allocation6 + $0x1], 1 }

</bundles_post_ra>
